<compile_context>
chip_gen: v5e
topology: v5e:2x2
jax: 0.10.0
libtpu: 0.0.40
codegen_flags: <defaults>
</compile_context>

<pallas_src>
import numpy as np
import jax
import jax.numpy as jnp
from jax.experimental import pallas as pl
from jax.experimental.pallas import tpu as pltpu

_CONV_NAMES = ("conv1_1", "conv1_2", "conv2_1", "conv2_2", "conv3_1", "conv3_2")
_CONV_STRIDES = (1, 2, 2, 1, 2, 1)
_LANE = 128
_N_CLASSES = 10


def _round_up(n, m=_LANE):
    return ((n + m - 1) // m) * m


def _conv_plan(input_hw):
    """Static per-layer layout plan.

    Activation layout after every layer: (C, N) with the value of output pixel
    (i, j) stored at lane (i+1)*P + s*(j+1), where
      s = W spacing (1, 2, 4, 8 ... the stride-2 W-subsample is folded into the
          spacing instead of compacting lanes -> no selection matmul needed),
      P = row pitch = s*(w+2) (rows 0 and h+1 are zero pad rows),
      N = round_up((h+2)*P, 128).
    H *is* compacted after every layer, so lane counts shrink with the image.
    """
    h = w = input_hw
    s = 1
    P = s * (w + 2)
    cfgs = []
    for li, sigma in enumerate(_CONV_STRIDES):
        h_in, w_in, s_in, P_in = h, w, s, P
        N_in = _round_up((h_in + 2) * P_in)
        # Every tap is a static lane slice of a 128-lane zero-extended copy.
        assert 2 * P_in + 2 * s_in <= _LANE, (
            "tap offset exceeds the 128-lane zero extension; input_hw too large "
            "for the dilated-W layout")
        assert P_in == s_in * (w_in + 2)
        h_out, w_out = h_in // sigma, w_in // sigma
        s_out = s_in * sigma
        last = li == len(_CONV_STRIDES) - 1
        if last:                       # fc1 consumes the offset layout directly
            P_out, N_out = P_in, N_in
        else:
            P_out = s_out * (w_out + 2)
            N_out = _round_up((h_out + 2) * P_out)
        cfgs.append(dict(sigma=sigma, h_in=h_in, w_in=w_in, s_in=s_in, P_in=P_in,
                         N_in=N_in, h_out=h_out, w_out=w_out, s_out=s_out,
                         P_out=P_out, N_out=N_out, last=last))
        h, w, s, P = h_out, w_out, s_out, P_out
    return cfgs


# ----------------------------------------------------------------------------
# In-kernel helpers (fully unrolled at trace time; everything stays in VMEM)
# ----------------------------------------------------------------------------
def _shift_taps(a, P_in, s_in):
    """9 shifted copies of a (Cin, N) activation; tap t=(kh,kw) reads lane
    p + kh*P_in + kw*s_in (static slice of a 128-lane zero-extended copy)."""
    cin, n = a.shape
    ext = jnp.concatenate([a, jnp.zeros((cin, _LANE), a.dtype)], axis=1)
    taps = []
    for t in range(9):
        kh, kw = divmod(t, 3)
        off = kh * P_in + kw * s_in
        taps.append(a if off == 0 else ext[:, off:off + n])
    return taps


def _conv3x3_relu(a, w_ref, b_ref, P_in, s_in):
    """3x3 conv + bias + ReLU in 'offset layout': the value for output pixel
    (i, j) of a stride-sigma conv lands at lane sigma*i*P_in + sigma*s_in*j.
    All 9 taps are folded into ONE MXU matmul with K = 9*Cin (VPU broadcast
    path only for Cin == 1)."""
    cin = a.shape[0]
    taps = _shift_taps(a, P_in, s_in)
    if cin == 1:
        acc = None
        for t in range(9):
            part = w_ref[:, t:t + 1] * taps[t]          # (Cout,1)*(1,N) broadcast
            acc = part if acc is None else acc + part
    else:
        stack = jnp.concatenate(taps, axis=0)           # (9*Cin, N) im2col stack
        acc = jnp.dot(w_ref[...], stack, preferred_element_type=jnp.float32)
    return jnp.maximum(acc + b_ref[...], 0.0)


def _reposition_stride1(y, mask_ref, P, s, n):
    """Offset layout -> next layer's layout for sigma=1 (same pitch/spacing):
    one constant right shift by P+s plus a precomputed valid-position mask."""
    c = y.shape[0]
    d = P + s
    shifted = jnp.concatenate([jnp.zeros((c, d), y.dtype), y[:, :n - d]], axis=1)
    return shifted * mask_ref[...]


def _reposition_stride2(y, cfg):
    """Offset layout -> next layer's layout for sigma=2: H is re-compacted with
    one static contiguous lane slice per output row (the W stride is already
    folded into the spacing, so each row is a pure shift); zero pad rows / pad
    cols / lane tail come from the interleaved zero pieces of a single concat."""
    c = y.shape[0]
    sig, P_in = cfg["sigma"], cfg["P_in"]
    h_o, w_o, s_o = cfg["h_out"], cfg["w_out"], cfg["s_out"]
    P_o, N_o = cfg["P_out"], cfg["N_out"]
    span = s_o * (w_o - 1) + 1
    zeros = lambda width: jnp.zeros((c, width), y.dtype)
    pieces = [zeros(P_o + s_o)]                          # top pad row + left pad col
    for i in range(h_o):
        src = sig * i * P_in
        pieces.append(y[:, src:src + span])
        if i + 1 < h_o:
            pieces.append(zeros(P_o - span))             # right pad .. next left pad
    pieces.append(zeros((P_o - s_o - span) + P_o + (N_o - (h_o + 2) * P_o)))
    return jnp.concatenate(pieces, axis=1)


def _build_padded_input(img, P0, N0):
    """(H, W) image -> (1, N0) zero-padded flat layout (pad done in-kernel)."""
    h, w = img.shape
    zeros = lambda width: jnp.zeros((1, width), img.dtype)
    pieces = [zeros(P0 + 1)]                             # top pad row + left pad col
    for i in range(h):
        pieces.append(img[i:i + 1, :])
        if i + 1 < h:
            pieces.append(zeros(2))                      # right pad + next left pad
    pieces.append(zeros(N0 - (P0 + 1) - h * w - (h - 1) * 2))
    return jnp.concatenate(pieces, axis=1)


def _make_kernel(cfgs):
    n_conv = len(cfgs)

    def kernel(*refs):
        x_ref = refs[0]
        conv_refs = refs[1:1 + 3 * n_conv]
        fw1, fb1, fw2, fb2, fw3, fb3 = refs[1 + 3 * n_conv:-1]
        out_ref = refs[-1]

        cfg0 = cfgs[0]
        a = _build_padded_input(x_ref[0, 0], cfg0["P_in"], cfg0["N_in"])
        for li, cfg in enumerate(cfgs):
            w_ref, b_ref, aux_ref = conv_refs[3 * li:3 * li + 3]
            y = _conv3x3_relu(a, w_ref, b_ref, cfg["P_in"], cfg["s_in"])
            if cfg["last"]:
                a = y                                    # fc1 reads offset layout
            elif cfg["sigma"] == 1:
                a = _reposition_stride1(y, aux_ref, cfg["P_in"], cfg["s_in"],
                                        cfg["N_in"])
            else:
                a = _reposition_stride2(y, cfg)

        # ---- FC head (dropout is identity in eval mode) ----
        last = cfgs[-1]
        sp, s5, P5 = last["h_out"], last["s_out"], last["P_in"]
        c3 = conv_refs[3 * (n_conv - 1)].shape[0]
        piece_w = s5 * sp
        pieces = [a[c:c + 1, i * P5:i * P5 + piece_w]
                  for c in range(c3) for i in range(sp)]
        z = jnp.concatenate(pieces, axis=1)              # (1, c3*sp*piece_w)
        z = jnp.maximum(
            jnp.dot(z, fw1[...], preferred_element_type=jnp.float32) + fb1[...], 0.0)
        z = jnp.maximum(
            jnp.dot(z, fw2[...], preferred_element_type=jnp.float32) + fb2[...], 0.0)
        z = jnp.dot(z, fw3[...], preferred_element_type=jnp.float32) + fb3[...]
        out_ref[0] = z                                   # (1, 128) lane-dense store

    return kernel


# ----------------------------------------------------------------------------
# One-time parameter packing (host side)
# ----------------------------------------------------------------------------
def _valid_mask(cfg):
    h, w, s, P, N = (cfg["h_out"], cfg["w_out"], cfg["s_out"],
                     cfg["P_out"], cfg["N_out"])
    m = np.zeros((1, N), np.float32)
    for i in range(h):
        for j in range(w):
            m[0, (i + 1) * P + s * (j + 1)] = 1.0
    return m


def pack_params(params, input_hw=32):
    cfgs = _conv_plan(input_hw)
    packed = []
    for name, cfg in zip(_CONV_NAMES, cfgs):
        w, b = params[name]
        w = np.asarray(w, np.float32)                    # (Cout, Cin, 3, 3) OIHW
        cout, cin = w.shape[:2]
        wmat = np.zeros((cout, 9 * cin), np.float32)     # column t*Cin+c = w[:,c,kh,kw]
        for t in range(9):
            kh, kw = divmod(t, 3)
            wmat[:, t * cin:(t + 1) * cin] = w[:, :, kh, kw]
        packed.append(wmat)
        packed.append(np.asarray(b, np.float32).reshape(-1, 1))
        if cfg["sigma"] == 1 and not cfg["last"]:
            packed.append(_valid_mask(cfg))              # (1, N_out) 0/1 constant
        else:
            packed.append(np.zeros((1, 1), np.float32))  # unused dummy aux

    # fc1 rows (torch.flatten(NCHW) order) re-indexed to the conv3_2 offset
    # layout gathered in-kernel (piece (c, i) covers lanes i*P5 .. i*P5+s5*sp).
    last = cfgs[-1]
    sp, s5 = last["h_out"], last["s_out"]
    piece_w = s5 * sp
    w1, b1 = params["fc1"]
    w1 = np.asarray(w1, np.float32)
    c3 = np.asarray(params["conv3_2"][0]).shape[0]
    assert w1.shape[0] == c3 * sp * sp, "input_hw inconsistent with fc1 width"
    fc1_mat = np.zeros((c3 * sp * piece_w, w1.shape[1]), np.float32)
    for c in range(c3):
        for i in range(sp):
            for j in range(sp):
                fc1_mat[(c * sp + i) * piece_w + s5 * j, :] = \
                    w1[(c * sp + i) * sp + j, :]
    packed.append(fc1_mat)
    packed.append(np.asarray(b1, np.float32).reshape(1, -1))

    w2, b2 = params["fc2"]
    packed.append(np.asarray(w2, np.float32))
    packed.append(np.asarray(b2, np.float32).reshape(1, -1))

    # Output head padded to a lane-dense 128-wide store ([:, :10] sliced outside).
    w3, b3 = params["out"]
    w3 = np.asarray(w3, np.float32)
    b3 = np.asarray(b3, np.float32)
    w3p = np.zeros((w3.shape[0], _LANE), np.float32)
    w3p[:, :w3.shape[1]] = w3
    b3p = np.zeros((1, _LANE), np.float32)
    b3p[0, :b3.shape[0]] = b3
    packed.append(w3p)
    packed.append(b3p)
    return [jnp.asarray(p) for p in packed]


# ----------------------------------------------------------------------------
# Forward pass (eval mode)
# ----------------------------------------------------------------------------
def _const_index_map(nd):
    def index_map(i):
        return (0,) * nd
    return index_map


@jax.jit
def simple_model_forward(packed, x_nchw):
    bsz, cin0, h, w = x_nchw.shape
    assert h == w and cin0 == 1, "simple_model expects (B, 1, H, H) inputs"
    cfgs = _conv_plan(h)
    x = x_nchw.astype(jnp.float32)

    # Advisory cost hint for XLA's scheduler around this latency-bound call.
    conv_wmats = packed[0:3 * len(cfgs):3]
    conv_flops = sum(2 * wm.shape[0] * wm.shape[1] * c["N_in"]
                     for wm, c in zip(conv_wmats, cfgs))
    fc_flops = 2 * (packed[-6].shape[0] * packed[-6].shape[1]
                    + packed[-4].shape[0] * packed[-4].shape[1]
                    + packed[-2].shape[0] * packed[-2].shape[1])
    cost = pl.CostEstimate(
        flops=int(bsz * (conv_flops + fc_flops)),
        transcendentals=0,
        bytes_accessed=int(x.size * 4 + sum(int(p.size) * 4 for p in packed)
                           + bsz * _LANE * 4))

    out = pl.pallas_call(
        _make_kernel(cfgs),
        out_shape=jax.ShapeDtypeStruct((bsz, 1, _LANE), jnp.float32),
        grid=(bsz,),
        in_specs=[pl.BlockSpec((1, 1, h, w), lambda i: (i, 0, 0, 0))]
                 + [pl.BlockSpec(p.shape, _const_index_map(p.ndim)) for p in packed],
        out_specs=pl.BlockSpec((1, 1, _LANE), lambda i: (i, 0, 0)),
        compiler_params=pltpu.CompilerParams(
            dimension_semantics=("parallel",),   # batch split across v7x's 2 cores
        ),
        cost_estimate=cost,
    )(x, *packed)
    return out[:, 0, :_N_CLASSES]


# ----------------------------------------------------------------------------
# Deterministic synthetic parameters + pure-XLA reference (sanity check)
# ----------------------------------------------------------------------------
def init_params(init_width=4, seed=42):
    w = init_width
    keys = jax.random.split(jax.random.PRNGKey(seed), 18)
    ki = iter(range(18))

    def conv_p(cin, cout):
        kw_ = jax.random.normal(keys[next(ki)], (cout, cin, 3, 3), jnp.float32) * 0.1
        kb_ = jax.random.normal(keys[next(ki)], (cout,), jnp.float32) * 0.05
        return kw_, kb_

    def fc_p(fin, fout):
        kw_ = jax.random.normal(keys[next(ki)], (fin, fout), jnp.float32) * 0.1
        kb_ = jax.random.normal(keys[next(ki)], (fout,), jnp.float32) * 0.05
        return kw_, kb_

    return {
        "conv1_1": conv_p(1, w), "conv1_2": conv_p(w, w),
        "conv2_1": conv_p(w, 2 * w), "conv2_2": conv_p(2 * w, 2 * w),
        "conv3_1": conv_p(2 * w, 4 * w), "conv3_2": conv_p(4 * w, 4 * w),
        "fc1": fc_p(4 * w * 4 * 4, 4 * w * 4),
        "fc2": fc_p(4 * w * 4, 4 * w),
        "out": fc_p(4 * w, 10),
    }


def reference_forward(params, x_nchw):
    hi = jax.lax.Precision.HIGHEST
    z = x_nchw.astype(jnp.float32)
    for name, stride in zip(_CONV_NAMES, _CONV_STRIDES):
        wt, b = params[name]
        z = jax.lax.conv_general_dilated(
            z, wt, window_strides=(stride, stride), padding=((1, 1), (1, 1)),
            dimension_numbers=("NCHW", "OIHW", "NCHW"), precision=hi)
        z = jax.nn.relu(z + b[None, :, None, None])
    z = z.reshape(z.shape[0], -1)                        # == torch.flatten(z, 1)
    w, b = params["fc1"]; z = jax.nn.relu(jnp.dot(z, w, precision=hi) + b)
    w, b = params["fc2"]; z = jax.nn.relu(jnp.dot(z, w, precision=hi) + b)
    w, b = params["out"]; z = jnp.dot(z, w, precision=hi) + b
    return z


if __name__ == "__main__":
    init_width = 4
    params = init_params(init_width=init_width, seed=42)
    packed = pack_params(params, input_hw=32)

    # fc1 in_features = init_width*4*4*4  ->  input is (B, 1, 32, 32)
    x = jax.random.normal(jax.random.PRNGKey(0), (2, 1, 32, 32), jnp.float32)

    logits = simple_model_forward(packed, x)
    jax.block_until_ready(logits)
    assert logits.shape == (2, _N_CLASSES), logits.shape

    # Sanity check against a plain XLA reference.
    ref = reference_forward(params, x)
    err = float(jnp.max(jnp.abs(logits - ref)))
    assert err < 2e-2, f"kernel/reference mismatch: max abs err = {err}"

    print("KERNEL_OK")
</pallas_src>

<mosaic_0001>
module attributes {stable_mosaic.version = 11 : i64} {
  func.func @kernel(%arg0: i32, %arg1: memref<1x1x32x32xf32, #tpu.memory_space<vmem>>, %arg2: memref<4x9xf32, #tpu.memory_space<vmem>>, %arg3: memref<4x1xf32, #tpu.memory_space<vmem>>, %arg4: memref<1x1280xf32, #tpu.memory_space<vmem>>, %arg5: memref<4x36xf32, #tpu.memory_space<vmem>>, %arg6: memref<4x1xf32, #tpu.memory_space<vmem>>, %arg7: memref<1x1xf32, #tpu.memory_space<vmem>>, %arg8: memref<8x36xf32, #tpu.memory_space<vmem>>, %arg9: memref<8x1xf32, #tpu.memory_space<vmem>>, %arg10: memref<1x1xf32, #tpu.memory_space<vmem>>, %arg11: memref<8x72xf32, #tpu.memory_space<vmem>>, %arg12: memref<8x1xf32, #tpu.memory_space<vmem>>, %arg13: memref<1x512xf32, #tpu.memory_space<vmem>>, %arg14: memref<16x72xf32, #tpu.memory_space<vmem>>, %arg15: memref<16x1xf32, #tpu.memory_space<vmem>>, %arg16: memref<1x1xf32, #tpu.memory_space<vmem>>, %arg17: memref<16x144xf32, #tpu.memory_space<vmem>>, %arg18: memref<16x1xf32, #tpu.memory_space<vmem>>, %arg19: memref<1x1xf32, #tpu.memory_space<vmem>>, %arg20: memref<2048x64xf32, #tpu.memory_space<vmem>>, %arg21: memref<1x64xf32, #tpu.memory_space<vmem>>, %arg22: memref<64x16xf32, #tpu.memory_space<vmem>>, %arg23: memref<1x16xf32, #tpu.memory_space<vmem>>, %arg24: memref<16x128xf32, #tpu.memory_space<vmem>>, %arg25: memref<1x128xf32, #tpu.memory_space<vmem>>, %arg26: memref<1x1x128xf32, #tpu.memory_space<vmem>>) attributes {dimension_semantics = [#tpu.dimension_semantics<parallel>], iteration_bounds = array<i64: 2>, scalar_prefetch = 0 : i64, scratch_operands = 0 : i64, tpu.core_type = #tpu.core_type<tc>, window_params = [{transform_indices = @transform_0, window_bounds = array<i64: 1, 1, 32, 32>}, {pipeline_mode = #tpu.pipeline_mode<synchronous>, transform_indices = @transform_1, window_bounds = array<i64: 4, 9>}, {pipeline_mode = #tpu.pipeline_mode<synchronous>, transform_indices = @transform_2, window_bounds = array<i64: 4, 1>}, {pipeline_mode = #tpu.pipeline_mode<synchronous>, transform_indices = @transform_3, window_bounds = array<i64: 1, 1280>}, {pipeline_mode = #tpu.pipeline_mode<synchronous>, transform_indices = @transform_4, window_bounds = array<i64: 4, 36>}, {pipeline_mode = #tpu.pipeline_mode<synchronous>, transform_indices = @transform_5, window_bounds = array<i64: 4, 1>}, {pipeline_mode = #tpu.pipeline_mode<synchronous>, transform_indices = @transform_6, window_bounds = array<i64: 1, 1>}, {pipeline_mode = #tpu.pipeline_mode<synchronous>, transform_indices = @transform_7, window_bounds = array<i64: 8, 36>}, {pipeline_mode = #tpu.pipeline_mode<synchronous>, transform_indices = @transform_8, window_bounds = array<i64: 8, 1>}, {pipeline_mode = #tpu.pipeline_mode<synchronous>, transform_indices = @transform_9, window_bounds = array<i64: 1, 1>}, {pipeline_mode = #tpu.pipeline_mode<synchronous>, transform_indices = @transform_10, window_bounds = array<i64: 8, 72>}, {pipeline_mode = #tpu.pipeline_mode<synchronous>, transform_indices = @transform_11, window_bounds = array<i64: 8, 1>}, {pipeline_mode = #tpu.pipeline_mode<synchronous>, transform_indices = @transform_12, window_bounds = array<i64: 1, 512>}, {pipeline_mode = #tpu.pipeline_mode<synchronous>, transform_indices = @transform_13, window_bounds = array<i64: 16, 72>}, {pipeline_mode = #tpu.pipeline_mode<synchronous>, transform_indices = @transform_14, window_bounds = array<i64: 16, 1>}, {pipeline_mode = #tpu.pipeline_mode<synchronous>, transform_indices = @transform_15, window_bounds = array<i64: 1, 1>}, {pipeline_mode = #tpu.pipeline_mode<synchronous>, transform_indices = @transform_16, window_bounds = array<i64: 16, 144>}, {pipeline_mode = #tpu.pipeline_mode<synchronous>, transform_indices = @transform_17, window_bounds = array<i64: 16, 1>}, {pipeline_mode = #tpu.pipeline_mode<synchronous>, transform_indices = @transform_18, window_bounds = array<i64: 1, 1>}, {pipeline_mode = #tpu.pipeline_mode<synchronous>, transform_indices = @transform_19, window_bounds = array<i64: 2048, 64>}, {pipeline_mode = #tpu.pipeline_mode<synchronous>, transform_indices = @transform_20, window_bounds = array<i64: 1, 64>}, {pipeline_mode = #tpu.pipeline_mode<synchronous>, transform_indices = @transform_21, window_bounds = array<i64: 64, 16>}, {pipeline_mode = #tpu.pipeline_mode<synchronous>, transform_indices = @transform_22, window_bounds = array<i64: 1, 16>}, {pipeline_mode = #tpu.pipeline_mode<synchronous>, transform_indices = @transform_23, window_bounds = array<i64: 16, 128>}, {pipeline_mode = #tpu.pipeline_mode<synchronous>, transform_indices = @transform_24, window_bounds = array<i64: 1, 128>}, {transform_indices = @transform_25, window_bounds = array<i64: 1, 1, 128>}]} {
    %c0 = arith.constant 0 : index
    %c0_0 = arith.constant 0 : index
    %c0_1 = arith.constant 0 : index
    %c0_2 = arith.constant 0 : index
    %0 = vector.load %arg1[%c0, %c0_0, %c0_1, %c0_2] : memref<1x1x32x32xf32, #tpu.memory_space<vmem>>, vector<1x1x32x32xf32>
    %1 = vector.shape_cast %0 : vector<1x1x32x32xf32> to vector<32x32xf32>
    %cst = arith.constant 0.000000e+00 : f32
    %2 = vector.broadcast %cst : f32 to vector<1x35xf32>
    %3 = vector.extract_strided_slice %1 {offsets = [0, 0], sizes = [1, 32], strides = [1, 1]} : vector<32x32xf32> to vector<1x32xf32>
    %cst_3 = arith.constant 0.000000e+00 : f32
    %4 = vector.broadcast %cst_3 : f32 to vector<1x2xf32>
    %5 = vector.extract_strided_slice %1 {offsets = [1, 0], sizes = [1, 32], strides = [1, 1]} : vector<32x32xf32> to vector<1x32xf32>
    %cst_4 = arith.constant 0.000000e+00 : f32
    %6 = vector.broadcast %cst_4 : f32 to vector<1x2xf32>
    %7 = vector.extract_strided_slice %1 {offsets = [2, 0], sizes = [1, 32], strides = [1, 1]} : vector<32x32xf32> to vector<1x32xf32>
    %cst_5 = arith.constant 0.000000e+00 : f32
    %8 = vector.broadcast %cst_5 : f32 to vector<1x2xf32>
    %9 = vector.extract_strided_slice %1 {offsets = [3, 0], sizes = [1, 32], strides = [1, 1]} : vector<32x32xf32> to vector<1x32xf32>
    %cst_6 = arith.constant 0.000000e+00 : f32
    %10 = vector.broadcast %cst_6 : f32 to vector<1x2xf32>
    %11 = vector.extract_strided_slice %1 {offsets = [4, 0], sizes = [1, 32], strides = [1, 1]} : vector<32x32xf32> to vector<1x32xf32>
    %cst_7 = arith.constant 0.000000e+00 : f32
    %12 = vector.broadcast %cst_7 : f32 to vector<1x2xf32>
    %13 = vector.extract_strided_slice %1 {offsets = [5, 0], sizes = [1, 32], strides = [1, 1]} : vector<32x32xf32> to vector<1x32xf32>
    %cst_8 = arith.constant 0.000000e+00 : f32
    %14 = vector.broadcast %cst_8 : f32 to vector<1x2xf32>
    %15 = vector.extract_strided_slice %1 {offsets = [6, 0], sizes = [1, 32], strides = [1, 1]} : vector<32x32xf32> to vector<1x32xf32>
    %cst_9 = arith.constant 0.000000e+00 : f32
    %16 = vector.broadcast %cst_9 : f32 to vector<1x2xf32>
    %17 = vector.extract_strided_slice %1 {offsets = [7, 0], sizes = [1, 32], strides = [1, 1]} : vector<32x32xf32> to vector<1x32xf32>
    %cst_10 = arith.constant 0.000000e+00 : f32
    %18 = vector.broadcast %cst_10 : f32 to vector<1x2xf32>
    %19 = vector.extract_strided_slice %1 {offsets = [8, 0], sizes = [1, 32], strides = [1, 1]} : vector<32x32xf32> to vector<1x32xf32>
    %cst_11 = arith.constant 0.000000e+00 : f32
    %20 = vector.broadcast %cst_11 : f32 to vector<1x2xf32>
    %21 = vector.extract_strided_slice %1 {offsets = [9, 0], sizes = [1, 32], strides = [1, 1]} : vector<32x32xf32> to vector<1x32xf32>
    %cst_12 = arith.constant 0.000000e+00 : f32
    %22 = vector.broadcast %cst_12 : f32 to vector<1x2xf32>
    %23 = vector.extract_strided_slice %1 {offsets = [10, 0], sizes = [1, 32], strides = [1, 1]} : vector<32x32xf32> to vector<1x32xf32>
    %cst_13 = arith.constant 0.000000e+00 : f32
    %24 = vector.broadcast %cst_13 : f32 to vector<1x2xf32>
    %25 = vector.extract_strided_slice %1 {offsets = [11, 0], sizes = [1, 32], strides = [1, 1]} : vector<32x32xf32> to vector<1x32xf32>
    %cst_14 = arith.constant 0.000000e+00 : f32
    %26 = vector.broadcast %cst_14 : f32 to vector<1x2xf32>
    %27 = vector.extract_strided_slice %1 {offsets = [12, 0], sizes = [1, 32], strides = [1, 1]} : vector<32x32xf32> to vector<1x32xf32>
    %cst_15 = arith.constant 0.000000e+00 : f32
    %28 = vector.broadcast %cst_15 : f32 to vector<1x2xf32>
    %29 = vector.extract_strided_slice %1 {offsets = [13, 0], sizes = [1, 32], strides = [1, 1]} : vector<32x32xf32> to vector<1x32xf32>
    %cst_16 = arith.constant 0.000000e+00 : f32
    %30 = vector.broadcast %cst_16 : f32 to vector<1x2xf32>
    %31 = vector.extract_strided_slice %1 {offsets = [14, 0], sizes = [1, 32], strides = [1, 1]} : vector<32x32xf32> to vector<1x32xf32>
    %cst_17 = arith.constant 0.000000e+00 : f32
    %32 = vector.broadcast %cst_17 : f32 to vector<1x2xf32>
    %33 = vector.extract_strided_slice %1 {offsets = [15, 0], sizes = [1, 32], strides = [1, 1]} : vector<32x32xf32> to vector<1x32xf32>
    %cst_18 = arith.constant 0.000000e+00 : f32
    %34 = vector.broadcast %cst_18 : f32 to vector<1x2xf32>
    %35 = vector.extract_strided_slice %1 {offsets = [16, 0], sizes = [1, 32], strides = [1, 1]} : vector<32x32xf32> to vector<1x32xf32>
    %cst_19 = arith.constant 0.000000e+00 : f32
    %36 = vector.broadcast %cst_19 : f32 to vector<1x2xf32>
    %37 = vector.extract_strided_slice %1 {offsets = [17, 0], sizes = [1, 32], strides = [1, 1]} : vector<32x32xf32> to vector<1x32xf32>
    %cst_20 = arith.constant 0.000000e+00 : f32
    %38 = vector.broadcast %cst_20 : f32 to vector<1x2xf32>
    %39 = vector.extract_strided_slice %1 {offsets = [18, 0], sizes = [1, 32], strides = [1, 1]} : vector<32x32xf32> to vector<1x32xf32>
    %cst_21 = arith.constant 0.000000e+00 : f32
    %40 = vector.broadcast %cst_21 : f32 to vector<1x2xf32>
    %41 = vector.extract_strided_slice %1 {offsets = [19, 0], sizes = [1, 32], strides = [1, 1]} : vector<32x32xf32> to vector<1x32xf32>
    %cst_22 = arith.constant 0.000000e+00 : f32
    %42 = vector.broadcast %cst_22 : f32 to vector<1x2xf32>
    %43 = vector.extract_strided_slice %1 {offsets = [20, 0], sizes = [1, 32], strides = [1, 1]} : vector<32x32xf32> to vector<1x32xf32>
    %cst_23 = arith.constant 0.000000e+00 : f32
    %44 = vector.broadcast %cst_23 : f32 to vector<1x2xf32>
    %45 = vector.extract_strided_slice %1 {offsets = [21, 0], sizes = [1, 32], strides = [1, 1]} : vector<32x32xf32> to vector<1x32xf32>
    %cst_24 = arith.constant 0.000000e+00 : f32
    %46 = vector.broadcast %cst_24 : f32 to vector<1x2xf32>
    %47 = vector.extract_strided_slice %1 {offsets = [22, 0], sizes = [1, 32], strides = [1, 1]} : vector<32x32xf32> to vector<1x32xf32>
    %cst_25 = arith.constant 0.000000e+00 : f32
    %48 = vector.broadcast %cst_25 : f32 to vector<1x2xf32>
    %49 = vector.extract_strided_slice %1 {offsets = [23, 0], sizes = [1, 32], strides = [1, 1]} : vector<32x32xf32> to vector<1x32xf32>
    %cst_26 = arith.constant 0.000000e+00 : f32
    %50 = vector.broadcast %cst_26 : f32 to vector<1x2xf32>
    %51 = vector.extract_strided_slice %1 {offsets = [24, 0], sizes = [1, 32], strides = [1, 1]} : vector<32x32xf32> to vector<1x32xf32>
    %cst_27 = arith.constant 0.000000e+00 : f32
    %52 = vector.broadcast %cst_27 : f32 to vector<1x2xf32>
    %53 = vector.extract_strided_slice %1 {offsets = [25, 0], sizes = [1, 32], strides = [1, 1]} : vector<32x32xf32> to vector<1x32xf32>
    %cst_28 = arith.constant 0.000000e+00 : f32
    %54 = vector.broadcast %cst_28 : f32 to vector<1x2xf32>
    %55 = vector.extract_strided_slice %1 {offsets = [26, 0], sizes = [1, 32], strides = [1, 1]} : vector<32x32xf32> to vector<1x32xf32>
    %cst_29 = arith.constant 0.000000e+00 : f32
    %56 = vector.broadcast %cst_29 : f32 to vector<1x2xf32>
    %57 = vector.extract_strided_slice %1 {offsets = [27, 0], sizes = [1, 32], strides = [1, 1]} : vector<32x32xf32> to vector<1x32xf32>
    %cst_30 = arith.constant 0.000000e+00 : f32
    %58 = vector.broadcast %cst_30 : f32 to vector<1x2xf32>
    %59 = vector.extract_strided_slice %1 {offsets = [28, 0], sizes = [1, 32], strides = [1, 1]} : vector<32x32xf32> to vector<1x32xf32>
    %cst_31 = arith.constant 0.000000e+00 : f32
    %60 = vector.broadcast %cst_31 : f32 to vector<1x2xf32>
    %61 = vector.extract_strided_slice %1 {offsets = [29, 0], sizes = [1, 32], strides = [1, 1]} : vector<32x32xf32> to vector<1x32xf32>
    %cst_32 = arith.constant 0.000000e+00 : f32
    %62 = vector.broadcast %cst_32 : f32 to vector<1x2xf32>
    %63 = vector.extract_strided_slice %1 {offsets = [30, 0], sizes = [1, 32], strides = [1, 1]} : vector<32x32xf32> to vector<1x32xf32>
    %cst_33 = arith.constant 0.000000e+00 : f32
    %64 = vector.broadcast %cst_33 : f32 to vector<1x2xf32>
    %65 = vector.extract_strided_slice %1 {offsets = [31, 0], sizes = [1, 32], strides = [1, 1]} : vector<32x32xf32> to vector<1x32xf32>
    %cst_34 = arith.constant 0.000000e+00 : f32
    %66 = vector.broadcast %cst_34 : f32 to vector<1x159xf32>
    %67 = tpu.concatenate %2, %3, %4, %5, %6, %7, %8, %9, %10, %11, %12, %13, %14, %15, %16, %17 in 1 : vector<1x35xf32>, vector<1x32xf32>, vector<1x2xf32>, vector<1x32xf32>, vector<1x2xf32>, vector<1x32xf32>, vector<1x2xf32>, vector<1x32xf32>, vector<1x2xf32>, vector<1x32xf32>, vector<1x2xf32>, vector<1x32xf32>, vector<1x2xf32>, vector<1x32xf32>, vector<1x2xf32>, vector<1x32xf32> -> vector<1x305xf32>
    %68 = tpu.concatenate %18, %19, %20, %21, %22, %23, %24, %25, %26, %27, %28, %29, %30, %31, %32, %33 in 1 : vector<1x2xf32>, vector<1x32xf32>, vector<1x2xf32>, vector<1x32xf32>, vector<1x2xf32>, vector<1x32xf32>, vector<1x2xf32>, vector<1x32xf32>, vector<1x2xf32>, vector<1x32xf32>, vector<1x2xf32>, vector<1x32xf32>, vector<1x2xf32>, vector<1x32xf32>, vector<1x2xf32>, vector<1x32xf32> -> vector<1x272xf32>
    %69 = tpu.concatenate %34, %35, %36, %37, %38, %39, %40, %41, %42, %43, %44, %45, %46, %47, %48, %49 in 1 : vector<1x2xf32>, vector<1x32xf32>, vector<1x2xf32>, vector<1x32xf32>, vector<1x2xf32>, vector<1x32xf32>, vector<1x2xf32>, vector<1x32xf32>, vector<1x2xf32>, vector<1x32xf32>, vector<1x2xf32>, vector<1x32xf32>, vector<1x2xf32>, vector<1x32xf32>, vector<1x2xf32>, vector<1x32xf32> -> vector<1x272xf32>
    %70 = tpu.concatenate %50, %51, %52, %53, %54, %55, %56, %57, %58, %59, %60, %61, %62, %63, %64, %65 in 1 : vector<1x2xf32>, vector<1x32xf32>, vector<1x2xf32>, vector<1x32xf32>, vector<1x2xf32>, vector<1x32xf32>, vector<1x2xf32>, vector<1x32xf32>, vector<1x2xf32>, vector<1x32xf32>, vector<1x2xf32>, vector<1x32xf32>, vector<1x2xf32>, vector<1x32xf32>, vector<1x2xf32>, vector<1x32xf32> -> vector<1x272xf32>
    %71 = tpu.concatenate %67, %68, %69, %70, %66 in 1 : vector<1x305xf32>, vector<1x272xf32>, vector<1x272xf32>, vector<1x272xf32>, vector<1x159xf32> -> vector<1x1280xf32>
    %cst_35 = arith.constant 0.000000e+00 : f32
    %72 = vector.broadcast %cst_35 : f32 to vector<1x128xf32>
    %73 = tpu.concatenate %71, %72 in 1 : vector<1x1280xf32>, vector<1x128xf32> -> vector<1x1408xf32>
    %74 = vector.extract_strided_slice %73 {offsets = [0, 1], sizes = [1, 1280], strides = [1, 1]} : vector<1x1408xf32> to vector<1x1280xf32>
    %75 = vector.extract_strided_slice %73 {offsets = [0, 2], sizes = [1, 1280], strides = [1, 1]} : vector<1x1408xf32> to vector<1x1280xf32>
    %76 = vector.extract_strided_slice %73 {offsets = [0, 34], sizes = [1, 1280], strides = [1, 1]} : vector<1x1408xf32> to vector<1x1280xf32>
    %77 = vector.extract_strided_slice %73 {offsets = [0, 35], sizes = [1, 1280], strides = [1, 1]} : vector<1x1408xf32> to vector<1x1280xf32>
    %78 = vector.extract_strided_slice %73 {offsets = [0, 36], sizes = [1, 1280], strides = [1, 1]} : vector<1x1408xf32> to vector<1x1280xf32>
    %79 = vector.extract_strided_slice %73 {offsets = [0, 68], sizes = [1, 1280], strides = [1, 1]} : vector<1x1408xf32> to vector<1x1280xf32>
    %80 = vector.extract_strided_slice %73 {offsets = [0, 69], sizes = [1, 1280], strides = [1, 1]} : vector<1x1408xf32> to vector<1x1280xf32>
    %81 = vector.extract_strided_slice %73 {offsets = [0, 70], sizes = [1, 1280], strides = [1, 1]} : vector<1x1408xf32> to vector<1x1280xf32>
    %c0_36 = arith.constant 0 : index
    %c0_37 = arith.constant 0 : index
    %82 = vector.load %arg2[%c0_36, %c0_37] : memref<4x9xf32, #tpu.memory_space<vmem>>, vector<4x1xf32>
    %83 = vector.broadcast %82 : vector<4x1xf32> to vector<4x1280xf32>
    %84 = vector.broadcast %71 : vector<1x1280xf32> to vector<4x1280xf32>
    %85 = arith.mulf %83, %84 : vector<4x1280xf32>
    %c0_38 = arith.constant 0 : index
    %c1 = arith.constant 1 : index
    %86 = vector.load %arg2[%c0_38, %c1] : memref<4x9xf32, #tpu.memory_space<vmem>>, vector<4x1xf32>
    %87 = vector.broadcast %86 : vector<4x1xf32> to vector<4x1280xf32>
    %88 = vector.broadcast %74 : vector<1x1280xf32> to vector<4x1280xf32>
    %89 = arith.mulf %87, %88 : vector<4x1280xf32>
    %90 = arith.addf %85, %89 : vector<4x1280xf32>
    %c0_39 = arith.constant 0 : index
    %c2 = arith.constant 2 : index
    %91 = vector.load %arg2[%c0_39, %c2] : memref<4x9xf32, #tpu.memory_space<vmem>>, vector<4x1xf32>
    %92 = vector.broadcast %91 : vector<4x1xf32> to vector<4x1280xf32>
    %93 = vector.broadcast %75 : vector<1x1280xf32> to vector<4x1280xf32>
    %94 = arith.mulf %92, %93 : vector<4x1280xf32>
    %95 = arith.addf %90, %94 : vector<4x1280xf32>
    %c0_40 = arith.constant 0 : index
    %c3 = arith.constant 3 : index
    %96 = vector.load %arg2[%c0_40, %c3] : memref<4x9xf32, #tpu.memory_space<vmem>>, vector<4x1xf32>
    %97 = vector.broadcast %96 : vector<4x1xf32> to vector<4x1280xf32>
    %98 = vector.broadcast %76 : vector<1x1280xf32> to vector<4x1280xf32>
    %99 = arith.mulf %97, %98 : vector<4x1280xf32>
    %100 = arith.addf %95, %99 : vector<4x1280xf32>
    %c0_41 = arith.constant 0 : index
    %c4 = arith.constant 4 : index
    %101 = vector.load %arg2[%c0_41, %c4] : memref<4x9xf32, #tpu.memory_space<vmem>>, vector<4x1xf32>
    %102 = vector.broadcast %101 : vector<4x1xf32> to vector<4x1280xf32>
    %103 = vector.broadcast %77 : vector<1x1280xf32> to vector<4x1280xf32>
    %104 = arith.mulf %102, %103 : vector<4x1280xf32>
    %105 = arith.addf %100, %104 : vector<4x1280xf32>
    %c0_42 = arith.constant 0 : index
    %c5 = arith.constant 5 : index
    %106 = vector.load %arg2[%c0_42, %c5] : memref<4x9xf32, #tpu.memory_space<vmem>>, vector<4x1xf32>
    %107 = vector.broadcast %106 : vector<4x1xf32> to vector<4x1280xf32>
    %108 = vector.broadcast %78 : vector<1x1280xf32> to vector<4x1280xf32>
    %109 = arith.mulf %107, %108 : vector<4x1280xf32>
    %110 = arith.addf %105, %109 : vector<4x1280xf32>
    %c0_43 = arith.constant 0 : index
    %c6 = arith.constant 6 : index
    %111 = vector.load %arg2[%c0_43, %c6] : memref<4x9xf32, #tpu.memory_space<vmem>>, vector<4x1xf32>
    %112 = vector.broadcast %111 : vector<4x1xf32> to vector<4x1280xf32>
    %113 = vector.broadcast %79 : vector<1x1280xf32> to vector<4x1280xf32>
    %114 = arith.mulf %112, %113 : vector<4x1280xf32>
    %115 = arith.addf %110, %114 : vector<4x1280xf32>
    %c0_44 = arith.constant 0 : index
    %c7 = arith.constant 7 : index
    %116 = vector.load %arg2[%c0_44, %c7] : memref<4x9xf32, #tpu.memory_space<vmem>>, vector<4x1xf32>
    %117 = vector.broadcast %116 : vector<4x1xf32> to vector<4x1280xf32>
    %118 = vector.broadcast %80 : vector<1x1280xf32> to vector<4x1280xf32>
    %119 = arith.mulf %117, %118 : vector<4x1280xf32>
    %120 = arith.addf %115, %119 : vector<4x1280xf32>
    %c0_45 = arith.constant 0 : index
    %c8 = arith.constant 8 : index
    %121 = vector.load %arg2[%c0_45, %c8] : memref<4x9xf32, #tpu.memory_space<vmem>>, vector<4x1xf32>
    %122 = vector.broadcast %121 : vector<4x1xf32> to vector<4x1280xf32>
    %123 = vector.broadcast %81 : vector<1x1280xf32> to vector<4x1280xf32>
    %124 = arith.mulf %122, %123 : vector<4x1280xf32>
    %125 = arith.addf %120, %124 : vector<4x1280xf32>
    %c0_46 = arith.constant 0 : index
    %c0_47 = arith.constant 0 : index
    %126 = vector.load %arg3[%c0_46, %c0_47] : memref<4x1xf32, #tpu.memory_space<vmem>>, vector<4x1xf32>
    %127 = vector.broadcast %126 : vector<4x1xf32> to vector<4x1280xf32>
    %128 = arith.addf %125, %127 : vector<4x1280xf32>
    %cst_48 = arith.constant 0.000000e+00 : f32
    %129 = vector.broadcast %cst_48 : f32 to vector<4x1280xf32>
    %130 = arith.maximumf %128, %129 : vector<4x1280xf32>
    %cst_49 = arith.constant 0.000000e+00 : f32
    %131 = vector.broadcast %cst_49 : f32 to vector<4x35xf32>
    %132 = vector.extract_strided_slice %130 {offsets = [0, 0], sizes = [4, 1245], strides = [1, 1]} : vector<4x1280xf32> to vector<4x1245xf32>
    %133 = tpu.concatenate %131, %132 in 1 : vector<4x35xf32>, vector<4x1245xf32> -> vector<4x1280xf32>
    %c0_50 = arith.constant 0 : index
    %c0_51 = arith.constant 0 : index
    %134 = vector.load %arg4[%c0_50, %c0_51] : memref<1x1280xf32, #tpu.memory_space<vmem>>, vector<1x1280xf32>
    %135 = vector.broadcast %134 : vector<1x1280xf32> to vector<4x1280xf32>
    %136 = arith.mulf %133, %135 : vector<4x1280xf32>
    %cst_52 = arith.constant 0.000000e+00 : f32
    %137 = vector.broadcast %cst_52 : f32 to vector<4x128xf32>
    %138 = tpu.concatenate %136, %137 in 1 : vector<4x1280xf32>, vector<4x128xf32> -> vector<4x1408xf32>
    %139 = vector.extract_strided_slice %138 {offsets = [0, 1], sizes = [4, 1280], strides = [1, 1]} : vector<4x1408xf32> to vector<4x1280xf32>
    %140 = vector.extract_strided_slice %138 {offsets = [0, 2], sizes = [4, 1280], strides = [1, 1]} : vector<4x1408xf32> to vector<4x1280xf32>
    %141 = vector.extract_strided_slice %138 {offsets = [0, 34], sizes = [4, 1280], strides = [1, 1]} : vector<4x1408xf32> to vector<4x1280xf32>
    %142 = vector.extract_strided_slice %138 {offsets = [0, 35], sizes = [4, 1280], strides = [1, 1]} : vector<4x1408xf32> to vector<4x1280xf32>
    %143 = vector.extract_strided_slice %138 {offsets = [0, 36], sizes = [4, 1280], strides = [1, 1]} : vector<4x1408xf32> to vector<4x1280xf32>
    %144 = vector.extract_strided_slice %138 {offsets = [0, 68], sizes = [4, 1280], strides = [1, 1]} : vector<4x1408xf32> to vector<4x1280xf32>
    %145 = vector.extract_strided_slice %138 {offsets = [0, 69], sizes = [4, 1280], strides = [1, 1]} : vector<4x1408xf32> to vector<4x1280xf32>
    %146 = vector.extract_strided_slice %138 {offsets = [0, 70], sizes = [4, 1280], strides = [1, 1]} : vector<4x1408xf32> to vector<4x1280xf32>
    %147 = tpu.concatenate %136, %139, %140, %141, %142, %143, %144, %145, %146 in 0 : vector<4x1280xf32>, vector<4x1280xf32>, vector<4x1280xf32>, vector<4x1280xf32>, vector<4x1280xf32>, vector<4x1280xf32>, vector<4x1280xf32>, vector<4x1280xf32>, vector<4x1280xf32> -> vector<36x1280xf32>
    %c0_53 = arith.constant 0 : index
    %c0_54 = arith.constant 0 : index
    %148 = vector.load %arg5[%c0_53, %c0_54] : memref<4x36xf32, #tpu.memory_space<vmem>>, vector<4x36xf32>
    %cst_55 = arith.constant dense<0.000000e+00> : vector<4x1280xf32>
    %149 = tpu.matmul %148, %147, %cst_55 {dimension_numbers = #tpu.dot_dimension_numbers<[1], [0], [0], [1], [0, 0, 1, 1], [], []>} : vector<4x36xf32>, vector<36x1280xf32>, vector<4x1280xf32> -> vector<4x1280xf32>
    %c0_56 = arith.constant 0 : index
    %c0_57 = arith.constant 0 : index
    %150 = vector.load %arg6[%c0_56, %c0_57] : memref<4x1xf32, #tpu.memory_space<vmem>>, vector<4x1xf32>
    %151 = vector.broadcast %150 : vector<4x1xf32> to vector<4x1280xf32>
    %152 = arith.addf %149, %151 : vector<4x1280xf32>
    %cst_58 = arith.constant 0.000000e+00 : f32
    %153 = vector.broadcast %cst_58 : f32 to vector<4x1280xf32>
    %154 = arith.maximumf %152, %153 : vector<4x1280xf32>
    %cst_59 = arith.constant 0.000000e+00 : f32
    %155 = vector.broadcast %cst_59 : f32 to vector<4x38xf32>
    %156 = vector.extract_strided_slice %154 {offsets = [0, 0], sizes = [4, 31], strides = [1, 1]} : vector<4x1280xf32> to vector<4x31xf32>
    %cst_60 = arith.constant 0.000000e+00 : f32
    %157 = vector.broadcast %cst_60 : f32 to vector<4x5xf32>
    %158 = vector.extract_strided_slice %154 {offsets = [0, 68], sizes = [4, 31], strides = [1, 1]} : vector<4x1280xf32> to vector<4x31xf32>
    %cst_61 = arith.constant 0.000000e+00 : f32
    %159 = vector.broadcast %cst_61 : f32 to vector<4x5xf32>
    %160 = vector.extract_strided_slice %154 {offsets = [0, 136], sizes = [4, 31], strides = [1, 1]} : vector<4x1280xf32> to vector<4x31xf32>
    %cst_62 = arith.constant 0.000000e+00 : f32
    %161 = vector.broadcast %cst_62 : f32 to vector<4x5xf32>
    %162 = vector.extract_strided_slice %154 {offsets = [0, 204], sizes = [4, 31], strides = [1, 1]} : vector<4x1280xf32> to vector<4x31xf32>
    %cst_63 = arith.constant 0.000000e+00 : f32
    %163 = vector.broadcast %cst_63 : f32 to vector<4x5xf32>
    %164 = vector.extract_strided_slice %154 {offsets = [0, 272], sizes = [4, 31], strides = [1, 1]} : vector<4x1280xf32> to vector<4x31xf32>
    %cst_64 = arith.constant 0.000000e+00 : f32
    %165 = vector.broadcast %cst_64 : f32 to vector<4x5xf32>
    %166 = vector.extract_strided_slice %154 {offsets = [0, 340], sizes = [4, 31], strides = [1, 1]} : vector<4x1280xf32> to vector<4x31xf32>
    %cst_65 = arith.constant 0.000000e+00 : f32
    %167 = vector.broadcast %cst_65 : f32 to vector<4x5xf32>
    %168 = vector.extract_strided_slice %154 {offsets = [0, 408], sizes = [4, 31], strides = [1, 1]} : vector<4x1280xf32> to vector<4x31xf32>
    %cst_66 = arith.constant 0.000000e+00 : f32
    %169 = vector.broadcast %cst_66 : f32 to vector<4x5xf32>
    %170 = vector.extract_strided_slice %154 {offsets = [0, 476], sizes = [4, 31], strides = [1, 1]} : vector<4x1280xf32> to vector<4x31xf32>
    %cst_67 = arith.constant 0.000000e+00 : f32
    %171 = vector.broadcast %cst_67 : f32 to vector<4x5xf32>
    %172 = vector.extract_strided_slice %154 {offsets = [0, 544], sizes = [4, 31], strides = [1, 1]} : vector<4x1280xf32> to vector<4x31xf32>
    %cst_68 = arith.constant 0.000000e+00 : f32
    %173 = vector.broadcast %cst_68 : f32 to vector<4x5xf32>
    %174 = vector.extract_strided_slice %154 {offsets = [0, 612], sizes = [4, 31], strides = [1, 1]} : vector<4x1280xf32> to vector<4x31xf32>
    %cst_69 = arith.constant 0.000000e+00 : f32
    %175 = vector.broadcast %cst_69 : f32 to vector<4x5xf32>
    %176 = vector.extract_strided_slice %154 {offsets = [0, 680], sizes = [4, 31], strides = [1, 1]} : vector<4x1280xf32> to vector<4x31xf32>
    %cst_70 = arith.constant 0.000000e+00 : f32
    %177 = vector.broadcast %cst_70 : f32 to vector<4x5xf32>
    %178 = vector.extract_strided_slice %154 {offsets = [0, 748], sizes = [4, 31], strides = [1, 1]} : vector<4x1280xf32> to vector<4x31xf32>
    %cst_71 = arith.constant 0.000000e+00 : f32
    %179 = vector.broadcast %cst_71 : f32 to vector<4x5xf32>
    %180 = vector.extract_strided_slice %154 {offsets = [0, 816], sizes = [4, 31], strides = [1, 1]} : vector<4x1280xf32> to vector<4x31xf32>
    %cst_72 = arith.constant 0.000000e+00 : f32
    %181 = vector.broadcast %cst_72 : f32 to vector<4x5xf32>
    %182 = vector.extract_strided_slice %154 {offsets = [0, 884], sizes = [4, 31], strides = [1, 1]} : vector<4x1280xf32> to vector<4x31xf32>
    %cst_73 = arith.constant 0.000000e+00 : f32
    %183 = vector.broadcast %cst_73 : f32 to vector<4x5xf32>
    %184 = vector.extract_strided_slice %154 {offsets = [0, 952], sizes = [4, 31], strides = [1, 1]} : vector<4x1280xf32> to vector<4x31xf32>
    %cst_74 = arith.constant 0.000000e+00 : f32
    %185 = vector.broadcast %cst_74 : f32 to vector<4x5xf32>
    %186 = vector.extract_strided_slice %154 {offsets = [0, 1020], sizes = [4, 31], strides = [1, 1]} : vector<4x1280xf32> to vector<4x31xf32>
    %cst_75 = arith.constant 0.000000e+00 : f32
    %187 = vector.broadcast %cst_75 : f32 to vector<4x159xf32>
    %188 = tpu.concatenate %155, %156, %157, %158, %159, %160, %161, %162, %163, %164, %165, %166, %167, %168, %169, %170 in 1 : vector<4x38xf32>, vector<4x31xf32>, vector<4x5xf32>, vector<4x31xf32>, vector<4x5xf32>, vector<4x31xf32>, vector<4x5xf32>, vector<4x31xf32>, vector<4x5xf32>, vector<4x31xf32>, vector<4x5xf32>, vector<4x31xf32>, vector<4x5xf32>, vector<4x31xf32>, vector<4x5xf32>, vector<4x31xf32> -> vector<4x321xf32>
    %189 = tpu.concatenate %171, %172, %173, %174, %175, %176, %177, %178, %179, %180, %181, %182, %183, %184, %185, %186 in 1 : vector<4x5xf32>, vector<4x31xf32>, vector<4x5xf32>, vector<4x31xf32>, vector<4x5xf32>, vector<4x31xf32>, vector<4x5xf32>, vector<4x31xf32>, vector<4x5xf32>, vector<4x31xf32>, vector<4x5xf32>, vector<4x31xf32>, vector<4x5xf32>, vector<4x31xf32>, vector<4x5xf32>, vector<4x31xf32> -> vector<4x288xf32>
    %190 = tpu.concatenate %188, %189, %187 in 1 : vector<4x321xf32>, vector<4x288xf32>, vector<4x159xf32> -> vector<4x768xf32>
    %cst_76 = arith.constant 0.000000e+00 : f32
    %191 = vector.broadcast %cst_76 : f32 to vector<4x128xf32>
    %192 = tpu.concatenate %190, %191 in 1 : vector<4x768xf32>, vector<4x128xf32> -> vector<4x896xf32>
    %193 = vector.extract_strided_slice %192 {offsets = [0, 2], sizes = [4, 768], strides = [1, 1]} : vector<4x896xf32> to vector<4x768xf32>
    %194 = vector.extract_strided_slice %192 {offsets = [0, 4], sizes = [4, 768], strides = [1, 1]} : vector<4x896xf32> to vector<4x768xf32>
    %195 = vector.extract_strided_slice %192 {offsets = [0, 36], sizes = [4, 768], strides = [1, 1]} : vector<4x896xf32> to vector<4x768xf32>
    %196 = vector.extract_strided_slice %192 {offsets = [0, 38], sizes = [4, 768], strides = [1, 1]} : vector<4x896xf32> to vector<4x768xf32>
    %197 = vector.extract_strided_slice %192 {offsets = [0, 40], sizes = [4, 768], strides = [1, 1]} : vector<4x896xf32> to vector<4x768xf32>
    %198 = vector.extract_strided_slice %192 {offsets = [0, 72], sizes = [4, 768], strides = [1, 1]} : vector<4x896xf32> to vector<4x768xf32>
    %199 = vector.extract_strided_slice %192 {offsets = [0, 74], sizes = [4, 768], strides = [1, 1]} : vector<4x896xf32> to vector<4x768xf32>
    %200 = vector.extract_strided_slice %192 {offsets = [0, 76], sizes = [4, 768], strides = [1, 1]} : vector<4x896xf32> to vector<4x768xf32>
    %201 = tpu.concatenate %190, %193, %194, %195, %196, %197, %198, %199, %200 in 0 : vector<4x768xf32>, vector<4x768xf32>, vector<4x768xf32>, vector<4x768xf32>, vector<4x768xf32>, vector<4x768xf32>, vector<4x768xf32>, vector<4x768xf32>, vector<4x768xf32> -> vector<36x768xf32>
    %c0_77 = arith.constant 0 : index
    %c0_78 = arith.constant 0 : index
    %202 = vector.load %arg8[%c0_77, %c0_78] : memref<8x36xf32, #tpu.memory_space<vmem>>, vector<8x36xf32>
    %cst_79 = arith.constant dense<0.000000e+00> : vector<8x768xf32>
    %203 = tpu.matmul %202, %201, %cst_79 {dimension_numbers = #tpu.dot_dimension_numbers<[1], [0], [0], [1], [0, 0, 1, 1], [], []>} : vector<8x36xf32>, vector<36x768xf32>, vector<8x768xf32> -> vector<8x768xf32>
    %c0_80 = arith.constant 0 : index
    %c0_81 = arith.constant 0 : index
    %204 = vector.load %arg9[%c0_80, %c0_81] : memref<8x1xf32, #tpu.memory_space<vmem>>, vector<8x1xf32>
    %205 = vector.broadcast %204 : vector<8x1xf32> to vector<8x768xf32>
    %206 = arith.addf %203, %205 : vector<8x768xf32>
    %cst_82 = arith.constant 0.000000e+00 : f32
    %207 = vector.broadcast %cst_82 : f32 to vector<8x768xf32>
    %208 = arith.maximumf %206, %207 : vector<8x768xf32>
    %cst_83 = arith.constant 0.000000e+00 : f32
    %209 = vector.broadcast %cst_83 : f32 to vector<8x44xf32>
    %210 = vector.extract_strided_slice %208 {offsets = [0, 0], sizes = [8, 29], strides = [1, 1]} : vector<8x768xf32> to vector<8x29xf32>
    %cst_84 = arith.constant 0.000000e+00 : f32
    %211 = vector.broadcast %cst_84 : f32 to vector<8x11xf32>
    %212 = vector.extract_strided_slice %208 {offsets = [0, 72], sizes = [8, 29], strides = [1, 1]} : vector<8x768xf32> to vector<8x29xf32>
    %cst_85 = arith.constant 0.000000e+00 : f32
    %213 = vector.broadcast %cst_85 : f32 to vector<8x11xf32>
    %214 = vector.extract_strided_slice %208 {offsets = [0, 144], sizes = [8, 29], strides = [1, 1]} : vector<8x768xf32> to vector<8x29xf32>
    %cst_86 = arith.constant 0.000000e+00 : f32
    %215 = vector.broadcast %cst_86 : f32 to vector<8x11xf32>
    %216 = vector.extract_strided_slice %208 {offsets = [0, 216], sizes = [8, 29], strides = [1, 1]} : vector<8x768xf32> to vector<8x29xf32>
    %cst_87 = arith.constant 0.000000e+00 : f32
    %217 = vector.broadcast %cst_87 : f32 to vector<8x11xf32>
    %218 = vector.extract_strided_slice %208 {offsets = [0, 288], sizes = [8, 29], strides = [1, 1]} : vector<8x768xf32> to vector<8x29xf32>
    %cst_88 = arith.constant 0.000000e+00 : f32
    %219 = vector.broadcast %cst_88 : f32 to vector<8x11xf32>
    %220 = vector.extract_strided_slice %208 {offsets = [0, 360], sizes = [8, 29], strides = [1, 1]} : vector<8x768xf32> to vector<8x29xf32>
    %cst_89 = arith.constant 0.000000e+00 : f32
    %221 = vector.broadcast %cst_89 : f32 to vector<8x11xf32>
    %222 = vector.extract_strided_slice %208 {offsets = [0, 432], sizes = [8, 29], strides = [1, 1]} : vector<8x768xf32> to vector<8x29xf32>
    %cst_90 = arith.constant 0.000000e+00 : f32
    %223 = vector.broadcast %cst_90 : f32 to vector<8x11xf32>
    %224 = vector.extract_strided_slice %208 {offsets = [0, 504], sizes = [8, 29], strides = [1, 1]} : vector<8x768xf32> to vector<8x29xf32>
    %cst_91 = arith.constant 0.000000e+00 : f32
    %225 = vector.broadcast %cst_91 : f32 to vector<8x159xf32>
    %226 = tpu.concatenate %209, %210, %211, %212, %213, %214, %215, %216, %217, %218, %219, %220, %221, %222, %223, %224 in 1 : vector<8x44xf32>, vector<8x29xf32>, vector<8x11xf32>, vector<8x29xf32>, vector<8x11xf32>, vector<8x29xf32>, vector<8x11xf32>, vector<8x29xf32>, vector<8x11xf32>, vector<8x29xf32>, vector<8x11xf32>, vector<8x29xf32>, vector<8x11xf32>, vector<8x29xf32>, vector<8x11xf32>, vector<8x29xf32> -> vector<8x353xf32>
    %227 = tpu.concatenate %226, %225 in 1 : vector<8x353xf32>, vector<8x159xf32> -> vector<8x512xf32>
    %cst_92 = arith.constant 0.000000e+00 : f32
    %228 = vector.broadcast %cst_92 : f32 to vector<8x128xf32>
    %229 = tpu.concatenate %227, %228 in 1 : vector<8x512xf32>, vector<8x128xf32> -> vector<8x640xf32>
    %230 = vector.extract_strided_slice %229 {offsets = [0, 4], sizes = [8, 512], strides = [1, 1]} : vector<8x640xf32> to vector<8x512xf32>
    %231 = vector.extract_strided_slice %229 {offsets = [0, 8], sizes = [8, 512], strides = [1, 1]} : vector<8x640xf32> to vector<8x512xf32>
    %232 = vector.extract_strided_slice %229 {offsets = [0, 40], sizes = [8, 512], strides = [1, 1]} : vector<8x640xf32> to vector<8x512xf32>
    %233 = vector.extract_strided_slice %229 {offsets = [0, 44], sizes = [8, 512], strides = [1, 1]} : vector<8x640xf32> to vector<8x512xf32>
    %234 = vector.extract_strided_slice %229 {offsets = [0, 48], sizes = [8, 512], strides = [1, 1]} : vector<8x640xf32> to vector<8x512xf32>
    %235 = vector.extract_strided_slice %229 {offsets = [0, 80], sizes = [8, 512], strides = [1, 1]} : vector<8x640xf32> to vector<8x512xf32>
    %236 = vector.extract_strided_slice %229 {offsets = [0, 84], sizes = [8, 512], strides = [1, 1]} : vector<8x640xf32> to vector<8x512xf32>
    %237 = vector.extract_strided_slice %229 {offsets = [0, 88], sizes = [8, 512], strides = [1, 1]} : vector<8x640xf32> to vector<8x512xf32>
    %238 = tpu.concatenate %227, %230, %231, %232, %233, %234, %235, %236, %237 in 0 : vector<8x512xf32>, vector<8x512xf32>, vector<8x512xf32>, vector<8x512xf32>, vector<8x512xf32>, vector<8x512xf32>, vector<8x512xf32>, vector<8x512xf32>, vector<8x512xf32> -> vector<72x512xf32>
    %c0_93 = arith.constant 0 : index
    %c0_94 = arith.constant 0 : index
    %239 = vector.load %arg11[%c0_93, %c0_94] : memref<8x72xf32, #tpu.memory_space<vmem>>, vector<8x72xf32>
    %cst_95 = arith.constant dense<0.000000e+00> : vector<8x512xf32>
    %240 = tpu.matmul %239, %238, %cst_95 {dimension_numbers = #tpu.dot_dimension_numbers<[1], [0], [0], [1], [0, 0, 1, 1], [], []>} : vector<8x72xf32>, vector<72x512xf32>, vector<8x512xf32> -> vector<8x512xf32>
    %c0_96 = arith.constant 0 : index
    %c0_97 = arith.constant 0 : index
    %241 = vector.load %arg12[%c0_96, %c0_97] : memref<8x1xf32, #tpu.memory_space<vmem>>, vector<8x1xf32>
    %242 = vector.broadcast %241 : vector<8x1xf32> to vector<8x512xf32>
    %243 = arith.addf %240, %242 : vector<8x512xf32>
    %cst_98 = arith.constant 0.000000e+00 : f32
    %244 = vector.broadcast %cst_98 : f32 to vector<8x512xf32>
    %245 = arith.maximumf %243, %244 : vector<8x512xf32>
    %cst_99 = arith.constant 0.000000e+00 : f32
    %246 = vector.broadcast %cst_99 : f32 to vector<8x44xf32>
    %247 = vector.extract_strided_slice %245 {offsets = [0, 0], sizes = [8, 468], strides = [1, 1]} : vector<8x512xf32> to vector<8x468xf32>
    %248 = tpu.concatenate %246, %247 in 1 : vector<8x44xf32>, vector<8x468xf32> -> vector<8x512xf32>
    %c0_100 = arith.constant 0 : index
    %c0_101 = arith.constant 0 : index
    %249 = vector.load %arg13[%c0_100, %c0_101] : memref<1x512xf32, #tpu.memory_space<vmem>>, vector<1x512xf32>
    %250 = vector.broadcast %249 : vector<1x512xf32> to vector<8x512xf32>
    %251 = arith.mulf %248, %250 : vector<8x512xf32>
    %cst_102 = arith.constant 0.000000e+00 : f32
    %252 = vector.broadcast %cst_102 : f32 to vector<8x128xf32>
    %253 = tpu.concatenate %251, %252 in 1 : vector<8x512xf32>, vector<8x128xf32> -> vector<8x640xf32>
    %254 = vector.extract_strided_slice %253 {offsets = [0, 4], sizes = [8, 512], strides = [1, 1]} : vector<8x640xf32> to vector<8x512xf32>
    %255 = vector.extract_strided_slice %253 {offsets = [0, 8], sizes = [8, 512], strides = [1, 1]} : vector<8x640xf32> to vector<8x512xf32>
    %256 = vector.extract_strided_slice %253 {offsets = [0, 40], sizes = [8, 512], strides = [1, 1]} : vector<8x640xf32> to vector<8x512xf32>
    %257 = vector.extract_strided_slice %253 {offsets = [0, 44], sizes = [8, 512], strides = [1, 1]} : vector<8x640xf32> to vector<8x512xf32>
    %258 = vector.extract_strided_slice %253 {offsets = [0, 48], sizes = [8, 512], strides = [1, 1]} : vector<8x640xf32> to vector<8x512xf32>
    %259 = vector.extract_strided_slice %253 {offsets = [0, 80], sizes = [8, 512], strides = [1, 1]} : vector<8x640xf32> to vector<8x512xf32>
    %260 = vector.extract_strided_slice %253 {offsets = [0, 84], sizes = [8, 512], strides = [1, 1]} : vector<8x640xf32> to vector<8x512xf32>
    %261 = vector.extract_strided_slice %253 {offsets = [0, 88], sizes = [8, 512], strides = [1, 1]} : vector<8x640xf32> to vector<8x512xf32>
    %262 = tpu.concatenate %251, %254, %255, %256, %257, %258, %259, %260, %261 in 0 : vector<8x512xf32>, vector<8x512xf32>, vector<8x512xf32>, vector<8x512xf32>, vector<8x512xf32>, vector<8x512xf32>, vector<8x512xf32>, vector<8x512xf32>, vector<8x512xf32> -> vector<72x512xf32>
    %c0_103 = arith.constant 0 : index
    %c0_104 = arith.constant 0 : index
    %263 = vector.load %arg14[%c0_103, %c0_104] : memref<16x72xf32, #tpu.memory_space<vmem>>, vector<16x72xf32>
    %cst_105 = arith.constant dense<0.000000e+00> : vector<16x512xf32>
    %264 = tpu.matmul %263, %262, %cst_105 {dimension_numbers = #tpu.dot_dimension_numbers<[1], [0], [0], [1], [0, 0, 1, 1], [], []>} : vector<16x72xf32>, vector<72x512xf32>, vector<16x512xf32> -> vector<16x512xf32>
    %c0_106 = arith.constant 0 : index
    %c0_107 = arith.constant 0 : index
    %265 = vector.load %arg15[%c0_106, %c0_107] : memref<16x1xf32, #tpu.memory_space<vmem>>, vector<16x1xf32>
    %266 = vector.broadcast %265 : vector<16x1xf32> to vector<16x512xf32>
    %267 = arith.addf %264, %266 : vector<16x512xf32>
    %cst_108 = arith.constant 0.000000e+00 : f32
    %268 = vector.broadcast %cst_108 : f32 to vector<16x512xf32>
    %269 = arith.maximumf %267, %268 : vector<16x512xf32>
    %cst_109 = arith.constant 0.000000e+00 : f32
    %270 = vector.broadcast %cst_109 : f32 to vector<16x56xf32>
    %271 = vector.extract_strided_slice %269 {offsets = [0, 0], sizes = [16, 25], strides = [1, 1]} : vector<16x512xf32> to vector<16x25xf32>
    %cst_110 = arith.constant 0.000000e+00 : f32
    %272 = vector.broadcast %cst_110 : f32 to vector<16x23xf32>
    %273 = vector.extract_strided_slice %269 {offsets = [0, 80], sizes = [16, 25], strides = [1, 1]} : vector<16x512xf32> to vector<16x25xf32>
    %cst_111 = arith.constant 0.000000e+00 : f32
    %274 = vector.broadcast %cst_111 : f32 to vector<16x23xf32>
    %275 = vector.extract_strided_slice %269 {offsets = [0, 160], sizes = [16, 25], strides = [1, 1]} : vector<16x512xf32> to vector<16x25xf32>
    %cst_112 = arith.constant 0.000000e+00 : f32
    %276 = vector.broadcast %cst_112 : f32 to vector<16x23xf32>
    %277 = vector.extract_strided_slice %269 {offsets = [0, 240], sizes = [16, 25], strides = [1, 1]} : vector<16x512xf32> to vector<16x25xf32>
    %cst_113 = arith.constant 0.000000e+00 : f32
    %278 = vector.broadcast %cst_113 : f32 to vector<16x159xf32>
    %279 = tpu.concatenate %270, %271, %272, %273, %274, %275, %276, %277, %278 in 1 : vector<16x56xf32>, vector<16x25xf32>, vector<16x23xf32>, vector<16x25xf32>, vector<16x23xf32>, vector<16x25xf32>, vector<16x23xf32>, vector<16x25xf32>, vector<16x159xf32> -> vector<16x384xf32>
    %cst_114 = arith.constant 0.000000e+00 : f32
    %280 = vector.broadcast %cst_114 : f32 to vector<16x128xf32>
    %281 = tpu.concatenate %279, %280 in 1 : vector<16x384xf32>, vector<16x128xf32> -> vector<16x512xf32>
    %282 = vector.extract_strided_slice %281 {offsets = [0, 8], sizes = [16, 384], strides = [1, 1]} : vector<16x512xf32> to vector<16x384xf32>
    %283 = vector.extract_strided_slice %281 {offsets = [0, 16], sizes = [16, 384], strides = [1, 1]} : vector<16x512xf32> to vector<16x384xf32>
    %284 = vector.extract_strided_slice %281 {offsets = [0, 48], sizes = [16, 384], strides = [1, 1]} : vector<16x512xf32> to vector<16x384xf32>
    %285 = vector.extract_strided_slice %281 {offsets = [0, 56], sizes = [16, 384], strides = [1, 1]} : vector<16x512xf32> to vector<16x384xf32>
    %286 = vector.extract_strided_slice %281 {offsets = [0, 64], sizes = [16, 384], strides = [1, 1]} : vector<16x512xf32> to vector<16x384xf32>
    %287 = vector.extract_strided_slice %281 {offsets = [0, 96], sizes = [16, 384], strides = [1, 1]} : vector<16x512xf32> to vector<16x384xf32>
    %288 = vector.extract_strided_slice %281 {offsets = [0, 104], sizes = [16, 384], strides = [1, 1]} : vector<16x512xf32> to vector<16x384xf32>
    %289 = vector.extract_strided_slice %281 {offsets = [0, 112], sizes = [16, 384], strides = [1, 1]} : vector<16x512xf32> to vector<16x384xf32>
    %290 = tpu.concatenate %279, %282, %283, %284, %285, %286, %287, %288, %289 in 0 : vector<16x384xf32>, vector<16x384xf32>, vector<16x384xf32>, vector<16x384xf32>, vector<16x384xf32>, vector<16x384xf32>, vector<16x384xf32>, vector<16x384xf32>, vector<16x384xf32> -> vector<144x384xf32>
    %c0_115 = arith.constant 0 : index
    %c0_116 = arith.constant 0 : index
    %291 = vector.load %arg17[%c0_115, %c0_116] : memref<16x144xf32, #tpu.memory_space<vmem>>, vector<16x144xf32>
    %cst_117 = arith.constant dense<0.000000e+00> : vector<16x384xf32>
    %292 = tpu.matmul %291, %290, %cst_117 {dimension_numbers = #tpu.dot_dimension_numbers<[1], [0], [0], [1], [0, 0, 1, 1], [], []>} : vector<16x144xf32>, vector<144x384xf32>, vector<16x384xf32> -> vector<16x384xf32>
    %c0_118 = arith.constant 0 : index
    %c0_119 = arith.constant 0 : index
    %293 = vector.load %arg18[%c0_118, %c0_119] : memref<16x1xf32, #tpu.memory_space<vmem>>, vector<16x1xf32>
    %294 = vector.broadcast %293 : vector<16x1xf32> to vector<16x384xf32>
    %295 = arith.addf %292, %294 : vector<16x384xf32>
    %cst_120 = arith.constant 0.000000e+00 : f32
    %296 = vector.broadcast %cst_120 : f32 to vector<16x384xf32>
    %297 = arith.maximumf %295, %296 : vector<16x384xf32>
    %298 = vector.extract_strided_slice %297 {offsets = [0, 0], sizes = [1, 32], strides = [1, 1]} : vector<16x384xf32> to vector<1x32xf32>
    %299 = vector.extract_strided_slice %297 {offsets = [0, 48], sizes = [1, 32], strides = [1, 1]} : vector<16x384xf32> to vector<1x32xf32>
    %300 = vector.extract_strided_slice %297 {offsets = [0, 96], sizes = [1, 32], strides = [1, 1]} : vector<16x384xf32> to vector<1x32xf32>
    %301 = vector.extract_strided_slice %297 {offsets = [0, 144], sizes = [1, 32], strides = [1, 1]} : vector<16x384xf32> to vector<1x32xf32>
    %302 = vector.extract_strided_slice %297 {offsets = [1, 0], sizes = [1, 32], strides = [1, 1]} : vector<16x384xf32> to vector<1x32xf32>
    %303 = vector.extract_strided_slice %297 {offsets = [1, 48], sizes = [1, 32], strides = [1, 1]} : vector<16x384xf32> to vector<1x32xf32>
    %304 = vector.extract_strided_slice %297 {offsets = [1, 96], sizes = [1, 32], strides = [1, 1]} : vector<16x384xf32> to vector<1x32xf32>
    %305 = vector.extract_strided_slice %297 {offsets = [1, 144], sizes = [1, 32], strides = [1, 1]} : vector<16x384xf32> to vector<1x32xf32>
    %306 = vector.extract_strided_slice %297 {offsets = [2, 0], sizes = [1, 32], strides = [1, 1]} : vector<16x384xf32> to vector<1x32xf32>
    %307 = vector.extract_strided_slice %297 {offsets = [2, 48], sizes = [1, 32], strides = [1, 1]} : vector<16x384xf32> to vector<1x32xf32>
    %308 = vector.extract_strided_slice %297 {offsets = [2, 96], sizes = [1, 32], strides = [1, 1]} : vector<16x384xf32> to vector<1x32xf32>
    %309 = vector.extract_strided_slice %297 {offsets = [2, 144], sizes = [1, 32], strides = [1, 1]} : vector<16x384xf32> to vector<1x32xf32>
    %310 = vector.extract_strided_slice %297 {offsets = [3, 0], sizes = [1, 32], strides = [1, 1]} : vector<16x384xf32> to vector<1x32xf32>
    %311 = vector.extract_strided_slice %297 {offsets = [3, 48], sizes = [1, 32], strides = [1, 1]} : vector<16x384xf32> to vector<1x32xf32>
    %312 = vector.extract_strided_slice %297 {offsets = [3, 96], sizes = [1, 32], strides = [1, 1]} : vector<16x384xf32> to vector<1x32xf32>
    %313 = vector.extract_strided_slice %297 {offsets = [3, 144], sizes = [1, 32], strides = [1, 1]} : vector<16x384xf32> to vector<1x32xf32>
    %314 = vector.extract_strided_slice %297 {offsets = [4, 0], sizes = [1, 32], strides = [1, 1]} : vector<16x384xf32> to vector<1x32xf32>
    %315 = vector.extract_strided_slice %297 {offsets = [4, 48], sizes = [1, 32], strides = [1, 1]} : vector<16x384xf32> to vector<1x32xf32>
    %316 = vector.extract_strided_slice %297 {offsets = [4, 96], sizes = [1, 32], strides = [1, 1]} : vector<16x384xf32> to vector<1x32xf32>
    %317 = vector.extract_strided_slice %297 {offsets = [4, 144], sizes = [1, 32], strides = [1, 1]} : vector<16x384xf32> to vector<1x32xf32>
    %318 = vector.extract_strided_slice %297 {offsets = [5, 0], sizes = [1, 32], strides = [1, 1]} : vector<16x384xf32> to vector<1x32xf32>
    %319 = vector.extract_strided_slice %297 {offsets = [5, 48], sizes = [1, 32], strides = [1, 1]} : vector<16x384xf32> to vector<1x32xf32>
    %320 = vector.extract_strided_slice %297 {offsets = [5, 96], sizes = [1, 32], strides = [1, 1]} : vector<16x384xf32> to vector<1x32xf32>
    %321 = vector.extract_strided_slice %297 {offsets = [5, 144], sizes = [1, 32], strides = [1, 1]} : vector<16x384xf32> to vector<1x32xf32>
    %322 = vector.extract_strided_slice %297 {offsets = [6, 0], sizes = [1, 32], strides = [1, 1]} : vector<16x384xf32> to vector<1x32xf32>
    %323 = vector.extract_strided_slice %297 {offsets = [6, 48], sizes = [1, 32], strides = [1, 1]} : vector<16x384xf32> to vector<1x32xf32>
    %324 = vector.extract_strided_slice %297 {offsets = [6, 96], sizes = [1, 32], strides = [1, 1]} : vector<16x384xf32> to vector<1x32xf32>
    %325 = vector.extract_strided_slice %297 {offsets = [6, 144], sizes = [1, 32], strides = [1, 1]} : vector<16x384xf32> to vector<1x32xf32>
    %326 = vector.extract_strided_slice %297 {offsets = [7, 0], sizes = [1, 32], strides = [1, 1]} : vector<16x384xf32> to vector<1x32xf32>
    %327 = vector.extract_strided_slice %297 {offsets = [7, 48], sizes = [1, 32], strides = [1, 1]} : vector<16x384xf32> to vector<1x32xf32>
    %328 = vector.extract_strided_slice %297 {offsets = [7, 96], sizes = [1, 32], strides = [1, 1]} : vector<16x384xf32> to vector<1x32xf32>
    %329 = vector.extract_strided_slice %297 {offsets = [7, 144], sizes = [1, 32], strides = [1, 1]} : vector<16x384xf32> to vector<1x32xf32>
    %330 = vector.extract_strided_slice %297 {offsets = [8, 0], sizes = [1, 32], strides = [1, 1]} : vector<16x384xf32> to vector<1x32xf32>
    %331 = vector.extract_strided_slice %297 {offsets = [8, 48], sizes = [1, 32], strides = [1, 1]} : vector<16x384xf32> to vector<1x32xf32>
    %332 = vector.extract_strided_slice %297 {offsets = [8, 96], sizes = [1, 32], strides = [1, 1]} : vector<16x384xf32> to vector<1x32xf32>
    %333 = vector.extract_strided_slice %297 {offsets = [8, 144], sizes = [1, 32], strides = [1, 1]} : vector<16x384xf32> to vector<1x32xf32>
    %334 = vector.extract_strided_slice %297 {offsets = [9, 0], sizes = [1, 32], strides = [1, 1]} : vector<16x384xf32> to vector<1x32xf32>
    %335 = vector.extract_strided_slice %297 {offsets = [9, 48], sizes = [1, 32], strides = [1, 1]} : vector<16x384xf32> to vector<1x32xf32>
    %336 = vector.extract_strided_slice %297 {offsets = [9, 96], sizes = [1, 32], strides = [1, 1]} : vector<16x384xf32> to vector<1x32xf32>
    %337 = vector.extract_strided_slice %297 {offsets = [9, 144], sizes = [1, 32], strides = [1, 1]} : vector<16x384xf32> to vector<1x32xf32>
    %338 = vector.extract_strided_slice %297 {offsets = [10, 0], sizes = [1, 32], strides = [1, 1]} : vector<16x384xf32> to vector<1x32xf32>
    %339 = vector.extract_strided_slice %297 {offsets = [10, 48], sizes = [1, 32], strides = [1, 1]} : vector<16x384xf32> to vector<1x32xf32>
    %340 = vector.extract_strided_slice %297 {offsets = [10, 96], sizes = [1, 32], strides = [1, 1]} : vector<16x384xf32> to vector<1x32xf32>
    %341 = vector.extract_strided_slice %297 {offsets = [10, 144], sizes = [1, 32], strides = [1, 1]} : vector<16x384xf32> to vector<1x32xf32>
    %342 = vector.extract_strided_slice %297 {offsets = [11, 0], sizes = [1, 32], strides = [1, 1]} : vector<16x384xf32> to vector<1x32xf32>
    %343 = vector.extract_strided_slice %297 {offsets = [11, 48], sizes = [1, 32], strides = [1, 1]} : vector<16x384xf32> to vector<1x32xf32>
    %344 = vector.extract_strided_slice %297 {offsets = [11, 96], sizes = [1, 32], strides = [1, 1]} : vector<16x384xf32> to vector<1x32xf32>
    %345 = vector.extract_strided_slice %297 {offsets = [11, 144], sizes = [1, 32], strides = [1, 1]} : vector<16x384xf32> to vector<1x32xf32>
    %346 = vector.extract_strided_slice %297 {offsets = [12, 0], sizes = [1, 32], strides = [1, 1]} : vector<16x384xf32> to vector<1x32xf32>
    %347 = vector.extract_strided_slice %297 {offsets = [12, 48], sizes = [1, 32], strides = [1, 1]} : vector<16x384xf32> to vector<1x32xf32>
    %348 = vector.extract_strided_slice %297 {offsets = [12, 96], sizes = [1, 32], strides = [1, 1]} : vector<16x384xf32> to vector<1x32xf32>
    %349 = vector.extract_strided_slice %297 {offsets = [12, 144], sizes = [1, 32], strides = [1, 1]} : vector<16x384xf32> to vector<1x32xf32>
    %350 = vector.extract_strided_slice %297 {offsets = [13, 0], sizes = [1, 32], strides = [1, 1]} : vector<16x384xf32> to vector<1x32xf32>
    %351 = vector.extract_strided_slice %297 {offsets = [13, 48], sizes = [1, 32], strides = [1, 1]} : vector<16x384xf32> to vector<1x32xf32>
    %352 = vector.extract_strided_slice %297 {offsets = [13, 96], sizes = [1, 32], strides = [1, 1]} : vector<16x384xf32> to vector<1x32xf32>
    %353 = vector.extract_strided_slice %297 {offsets = [13, 144], sizes = [1, 32], strides = [1, 1]} : vector<16x384xf32> to vector<1x32xf32>
    %354 = vector.extract_strided_slice %297 {offsets = [14, 0], sizes = [1, 32], strides = [1, 1]} : vector<16x384xf32> to vector<1x32xf32>
    %355 = vector.extract_strided_slice %297 {offsets = [14, 48], sizes = [1, 32], strides = [1, 1]} : vector<16x384xf32> to vector<1x32xf32>
    %356 = vector.extract_strided_slice %297 {offsets = [14, 96], sizes = [1, 32], strides = [1, 1]} : vector<16x384xf32> to vector<1x32xf32>
    %357 = vector.extract_strided_slice %297 {offsets = [14, 144], sizes = [1, 32], strides = [1, 1]} : vector<16x384xf32> to vector<1x32xf32>
    %358 = vector.extract_strided_slice %297 {offsets = [15, 0], sizes = [1, 32], strides = [1, 1]} : vector<16x384xf32> to vector<1x32xf32>
    %359 = vector.extract_strided_slice %297 {offsets = [15, 48], sizes = [1, 32], strides = [1, 1]} : vector<16x384xf32> to vector<1x32xf32>
    %360 = vector.extract_strided_slice %297 {offsets = [15, 96], sizes = [1, 32], strides = [1, 1]} : vector<16x384xf32> to vector<1x32xf32>
    %361 = vector.extract_strided_slice %297 {offsets = [15, 144], sizes = [1, 32], strides = [1, 1]} : vector<16x384xf32> to vector<1x32xf32>
    %362 = tpu.concatenate %298, %299, %300, %301, %302, %303, %304, %305, %306, %307, %308, %309, %310, %311, %312, %313 in 1 : vector<1x32xf32>, vector<1x32xf32>, vector<1x32xf32>, vector<1x32xf32>, vector<1x32xf32>, vector<1x32xf32>, vector<1x32xf32>, vector<1x32xf32>, vector<1x32xf32>, vector<1x32xf32>, vector<1x32xf32>, vector<1x32xf32>, vector<1x32xf32>, vector<1x32xf32>, vector<1x32xf32>, vector<1x32xf32> -> vector<1x512xf32>
    %363 = tpu.concatenate %314, %315, %316, %317, %318, %319, %320, %321, %322, %323, %324, %325, %326, %327, %328, %329 in 1 : vector<1x32xf32>, vector<1x32xf32>, vector<1x32xf32>, vector<1x32xf32>, vector<1x32xf32>, vector<1x32xf32>, vector<1x32xf32>, vector<1x32xf32>, vector<1x32xf32>, vector<1x32xf32>, vector<1x32xf32>, vector<1x32xf32>, vector<1x32xf32>, vector<1x32xf32>, vector<1x32xf32>, vector<1x32xf32> -> vector<1x512xf32>
    %364 = tpu.concatenate %330, %331, %332, %333, %334, %335, %336, %337, %338, %339, %340, %341, %342, %343, %344, %345 in 1 : vector<1x32xf32>, vector<1x32xf32>, vector<1x32xf32>, vector<1x32xf32>, vector<1x32xf32>, vector<1x32xf32>, vector<1x32xf32>, vector<1x32xf32>, vector<1x32xf32>, vector<1x32xf32>, vector<1x32xf32>, vector<1x32xf32>, vector<1x32xf32>, vector<1x32xf32>, vector<1x32xf32>, vector<1x32xf32> -> vector<1x512xf32>
    %365 = tpu.concatenate %346, %347, %348, %349, %350, %351, %352, %353, %354, %355, %356, %357, %358, %359, %360, %361 in 1 : vector<1x32xf32>, vector<1x32xf32>, vector<1x32xf32>, vector<1x32xf32>, vector<1x32xf32>, vector<1x32xf32>, vector<1x32xf32>, vector<1x32xf32>, vector<1x32xf32>, vector<1x32xf32>, vector<1x32xf32>, vector<1x32xf32>, vector<1x32xf32>, vector<1x32xf32>, vector<1x32xf32>, vector<1x32xf32> -> vector<1x512xf32>
    %366 = tpu.concatenate %362, %363, %364, %365 in 1 : vector<1x512xf32>, vector<1x512xf32>, vector<1x512xf32>, vector<1x512xf32> -> vector<1x2048xf32>
    %c0_121 = arith.constant 0 : index
    %c0_122 = arith.constant 0 : index
    %367 = vector.load %arg20[%c0_121, %c0_122] : memref<2048x64xf32, #tpu.memory_space<vmem>>, vector<2048x64xf32>
    %cst_123 = arith.constant dense<0.000000e+00> : vector<1x64xf32>
    %368 = tpu.matmul %366, %367, %cst_123 {dimension_numbers = #tpu.dot_dimension_numbers<[1], [0], [0], [1], [0, 0, 1, 1], [], []>} : vector<1x2048xf32>, vector<2048x64xf32>, vector<1x64xf32> -> vector<1x64xf32>
    %c0_124 = arith.constant 0 : index
    %c0_125 = arith.constant 0 : index
    %369 = vector.load %arg21[%c0_124, %c0_125] : memref<1x64xf32, #tpu.memory_space<vmem>>, vector<1x64xf32>
    %370 = arith.addf %368, %369 : vector<1x64xf32>
    %cst_126 = arith.constant 0.000000e+00 : f32
    %371 = vector.broadcast %cst_126 : f32 to vector<1x64xf32>
    %372 = arith.maximumf %370, %371 : vector<1x64xf32>
    %c0_127 = arith.constant 0 : index
    %c0_128 = arith.constant 0 : index
    %373 = vector.load %arg22[%c0_127, %c0_128] : memref<64x16xf32, #tpu.memory_space<vmem>>, vector<64x16xf32>
    %cst_129 = arith.constant dense<0.000000e+00> : vector<1x16xf32>
    %374 = tpu.matmul %372, %373, %cst_129 {dimension_numbers = #tpu.dot_dimension_numbers<[1], [0], [0], [1], [0, 0, 1, 1], [], []>} : vector<1x64xf32>, vector<64x16xf32>, vector<1x16xf32> -> vector<1x16xf32>
    %c0_130 = arith.constant 0 : index
    %c0_131 = arith.constant 0 : index
    %375 = vector.load %arg23[%c0_130, %c0_131] : memref<1x16xf32, #tpu.memory_space<vmem>>, vector<1x16xf32>
    %376 = arith.addf %374, %375 : vector<1x16xf32>
    %cst_132 = arith.constant 0.000000e+00 : f32
    %377 = vector.broadcast %cst_132 : f32 to vector<1x16xf32>
    %378 = arith.maximumf %376, %377 : vector<1x16xf32>
    %c0_133 = arith.constant 0 : index
    %c0_134 = arith.constant 0 : index
    %379 = vector.load %arg24[%c0_133, %c0_134] : memref<16x128xf32, #tpu.memory_space<vmem>>, vector<16x128xf32>
    %cst_135 = arith.constant dense<0.000000e+00> : vector<1x128xf32>
    %380 = tpu.matmul %378, %379, %cst_135 {dimension_numbers = #tpu.dot_dimension_numbers<[1], [0], [0], [1], [0, 0, 1, 1], [], []>} : vector<1x16xf32>, vector<16x128xf32>, vector<1x128xf32> -> vector<1x128xf32>
    %c0_136 = arith.constant 0 : index
    %c0_137 = arith.constant 0 : index
    %381 = vector.load %arg25[%c0_136, %c0_137] : memref<1x128xf32, #tpu.memory_space<vmem>>, vector<1x128xf32>
    %382 = arith.addf %380, %381 : vector<1x128xf32>
    %c0_138 = arith.constant 0 : index
    %c0_139 = arith.constant 0 : index
    %c0_140 = arith.constant 0 : index
    %383 = vector.load %arg26[%c0_138, %c0_139, %c0_140] : memref<1x1x128xf32, #tpu.memory_space<vmem>>, vector<1x1x128xf32>
    %384 = vector.shape_cast %383 : vector<1x1x128xf32> to vector<1x128xf32>
    %385 = vector.shape_cast %382 : vector<1x128xf32> to vector<1x1x128xf32>
    tpu.vector_store %arg26[%c0_138, %c0_139, %c0_140], %385 {strides = array<i32>} : memref<1x1x128xf32, #tpu.memory_space<vmem>>, vector<1x1x128xf32>,
    return
  }
  func.func @transform_0(%arg0: i32) -> (i32, i32, i32, i32) {
    %c0_i32 = arith.constant 0 : i32
    %c0_i32_0 = arith.constant 0 : i32
    %c0_i32_1 = arith.constant 0 : i32
    %c0_i32_2 = arith.constant 0 : i32
    return %arg0, %c0_i32, %c0_i32_0, %c0_i32_1 : i32, i32, i32, i32
  }
  func.func @transform_1(%arg0: i32) -> (i32, i32) {
    %c0_i32 = arith.constant 0 : i32
    %c0_i32_0 = arith.constant 0 : i32
    %c0_i32_1 = arith.constant 0 : i32
    return %c0_i32, %c0_i32_0 : i32, i32
  }
  func.func @transform_2(%arg0: i32) -> (i32, i32) {
    %c0_i32 = arith.constant 0 : i32
    %c0_i32_0 = arith.constant 0 : i32
    %c0_i32_1 = arith.constant 0 : i32
    return %c0_i32, %c0_i32_0 : i32, i32
  }
  func.func @transform_3(%arg0: i32) -> (i32, i32) {
    %c0_i32 = arith.constant 0 : i32
    %c0_i32_0 = arith.constant 0 : i32
    %c0_i32_1 = arith.constant 0 : i32
    return %c0_i32, %c0_i32_0 : i32, i32
  }
  func.func @transform_4(%arg0: i32) -> (i32, i32) {
    %c0_i32 = arith.constant 0 : i32
    %c0_i32_0 = arith.constant 0 : i32
    %c0_i32_1 = arith.constant 0 : i32
    return %c0_i32, %c0_i32_0 : i32, i32
  }
  func.func @transform_5(%arg0: i32) -> (i32, i32) {
    %c0_i32 = arith.constant 0 : i32
    %c0_i32_0 = arith.constant 0 : i32
    %c0_i32_1 = arith.constant 0 : i32
    return %c0_i32, %c0_i32_0 : i32, i32
  }
  func.func @transform_6(%arg0: i32) -> (i32, i32) {
    %c0_i32 = arith.constant 0 : i32
    %c0_i32_0 = arith.constant 0 : i32
    %c0_i32_1 = arith.constant 0 : i32
    return %c0_i32, %c0_i32_0 : i32, i32
  }
  func.func @transform_7(%arg0: i32) -> (i32, i32) {
    %c0_i32 = arith.constant 0 : i32
    %c0_i32_0 = arith.constant 0 : i32
    %c0_i32_1 = arith.constant 0 : i32
    return %c0_i32, %c0_i32_0 : i32, i32
  }
  func.func @transform_8(%arg0: i32) -> (i32, i32) {
    %c0_i32 = arith.constant 0 : i32
    %c0_i32_0 = arith.constant 0 : i32
    %c0_i32_1 = arith.constant 0 : i32
    return %c0_i32, %c0_i32_0 : i32, i32
  }
  func.func @transform_9(%arg0: i32) -> (i32, i32) {
    %c0_i32 = arith.constant 0 : i32
    %c0_i32_0 = arith.constant 0 : i32
    %c0_i32_1 = arith.constant 0 : i32
    return %c0_i32, %c0_i32_0 : i32, i32
  }
  func.func @transform_10(%arg0: i32) -> (i32, i32) {
    %c0_i32 = arith.constant 0 : i32
    %c0_i32_0 = arith.constant 0 : i32
    %c0_i32_1 = arith.constant 0 : i32
    return %c0_i32, %c0_i32_0 : i32, i32
  }
  func.func @transform_11(%arg0: i32) -> (i32, i32) {
    %c0_i32 = arith.constant 0 : i32
    %c0_i32_0 = arith.constant 0 : i32
    %c0_i32_1 = arith.constant 0 : i32
    return %c0_i32, %c0_i32_0 : i32, i32
  }
  func.func @transform_12(%arg0: i32) -> (i32, i32) {
    %c0_i32 = arith.constant 0 : i32
    %c0_i32_0 = arith.constant 0 : i32
    %c0_i32_1 = arith.constant 0 : i32
    return %c0_i32, %c0_i32_0 : i32, i32
  }
  func.func @transform_13(%arg0: i32) -> (i32, i32) {
    %c0_i32 = arith.constant 0 : i32
    %c0_i32_0 = arith.constant 0 : i32
    %c0_i32_1 = arith.constant 0 : i32
    return %c0_i32, %c0_i32_0 : i32, i32
  }
  func.func @transform_14(%arg0: i32) -> (i32, i32) {
    %c0_i32 = arith.constant 0 : i32
    %c0_i32_0 = arith.constant 0 : i32
    %c0_i32_1 = arith.constant 0 : i32
    return %c0_i32, %c0_i32_0 : i32, i32
  }
  func.func @transform_15(%arg0: i32) -> (i32, i32) {
    %c0_i32 = arith.constant 0 : i32
    %c0_i32_0 = arith.constant 0 : i32
    %c0_i32_1 = arith.constant 0 : i32
    return %c0_i32, %c0_i32_0 : i32, i32
  }
  func.func @transform_16(%arg0: i32) -> (i32, i32) {
    %c0_i32 = arith.constant 0 : i32
    %c0_i32_0 = arith.constant 0 : i32
    %c0_i32_1 = arith.constant 0 : i32
    return %c0_i32, %c0_i32_0 : i32, i32
  }
  func.func @transform_17(%arg0: i32) -> (i32, i32) {
    %c0_i32 = arith.constant 0 : i32
    %c0_i32_0 = arith.constant 0 : i32
    %c0_i32_1 = arith.constant 0 : i32
    return %c0_i32, %c0_i32_0 : i32, i32
  }
  func.func @transform_18(%arg0: i32) -> (i32, i32) {
    %c0_i32 = arith.constant 0 : i32
    %c0_i32_0 = arith.constant 0 : i32
    %c0_i32_1 = arith.constant 0 : i32
    return %c0_i32, %c0_i32_0 : i32, i32
  }
  func.func @transform_19(%arg0: i32) -> (i32, i32) {
    %c0_i32 = arith.constant 0 : i32
    %c0_i32_0 = arith.constant 0 : i32
    %c0_i32_1 = arith.constant 0 : i32
    return %c0_i32, %c0_i32_0 : i32, i32
  }
  func.func @transform_20(%arg0: i32) -> (i32, i32) {
    %c0_i32 = arith.constant 0 : i32
    %c0_i32_0 = arith.constant 0 : i32
    %c0_i32_1 = arith.constant 0 : i32
    return %c0_i32, %c0_i32_0 : i32, i32
  }
  func.func @transform_21(%arg0: i32) -> (i32, i32) {
    %c0_i32 = arith.constant 0 : i32
    %c0_i32_0 = arith.constant 0 : i32
    %c0_i32_1 = arith.constant 0 : i32
    return %c0_i32, %c0_i32_0 : i32, i32
  }
  func.func @transform_22(%arg0: i32) -> (i32, i32) {
    %c0_i32 = arith.constant 0 : i32
    %c0_i32_0 = arith.constant 0 : i32
    %c0_i32_1 = arith.constant 0 : i32
    return %c0_i32, %c0_i32_0 : i32, i32
  }
  func.func @transform_23(%arg0: i32) -> (i32, i32) {
    %c0_i32 = arith.constant 0 : i32
    %c0_i32_0 = arith.constant 0 : i32
    %c0_i32_1 = arith.constant 0 : i32
    return %c0_i32, %c0_i32_0 : i32, i32
  }
  func.func @transform_24(%arg0: i32) -> (i32, i32) {
    %c0_i32 = arith.constant 0 : i32
    %c0_i32_0 = arith.constant 0 : i32
    %c0_i32_1 = arith.constant 0 : i32
    return %c0_i32, %c0_i32_0 : i32, i32
  }
  func.func @transform_25(%arg0: i32) -> (i32, i32, i32) {
    %c0_i32 = arith.constant 0 : i32
    %c0_i32_0 = arith.constant 0 : i32
    %c0_i32_1 = arith.constant 0 : i32
    return %arg0, %c0_i32, %c0_i32_0 : i32, i32, i32
  }
}

</mosaic_0001>

<bundles_post_ra>
// kernel: simple_model_forward.1
= control target key start
LH: loop header
LB: loop body
LE: loop exit
PB: predicated region body
PF: predicated region fallthrough
CT: control target
= control target key end

     0   :  { %s8363_s0 = inlined_call_operand.vmem [shape: f32[2,1,32,32], index: 0, kind: input, shape index: {}]   ;;  %s8364_s1 = inlined_call_operand.vmem [shape: f32[4,9], index: 1, kind: input, shape index: {}]   ;;  %s8365_s2 = inlined_call_operand.vmem [shape: f32[4,1], index: 2, kind: input, shape index: {}]   ;;  %s8366_s3 = inlined_call_operand.vmem [shape: f32[1,1280], index: 3, kind: input, shape index: {}]   ;;  %s8367_s4 = inlined_call_operand.vmem [shape: f32[4,36], index: 4, kind: input, shape index: {}]   ;;  %s8368_s5 = inlined_call_operand.vmem [shape: f32[4,1], index: 5, kind: input, shape index: {}]   ;;  %s8369_s6 = inlined_call_operand.<no memory space> [shape: f32[1,1], index: 6, kind: input, shape index: {}]   ;;  %s8370_s7 = inlined_call_operand.vmem [shape: f32[8,36], index: 7, kind: input, shape index: {}]   ;;  %s8371_s8 = inlined_call_operand.vmem [shape: f32[8,1], index: 8, kind: input, shape index: {}]   ;;  %s8372_s10 = inlined_call_operand.vmem [shape: f32[8,72], index: 10, kind: input, shape index: {}]   ;;  %s8373_s11 = inlined_call_operand.vmem [shape: f32[8,1], index: 11, kind: input, shape index: {}]   ;;  %s8374_s12 = inlined_call_operand.vmem [shape: f32[1,512], index: 12, kind: input, shape index: {}]   ;;  %s8375_s13 = inlined_call_operand.vmem [shape: f32[16,72], index: 13, kind: input, shape index: {}]   ;;  %s8376_s14 = inlined_call_operand.vmem [shape: f32[16,1], index: 14, kind: input, shape index: {}]   ;;  %s8377_s16 = inlined_call_operand.vmem [shape: f32[16,144], index: 16, kind: input, shape index: {}]   ;;  %s8378_s17 = inlined_call_operand.vmem [shape: f32[16,1], index: 17, kind: input, shape index: {}]   ;;  %s8379_s19 = inlined_call_operand.vmem [shape: f32[2048,64], index: 19, kind: input, shape index: {}]   ;;  %s8380_s20 = inlined_call_operand.vmem [shape: f32[1,64], index: 20, kind: input, shape index: {}]   ;;  %s8381_s21 = inlined_call_operand.vmem [shape: f32[64,16], index: 21, kind: input, shape index: {}]   ;;  %s8382_s22 = inlined_call_operand.vmem [shape: f32[1,16], index: 22, kind: input, shape index: {}]   ;;  %s8383_s23 = inlined_call_operand.vmem [shape: f32[16,128], index: 23, kind: input, shape index: {}]   ;;  %s8384_s24 = inlined_call_operand.vmem [shape: f32[1,128], index: 24, kind: input, shape index: {}]   ;;  %s8385_s25 = inlined_call_operand.hbm [shape: f32[2,1,128], index: 25, kind: output, shape index: {}]   ;;  %s8386_s9 = inlined_call_operand.<no memory space> [shape: f32[1,1], index: 9, kind: input, shape index: {}]   ;;  %s8387_s15 = inlined_call_operand.<no memory space> [shape: f32[1,1], index: 15, kind: input, shape index: {}]   ;;  %s8388_s18 = inlined_call_operand.<no memory space> [shape: f32[1,1], index: 18, kind: input, shape index: {}]  }
   0x1   :  { %8481 = sst [smem:[#allocation46_spill]] %s8363_s0 }
   0x2   :  { %8482 = sst [smem:[#allocation47_spill]] %s8364_s1 }
   0x3   :  { %8483 = sst [smem:[#allocation48_spill]] %s8365_s2 }
   0x4   :  { %8484 = sst [smem:[#allocation49_spill]] %s8366_s3 }
   0x5   :  { %8485 = sst [smem:[#allocation50_spill]] %s8367_s4 }
   0x6   :  { %8486 = sst [smem:[#allocation51_spill]] %s8368_s5 }
   0x7   :  { %8487 = sst [smem:[#allocation52_spill]] %s8370_s7 }
   0x8   :  { %8488 = sst [smem:[#allocation53_spill]] %s8371_s8 }
   0x9   :  { %8489 = sst [smem:[#allocation54_spill]] %s8372_s10 }
   0xa   :  { %8490 = sst [smem:[#allocation55_spill]] %s8373_s11 }
   0xb   :  { %8491 = sst [smem:[#allocation56_spill]] %s8374_s12 }
   0xc   :  { %8492 = sst [smem:[#allocation57_spill]] %s8375_s13 }
   0xd   :  { %38 = vsyncpa [#allocation7], 0 }
   0xe   :  { %40 = vsyncpa [#allocation7 + $0x1], 0  ;;  %s5435_s29 = smov 0   ;;  %s5437_s2 = smov 0  }
   0xf   :  { %s5439_s6 = smov 0   ;;  %s5441_s30 = smov 0  }
  0x10 LB: > { %s5456_s9 = sadd.s32 4294967295, %s5240_s30   ;;  %s4489_s15 = sadd.s32 4294967294, %s5240_s30   ;;  %s5240_s30 = sphi %s5441_s30, %s8702_s30   ;;  %s5236_s6 = sphi %s5439_s6, %s8701_s6   ;;  %s5232_s2 = sphi %s5437_s2, %s8700_s2   ;;  %s5228_s29 = sphi %s5435_s29, %s8699_s29  }
  0x11   : > { %s5460_s18 = sadd.s32 1, %s5240_s30   ;;  %s583_s7 = sadd.s32 1, %s5236_s6 }
  0x12   : > { %s580_s3 = ssub.s32 %s5240_s30, %s5460_s18  ;;  %p593_p0 = scmp.ne.s32.totalorder %s5236_s6, %s5232_s2 }
  0x13   : > { %p581_p1 = scmp.eq.s32.totalorder %s580_s3, 0  ;;  %p594_p2 = scmp.eq.s32.totalorder %s5456_s9, 1 }
  0x14   : > { %p599_p3 = scmp.ne.s32.totalorder %s5232_s2, %s5228_s29  ;;  %p600_p4 = scmp.eq.s32.totalorder %s4489_s15, 1 }
  0x15   : > { %s5471_s26 = scalar_select %p581_p1, %s5236_s6, %s583_s7  }
  0x16   : > { %p5473_p5 = por %p594_p2, %p593_p0  ;;  %p5477_p6 = por %p600_p4, %p599_p3 }
  0x17   : > { %8493 = sst [smem:[#allocation9_spill]] %s5471_s26  ;;  %p4492_p7 = scmp.ge.s32.totalorder %s5240_s30, 1 }
  0x18   : > { %p698_p8 = scmp.lt.s32.totalorder %s5240_s30, 3 }
  0x1a   : > { %p699_p9 = pnand %p4492_p7, %p698_p8 }
  0x1c   : > { %702 = sbr.rel (%p699_p9) target bundleno = 3527 (0xdc7), region = 120 }
  0x21   : > { %p765_p10 = scmp.lt.s32.totalorder %s5456_s9, 1  ;;  %s8496_s5 = sld [smem:[#allocation46_spill]]  ;;  %v5250_v21 = vmov 1   ;;  %v5251_v27 = vmov 3   ;;  %v5259_v34 = vmov 2   ;;  %v5261_v36 = vmov 4  }
  0x22   : > { %s5242_s15 = smov 2   ;;  %s8392_s7 = smov 44   ;;  %4647 = vset.pattern.permute.xlu0 %v5250_v21  ;;  %4649 = vset.pattern.permute.xlu1 %v5251_v27  ;;  %v5262_v38 = vmov 6   ;;  %v5263_v40 = vmov 8   ;;  %v5264_v41 = vmov 5   ;;  %vm868_vm0 = vcmask 15360  }
  0x23   : > { %s766_s27 = scalar_select %p765_p10, %s5456_s9, 1  ;;  %4648 = vset.pattern.permute.xlu2 %v5259_v34  ;;  %vm870_vm1 = vcmask 277504   ;;  %vm8471_vm2 = vcmask 293888   ;;  %vm8425_vm3 = vcmask 556032   ;;  %vm876_vm4 = vcmask 572416  }
  0x24   : > { %s5244_s3 = smov 104   ;;  %s5247_s28 = smov 78   ;;  %vm878_vm5 = vcmask 834560   ;;  %vm8416_vm6 = vcmask 850944   ;;  %v5265_v62 = vmov 0   ;;  %v5266_v63 = vmov 7  }
  0x25   : > { %s4544_s4 = sshll.u32 %s766_s27, 5  ;;  %s5245_s27 = smov 10   ;;  %vm882_vm7 = vcmask 64512   ;;  %vm884_vm8 = vcmask 80896   ;;  %vm886_vm9 = vcmask 343040   ;;  %vm8432_vm10 = vcmask 359424  }
  0x26   : > { %s8394_s10 = smov 70   ;;  %vm8433_vm11 = vcmask 621568   ;;  %vm892_vm12 = vcmask 637952   ;;  %vm894_vm13 = vcmask 900096   ;;  %vm8396_vm14 = vcmask 916480   ;;  %s8599_s26 = sld [smem:[#allocation53_spill]] }
  0x27   : > { %s5488_s0 = scalar_lea.vmem %s8496_s5, %s4544_s4  ;;  %s5246_s4 = smov 36   ;;  %vm816_vm15 = vcmask 56320  }
  0x28   : > { %v771_v0 = vld [vmem:[%s5488_s0 + $0x8] sm:$0xff]  ;;  %v772_v3 = vld [vmem:[%s5488_s0 + $0x10] sm:$0xff]  ;;  %v773_v12 = vld [vmem:[%s5488_s0 + $0x18] sm:$0xff]  ;;  %s8390_s5 = smov 112   ;;  %s8647_s11 = sld [smem:[#allocation55_spill]] }
  0x29   : > { %837 = vrot.lane.b32.xlu1 %v771_v0, %s5242_s15  ;;  %v856_v1 = vrot.slane %v771_v0, 5  ;;  %v848_v2 = vrot.slane %v771_v0, 3  ;;  %v852_v4 = vrot.slane %v771_v0, 4  ;;  %v840_v5 = vrot.slane %v771_v0, 1  ;;  %v770_v25 = vld [vmem:[%s5488_s0] sm:$0xff]  ;;  %s5256_s0 = smov 77  }
  0x2a   : > { %v910_v6 = vrot.slane %v772_v3, 3  ;;  %v902_v7 = vrot.slane %v772_v3, 1  ;;  %v860_v8 = vrot.slane %v771_v0, 6  ;;  %v844_v9 = vrot.slane %v771_v0, 2  ;;  %s8656_s12 = sld [smem:[#allocation56_spill]] }
  0x2b   : > { %857 = vrot.lane.b32.xlu2 %v856_v1, %s8392_s7  ;;  %849 = vrot.lane.b32.xlu0 %v848_v2, %s5244_s3  ;;  %v914_v10 = vrot.slane %v772_v3, 4  ;;  %v906_v11 = vrot.slane %v772_v3, 2  ;;  %v918_v13 = vrot.slane %v772_v3, 5  ;;  %v864_v14 = vrot.slane %v771_v0, 7  ;;  %s8665_s13 = sld [smem:[#allocation57_spill]] }
  0x2c   : > { %v957_v15 = vrot.slane %v773_v12, 3  ;;  %v961_v16 = vrot.slane %v773_v12, 4  ;;  %v922_v17 = vrot.slane %v772_v3, 6  ;;  %v965_v18 = vrot.slane %v773_v12, 5 }
  0x2d   : > { %v926_v19 = vrot.slane %v772_v3, 7  ;;  %v949_v20 = vrot.slane %v773_v12, 1  ;;  %v953_v22 = vrot.slane %v773_v12, 2  ;;  %v969_v23 = vrot.slane %v773_v12, 6 }
  0x2e   : > { %v973_v24 = vrot.slane %v773_v12, 7  ;;  %v786_v26 = vrot.slane %v770_v25, 3  ;;  %v782_v28 = vrot.slane %v770_v25, 2  ;;  %v790_v29 = vrot.slane %v770_v25, 4 }
  0x2f   : > { %v798_v30 = vrot.slane %v770_v25, 6  ;;  %v794_v31 = vrot.slane %v770_v25, 5  ;;  %v802_v32 = vrot.slane %v770_v25, 7  ;;  %v778_v35 = vrot.slane %v770_v25, 1 }
  0x31   : > { %899 = vrot.lane.b32.xlu1 %v772_v3, %s5242_s15 }
  0x33   : > { %853 = vrot.lane.b32.xlu0 %v852_v4, %s5245_s27  ;;  %841 = vrot.lane.b32.xlu2 %v840_v5, %s5246_s4 }
  0x39   : > { %911 = vrot.lane.b32.xlu1 %v910_v6, %s5244_s3 }
  0x3b   : > { %903 = vrot.lane.b32.xlu0 %v902_v7, %s5246_s4  ;;  %861 = vrot.lane.b32.xlu2 %v860_v8, %s5247_s28 }
  0x41   : > { %845 = vrot.lane.b32.xlu1 %v844_v9, %s8394_s10 }
  0x43   : > { %915 = vrot.lane.b32.xlu0 %v914_v10, %s5245_s27  ;;  %907 = vrot.lane.b32.xlu2 %v906_v11, %s8394_s10 }
  0x49   : > { %919 = vrot.lane.b32.xlu1 %v918_v13, %s8392_s7 }
  0x4b   : > { %865 = vrot.lane.b32.xlu0 %v864_v14, %s8390_s5  ;;  %958 = vrot.lane.b32.xlu2 %v957_v15, %s5244_s3  ;;  %s5253_s3 = smov 103  }
  0x51   : > { %962 = vrot.lane.b32.xlu1 %v961_v16, %s5245_s27  ;;  %s5254_s27 = smov 43  }
  0x53   : > { %923 = vrot.lane.b32.xlu0 %v922_v17, %s5247_s28  ;;  %946 = vrot.lane.b32.xlu2 %v773_v12, %s5242_s15  ;;  %s5252_s15 = smov 9  }
  0x59   : > { %966 = vrot.lane.b32.xlu1 %v965_v18, %s8392_s7  ;;  %s5267_s7 = smov 49  }
  0x5b   : > { %927 = vrot.lane.b32.xlu0 %v926_v19, %s8390_s5  ;;  %950 = vrot.lane.b32.xlu2 %v949_v20, %s5246_s4  ;;  %s5255_s4 = smov 111  }
  0x61   : > { %954 = vrot.lane.b32.xlu1 %v953_v22, %s8394_s10  ;;  %s8497_s10 = sld [smem:[#allocation47_spill]] }
  0x63   : > { %970 = vrot.lane.b32.xlu0 %v969_v23, %s5247_s28  ;;  %974 = vrot.lane.b32.xlu2 %v973_v24, %s8390_s5  ;;  %s5257_s28 = smov 17   ;;  %s8397_s5 = smov 65  }
  0x67   : > { %v5518_v33 = vld [vmem:[%s8497_s10] sm:$0xf]  ;;  %s5268_s10 = smov 81  }
  0x69   : > { %787 = vrot.lane.b32.xlu1 %v786_v26, %s5252_s15  ;;  %s5258_s15 = smov 35  }
  0x6b   : > { %783 = vrot.lane.b32.xlu0 %v782_v28, %s5253_s3  ;;  %791 = vrot.lane.b32.xlu2 %v790_v29, %s5254_s27  ;;  %s8399_s3 = smov 69   ;;  %s8463_s27 = smov 126  }
  0x71   : > { %799 = vrot.lane.b32.xlu1 %v798_v30, %s5255_s4  ;;  %s8401_s4 = smov 127  }
  0x73   : > { %795 = vrot.lane.b32.xlu0 %v794_v31, %s5256_s0  ;;  %803 = vrot.lane.b32.xlu2 %v802_v32, %s5257_s28  ;;  %s8405_s0 = smov 94   ;;  %s5274_s28 = smov 93  }
  0x79   : > { %775 = vrot.lane.b32.xlu1 %v770_v25, %s5258_s15 }
  0x7b   : > { %1066 = vperm.xlu0 %4647, %v5518_v33   ;;  %1140 = vperm.xlu2 %4648, %v5518_v33  }
  0x81   : > { %779 = vrot.lane.b32.xlu1 %v778_v35, %s8399_s3  ;;  %s5278_s3 = smov 58  }
  0x83   : > { %4650 = vset.pattern.permute.xlu0 %v5261_v36  ;;  %4652 = vset.pattern.permute.xlu2 %v5262_v38 }
  0x84   : > { %1288 = vperm.xlu0 %4650, %v5518_v33   ;;  %1436 = vperm.xlu2 %4652, %v5518_v33  }
  0x85   : > { %v5525_v37 = vpop.permute.xlu2 %857 }
  0x89   : > { %1214 = vperm.xlu1 %4649, %v5518_v33  }
  0x8c   : > { %4654 = vset.pattern.permute.xlu2 %v5263_v40  ;;  %4655 = vset.pattern.permute.xlu0 %v5265_v62 }
  0x8d   : > { %v842_v39 = vpop.permute.xlu2 %841  ;;  %1584 = vperm.xlu2 %4654, %v5518_v33  }
  0x91   : > { %4651 = vset.pattern.permute.xlu1 %v5264_v41 }
  0x92   : > { %1362 = vperm.xlu1 %4651, %v5518_v33  }
  0x95   : > { %v5531_v42 = vpop.permute.xlu2 %861  ;;  %4807 = vset.pattern.permute.xlu2 %v5265_v62 }
  0x9a   : > { %4653 = vset.pattern.permute.xlu1 %v5266_v63 }
  0x9b   : > { %v838_v43 = vpop.permute.xlu1 %837 }
  0x9c   : > { %v869_v49 = vsel %vm868_vm0, 0.0, %v838_v43 }
  0x9d   : > { %v850_v44 = vpop.permute.xlu0 %849  ;;  %v908_v45 = vpop.permute.xlu2 %907  ;;  %v871_v51 = vsel %vm870_vm1, %v869_v49, 0.0 }
  0x9e   : > { %v873_v54 = vsel %vm8471_vm2, %v871_v51, %v842_v39  ;;  %v883_v3 = vsel %vm882_vm7, %v850_v44, 0.0 }
  0x9f   : > { %v875_v57 = vsel %vm8425_vm3, %v873_v54, 0.0 }
  0xa3   : > { %v900_v46 = vpop.permute.xlu1 %899 }
  0xa4   : > { %v930_v55 = vsel %vm868_vm0, 0.0, %v900_v46 }
  0xa5   : > { %v854_v47 = vpop.permute.xlu0 %853  ;;  %v5533_v48 = vpop.permute.xlu2 %958  ;;  %v931_v0 = vsel %vm870_vm1, %v930_v55, 0.0 }
  0xa6   : > { %v885_v6 = vsel %vm884_vm8, %v883_v3, %v854_v47 }
  0xa7   : > { %v887_v10 = vsel %vm886_vm9, %v885_v6, 0.0 }
  0xa8   : > { %v889_v12 = vsel %vm8432_vm10, %v887_v10, %v5525_v37  ;;  %v984_v37 = vsel %vm882_vm7, %v5533_v48, 0.0 }
  0xa9   : > { %v891_v16 = vsel %vm8433_vm11, %v889_v12, 0.0 }
  0xaa   : > { %v893_v17 = vsel %vm892_vm12, %v891_v16, %v5531_v42 }
  0xab   : > { %v912_v50 = vpop.permute.xlu1 %911  ;;  %v895_v20 = vsel %vm894_vm13, %v893_v17, 0.0 }
  0xac   : > { %v937_v21 = vsel %vm882_vm7, %v912_v50, 0.0  ;;  %vm824_vm7 = vcmask 613376  }
  0xad   : > { %v904_v52 = vpop.permute.xlu0 %903  ;;  %v947_v53 = vpop.permute.xlu2 %946 }
  0xae   : > { %v932_v2 = vsel %vm8471_vm2, %v931_v0, %v904_v52  ;;  %v977_v19 = vsel %vm868_vm0, 0.0, %v947_v53  ;;  %vm818_vm0 = vcmask 72704  }
  0xaf   : > { %v933_v5 = vsel %vm8425_vm3, %v932_v2, 0.0  ;;  %v978_v24 = vsel %vm870_vm1, %v977_v19, 0.0  ;;  %v8407_v2 = vmov 0.0  }
  0xb0   : > { %v934_v9 = vsel %vm876_vm4, %v933_v5, %v908_v45  ;;  %v5616_v3 = vperm.slane %v8407_v2, 0 }
  0xb1   : > { %v935_v11 = vsel %vm878_vm5, %v934_v9, 0.0 }
  0xb2   : > { %v936_v15 = vsel %vm8416_vm6, %v935_v11, %v912_v50 }
  0xb3   : > { %v846_v56 = vpop.permute.xlu1 %845 }
  0xb4   : > { %v877_v58 = vsel %vm876_vm4, %v875_v57, %v846_v56 }
  0xb5   : > { %v879_v59 = vsel %vm878_vm5, %v877_v58, 0.0  ;;  %v916_v60 = vpop.permute.xlu0 %915  ;;  %v951_v61 = vpop.permute.xlu2 %950 }
  0xb6   : > { %v881_v1 = vsel %vm8416_vm6, %v879_v59, %v850_v44  ;;  %v938_v25 = vsel %vm884_vm8, %v937_v21, %v916_v60  ;;  %v979_v26 = vsel %vm8471_vm2, %v978_v24, %v951_v61 }
  0xb7   : > { %994 = vrot.lane.b32.xlu2 %v881_v1, %s5267_s7  ;;  %v939_v27 = vsel %vm886_vm9, %v938_v25, 0.0  ;;  %v980_v28 = vsel %vm8425_vm3, %v979_v26, 0.0  ;;  %vm1257_vm3 = vcmask 769024  }
  0xbb   : > { %v920_v4 = vpop.permute.xlu1 %919 }
  0xbc   : > { %v940_v34 = vsel %vm8432_vm10, %v939_v27, %v920_v4 }
  0xbd   : > { %v866_v7 = vpop.permute.xlu0 %865  ;;  %v5551_v8 = vpop.permute.xlu2 %974  ;;  %v941_v39 = vsel %vm8433_vm11, %v940_v34, 0.0 }
  0xbe   : > { %1026 = vrot.lane.b32.xlu0 %v5551_v8, %s5268_s10  ;;  %998 = vrot.lane.b32.xlu1 %v866_v7, %s5267_s7  ;;  %v897_v23 = vsel %vm8396_vm14, %v895_v20, %v866_v7 }
  0xc3   : > { %v963_v13 = vpop.permute.xlu1 %962 }
  0xc4   : > { %v985_v38 = vsel %vm884_vm8, %v984_v37, %v963_v13  ;;  %vm826_vm8 = vcmask 629760  }
  0xc5   : > { %v924_v14 = vpop.permute.xlu0 %923  ;;  %v792_v36 = vpop.permute.xlu2 %791  ;;  %v986_v41 = vsel %vm886_vm9, %v985_v38, 0.0  ;;  %vm828_vm9 = vcmask 891904  }
  0xc6   : > { %1008 = vrot.lane.b32.xlu0 %v936_v15, %s8397_s5  ;;  %v942_v40 = vsel %vm892_vm12, %v941_v39, %v924_v14 }
  0xc7   : > { %v943_v43 = vsel %vm894_vm13, %v942_v40, 0.0 }
  0xcb   : > { %v967_v18 = vpop.permute.xlu1 %966 }
  0xcd   : > { %v928_v22 = vpop.permute.xlu0 %927  ;;  %v5599_v51 = vpop.permute.xlu2 %803 }
  0xce   : > { %996 = vrot.lane.b32.xlu0 %v897_v23, %s5267_s7  ;;  %1012 = vrot.lane.b32.xlu1 %v928_v22, %s8397_s5  ;;  %v944_v45 = vsel %vm8396_vm14, %v943_v43, %v928_v22  ;;  %s8403_s7 = smov 92  }
  0xd3   : > { %v955_v29 = vpop.permute.xlu1 %954 }
  0xd4   : > { %v981_v30 = vsel %vm876_vm4, %v980_v28, %v955_v29  ;;  %vm820_vm4 = vcmask 334848  }
  0xd5   : > { %v982_v31 = vsel %vm878_vm5, %v981_v30, 0.0  ;;  %v971_v32 = vpop.permute.xlu0 %970  ;;  %vm822_vm5 = vcmask 351232  }
  0xd6   : > { %1042 = vperm.xlu0 %4655, %v5518_v33   ;;  %1510 = vperm.xlu1 %4653, %v5518_v33   ;;  %v983_v35 = vsel %vm8416_vm6, %v982_v31, %v5533_v48  ;;  %v987_v33 = vsel %vm8432_vm10, %v986_v41, %v967_v18  ;;  %vm1109_vm6 = vcmask 1039360   ;;  %vm8467_vm10 = vcmask 752640  }
  0xd7   : > { %1022 = vrot.lane.b32.xlu2 %v983_v35, %s5268_s10  ;;  %v988_v47 = vsel %vm8433_vm11, %v987_v33, 0.0  ;;  %vm1479_vm11 = vcmask 490496  }
  0xd8   : > { %v989_v49 = vsel %vm892_vm12, %v988_v47, %v971_v32  ;;  %vm806_vm12 = vcmask 285696  }
  0xd9   : > { %v990_v53 = vsel %vm894_vm13, %v989_v49, 0.0 }
  0xda   : > { %v991_v57 = vsel %vm8396_vm14, %v990_v53, %v5551_v8  ;;  %vm8434_vm14 = vcmask 793600  }
  0xdb   : > { %v788_v42 = vpop.permute.xlu1 %787 }
  0xdd   : > { %v784_v44 = vpop.permute.xlu0 %783 }
  0xde   : > { %v817_v46 = vsel %vm816_vm15, %v784_v44, 0.0  ;;  %4656 = vset.pattern.permute.xlu1 %v5265_v62  ;;  %vm830_vm15 = vcmask 908288   ;;  %v5608_v62 = vpop.permute.xlu2 %1140 }
  0xdf   : > { %1010 = vrot.lane.b32.xlu2 %v944_v45, %s8397_s5  ;;  %v819_v48 = vsel %vm818_vm0, %v817_v46, %v788_v42  ;;  %vm808_vm0 = vcmask 547840   ;;  %s5277_s5 = smov 59  }
  0xe0   : > { %v821_v50 = vsel %vm820_vm4, %v819_v48, 0.0 }
  0xe1   : > { %v823_v52 = vsel %vm822_vm5, %v821_v50, %v792_v36  ;;  %vm810_vm5 = vcmask 564224  }
  0xe2   : > { %v825_v55 = vsel %vm824_vm7, %v823_v52, 0.0  ;;  %vm812_vm7 = vcmask 826368  }
  0xe3   : > { %v800_v54 = vpop.permute.xlu1 %799 }
  0xe5   : > { %v796_v56 = vpop.permute.xlu0 %795 }
  0xe6   : > { %v827_v58 = vsel %vm826_vm8, %v825_v55, %v796_v56  ;;  %v5635_v16 = vpop.permute.xlu2 %1436 }
  0xe7   : > { %1024 = vrot.lane.b32.xlu2 %v991_v57, %s5268_s10  ;;  %v829_v59 = vsel %vm828_vm9, %v827_v58, 0.0  ;;  %vm814_vm9 = vcmask 842752   ;;  %s5276_s10 = smov 60  }
  0xe8   : > { %v831_v60 = vsel %vm830_vm15, %v829_v59, %v800_v54  ;;  %vm832_vm15 = vcmask 121856  }
  0xe9   : > { %v5606_v61 = vperm.slane %v831_v60, 0  ;;  %v833_v24 = vsel %vm832_vm15, %v800_v54, 0.0  ;;  %vm8420_vm15 = vcmask 662528  }
  0xeb   : > { %8498 = vst [vmem:[#allocation10_spill] sm:$0xff] %v5606_v61  ;;  %v776_v63 = vpop.permute.xlu1 %775  ;;  %v1144_v0 = vmul.f32 %v5608_v62, %v5606_v61  ;;  %v1440_v29 = vmul.f32 %v5635_v16, %v5606_v61 }
  0xec   : > { %v807_v4 = vsel %vm806_vm12, 0.0, %v776_v63 }
  0xed   : > { %v5612_v1 = vpop.permute.xlu0 %1066  ;;  %1165 = vrot.lane.b32.xlu0 %v1144_v0, %s8463_s27  ;;  %v809_v6 = vsel %vm808_vm0, %v807_v4, 0.0  ;;  %vm8431_vm0 = vcmask 138240  }
  0xee   : > { %v1070_v5 = vmul.f32 %v5612_v1, %v5606_v61  ;;  %v1078_v7 = vmul.f32 %v5612_v1, %v5616_v3  ;;  %v5646_v20 = vpop.permute.xlu2 %1584  ;;  %v835_v25 = vsel %vm8431_vm0, %v833_v24, %v5599_v51  ;;  %vm1331_vm0 = vcmask 760832  }
  0xf0   : > { %1091 = vrot.lane.b32.xlu1 %v1070_v5, %s8401_s4 }
  0xf3   : > { %v780_v8 = vpop.permute.xlu1 %779 }
  0xf4   : > { %v811_v9 = vsel %vm810_vm5, %v809_v6, %v780_v8 }
  0xf5   : > { %v813_v10 = vsel %vm812_vm7, %v811_v9, 0.0  ;;  %1107 = vrot.lane.b32.xlu0 %v1078_v7, %s8401_s4  ;;  %vm8469_vm7 = vcmask 400384  }
  0xf6   : > { %v815_v11 = vsel %vm814_vm9, %v813_v10, %v784_v44  ;;  %v5638_v17 = vpop.permute.xlu0 %1288  ;;  %vm8437_vm9 = vcmask 531456  }
  0xf7   : > { %v5626_v12 = vperm.slane %v815_v11, 0  ;;  %v1292_v19 = vmul.f32 %v5638_v17, %v5606_v61 }
  0xf9   : > { %v1069_v13 = vmul.f32 %v5612_v1, %v5626_v12  ;;  %v1143_v18 = vmul.f32 %v5608_v62, %v5626_v12  ;;  %v1291_v32 = vmul.f32 %v5638_v17, %v5626_v12 }
  0xfb   : > { %1089 = vrot.lane.b32.xlu1 %v1069_v13, %s8401_s4  ;;  %v5631_v14 = vpop.permute.xlu1 %1214 }
  0xfc   : > { %v1218_v15 = vmul.f32 %v5631_v14, %v5606_v61  ;;  %v1217_v21 = vmul.f32 %v5631_v14, %v5626_v12 }
  0xfe   : > { %1239 = vrot.lane.b32.xlu2 %v1218_v15, %s8405_s0 }
 0x103   : > { %1163 = vrot.lane.b32.xlu1 %v1143_v18, %s8463_s27 }
 0x104   : > { %v5650_v22 = vpop.permute.xlu1 %1362 }
 0x105   : > { %v1366_v23 = vmul.f32 %v5650_v22, %v5606_v61 }
 0x106   : > { %1313 = vrot.lane.b32.xlu2 %v1292_v19, %s5274_s28 }
 0x10b   : > { %1237 = vrot.lane.b32.xlu1 %v1217_v21, %s8405_s0 }
 0x10e   : > { %1387 = vrot.lane.b32.xlu2 %v1366_v23, %s8403_s7 }
 0x111   : > { %v995_v26 = vpop.permute.xlu2 %994 }
 0x112   : > { %v1034_v27 = vsel %vm8469_vm7, %v835_v25, %v995_v26 }
 0x113   : > { %v5659_v28 = vperm.slane %v1034_v27, 0 }
 0x115   : > { %v1219_v30 = vmul.f32 %v5631_v14, %v5659_v28  ;;  %v1145_v31 = vmul.f32 %v5608_v62, %v5659_v28  ;;  %v1293_v34 = vmul.f32 %v5638_v17, %v5659_v28  ;;  %v1071_v35 = vmul.f32 %v5612_v1, %v5659_v28 }
 0x116   : > { %1461 = vrot.lane.b32.xlu2 %v1440_v29, %s5276_s10  ;;  %v1367_v36 = vmul.f32 %v5650_v22, %v5659_v28  ;;  %v1441_v37 = vmul.f32 %v5635_v16, %v5659_v28 }
 0x117   : > { %1241 = vrot.lane.b32.xlu0 %v1219_v30, %s8405_s0  ;;  %1167 = vrot.lane.b32.xlu1 %v1145_v31, %s8463_s27 }
 0x11e   : > { %1311 = vrot.lane.b32.xlu2 %v1291_v32, %s5274_s28 }
 0x11f   : > { %1315 = vrot.lane.b32.xlu0 %v1293_v34, %s5274_s28 }
 0x126   : > { %1093 = vrot.lane.b32.xlu2 %v1071_v35, %s8401_s4 }
 0x127   : > { %1389 = vrot.lane.b32.xlu0 %v1367_v36, %s8403_s7 }
 0x12f   : > { %1463 = vrot.lane.b32.xlu0 %v1441_v37, %s5276_s10 }
 0x130   : > { %v1027_v38 = vpop.permute.xlu0 %1026  ;;  %v999_v56 = vpop.permute.xlu1 %998 }
 0x131   : > { %v5685_v39 = vpop.permute.xlu2 %1022 }
 0x138   : > { %v1009_v40 = vpop.permute.xlu0 %1008 }
 0x139   : > { %v1011_v41 = vpop.permute.xlu2 %1010 }
 0x13a   : > { %v1015_v42 = vsel %vm8437_vm9, %v1009_v40, %v1011_v41 }
 0x13b   : > { %v5688_v33 = vperm.slane %v1015_v42, 0 }
 0x13d   : > { %v1148_v43 = vmul.f32 %v5608_v62, %v5688_v33  ;;  %v1222_v51 = vmul.f32 %v5631_v14, %v5688_v33  ;;  %v1074_v53 = vmul.f32 %v5612_v1, %v5688_v33  ;;  %v1296_v55 = vmul.f32 %v5638_v17, %v5688_v33 }
 0x13e   : > { %v1370_v29 = vmul.f32 %v5650_v22, %v5688_v33 }
 0x13f   : > { %1173 = vrot.lane.b32.xlu0 %v1148_v43, %s8463_s27 }
 0x140   : > { %v997_v44 = vpop.permute.xlu0 %996  ;;  %v1013_v18 = vpop.permute.xlu1 %1012 }
 0x141   : > { %v1001_v45 = vsel %vm8469_vm7, %v995_v26, %v997_v44  ;;  %v1025_v47 = vpop.permute.xlu2 %1024  ;;  %v1002_v57 = vsel %vm8469_vm7, %v997_v44, %v999_v56  ;;  %v1016_v26 = vsel %vm8437_vm9, %v1011_v41, %v1013_v18  ;;  %v1588_v18 = vmul.f32 %v5646_v20, %v5606_v61 }
 0x142   : > { %v5694_v46 = vperm.slane %v1001_v45, 0  ;;  %v1029_v50 = vsel %vm8420_vm15, %v5685_v39, %v1025_v47  ;;  %v1035_v60 = vsel %vm8437_vm9, %v1002_v57, %v1009_v40  ;;  %v1030_v4 = vsel %vm8420_vm15, %v1025_v47, %v1027_v38 }
 0x143   : > { %v5707_v52 = vperm.slane %v1029_v50, 0  ;;  %v5729_v0 = vperm.slane %v1035_v60, 0  ;;  %v1038_v8 = vsel %vm8434_vm14, %v1030_v4, 0.0  ;;  %v1036_v31 = vsel %vm8420_vm15, %v1016_v26, %v5685_v39 }
 0x144   : > { %v1072_v48 = vmul.f32 %v5612_v1, %v5694_v46  ;;  %v1146_v49 = vmul.f32 %v5608_v62, %v5694_v46  ;;  %v1220_v58 = vmul.f32 %v5631_v14, %v5694_v46  ;;  %v1294_v5 = vmul.f32 %v5638_v17, %v5694_v46 }
 0x145   : > { %v1076_v54 = vmul.f32 %v5612_v1, %v5707_v52  ;;  %v1150_v59 = vmul.f32 %v5608_v62, %v5707_v52  ;;  %v1224_v63 = vmul.f32 %v5631_v14, %v5707_v52  ;;  %8499 = vst [vmem:[#allocation11_spill] sm:$0xff] %v5729_v0  ;;  %v1073_v6 = vmul.f32 %v5612_v1, %v5729_v0 }
 0x146   : > { %1095 = vrot.lane.b32.xlu1 %v1072_v48, %s8401_s4  ;;  %1169 = vrot.lane.b32.xlu2 %v1146_v49, %s8463_s27  ;;  %v1147_v7 = vmul.f32 %v5608_v62, %v5729_v0  ;;  %v5742_v9 = vperm.slane %v1038_v8, 0  ;;  %v1368_v10 = vmul.f32 %v5650_v22, %v5694_v46  ;;  %v1221_v11 = vmul.f32 %v5631_v14, %v5729_v0 }
 0x147   : > { %1247 = vrot.lane.b32.xlu0 %v1222_v51, %s8405_s0  ;;  %v1442_v19 = vmul.f32 %v5635_v16, %v5694_v46  ;;  %v1295_v21 = vmul.f32 %v5638_v17, %v5729_v0  ;;  %v1369_v30 = vmul.f32 %v5650_v22, %v5729_v0  ;;  %v5782_v34 = vperm.slane %v1036_v31, 0 }
 0x148   : > { %8500 = vst [vmem:[#allocation12_spill] sm:$0xff] %v5742_v9  ;;  %v1077_v13 = vmul.f32 %v5612_v1, %v5742_v9  ;;  %v1151_v23 = vmul.f32 %v5608_v62, %v5742_v9  ;;  %v5766_v25 = vpop.permute.xlu0 %1042  ;;  %v5769_v27 = vpop.permute.xlu1 %1510  ;;  %v1443_v37 = vmul.f32 %v5635_v16, %v5729_v0  ;;  %v1225_v47 = vmul.f32 %v5631_v14, %v5742_v9 }
 0x149   : > { %v1514_v32 = vmul.f32 %v5769_v27, %v5606_v61  ;;  %8501 = vst [vmem:[#allocation13_spill] sm:$0xff] %v5782_v34  ;;  %v1075_v38 = vmul.f32 %v5612_v1, %v5782_v34  ;;  %v1517_v39 = vmul.f32 %v5769_v27, %v5729_v0  ;;  %v1223_v42 = vmul.f32 %v5631_v14, %v5782_v34 }
 0x14a   : > { %v1149_v43 = vmul.f32 %v5608_v62, %v5782_v34  ;;  %v1297_v1 = vmul.f32 %v5638_v17, %v5782_v34  ;;  %v1516_v48 = vmul.f32 %v5769_v27, %v5694_v46  ;;  %v1365_v49 = vmul.f32 %v5650_v22, %v5626_v12 }
 0x14b   : > { %v1590_v56 = vmul.f32 %v5646_v20, %v5694_v46  ;;  %v1518_v60 = vmul.f32 %v5769_v27, %v5688_v33  ;;  %vm1183_vm15 = vcmask 1031168   ;;  %vm1553_vm14 = vcmask 482304  }
 0x14c   : > { %vm1627_vm9 = vcmask 474112  }
 0x14e   : > { %1099 = vrot.lane.b32.xlu1 %v1074_v53, %s8401_s4  ;;  %1103 = vrot.lane.b32.xlu2 %v1076_v54, %s8401_s4  ;;  %v1444_v53 = vmul.f32 %v5635_v16, %v5688_v33  ;;  %v1515_v54 = vmul.f32 %v5769_v27, %v5659_v28 }
 0x14f   : > { %1321 = vrot.lane.b32.xlu0 %v1296_v55, %s5274_s28 }
 0x156   : > { %1243 = vrot.lane.b32.xlu1 %v1220_v58, %s8405_s0  ;;  %1177 = vrot.lane.b32.xlu2 %v1150_v59, %s8463_s27  ;;  %v1299_v58 = vmul.f32 %v5638_v17, %v5742_v9  ;;  %v1152_v59 = vmul.f32 %v5608_v62, %v5616_v3  ;;  %v1298_v62 = vmul.f32 %v5638_v17, %v5707_v52 }
 0x157   : > { %1251 = vrot.lane.b32.xlu0 %v1224_v63, %s8405_s0 }
 0x158   : > { %v5750_v15 = vpop.permute.xlu2 %1239 }
 0x15e   : > { %1317 = vrot.lane.b32.xlu1 %v1294_v5, %s5274_s28  ;;  %1097 = vrot.lane.b32.xlu2 %v1073_v6, %s8401_s4  ;;  %v1589_v6 = vmul.f32 %v5646_v20, %v5659_v28 }
 0x15f   : > { %1171 = vrot.lane.b32.xlu0 %v1147_v7, %s8463_s27  ;;  %v5784_v35 = vpop.permute.xlu0 %1165  ;;  %v1373_v7 = vmul.f32 %v5650_v22, %v5742_v9 }
 0x160   : > { %v5764_v24 = vpop.permute.xlu2 %1313 }
 0x162   : > { %v5810_v44 = vpop.permute.xlu1 %1091 }
 0x166   : > { %1391 = vrot.lane.b32.xlu1 %v1368_v10, %s8403_s7  ;;  %1245 = vrot.lane.b32.xlu2 %v1221_v11, %s8405_s0 }
 0x167   : > { %1105 = vrot.lane.b32.xlu0 %v1077_v13, %s8401_s4  ;;  %v5797_v40 = vpop.permute.xlu0 %1107  ;;  %v1226_v13 = vmul.f32 %v5631_v14, %v5616_v3  ;;  %v1372_v14 = vmul.f32 %v5650_v22, %v5707_v52 }
 0x168   : > { %v5786_v36 = vpop.permute.xlu2 %1387  ;;  %8502 = vst [vmem:[#allocation14_spill] sm:$0xff] %v5797_v40 }
 0x16d   : > { %v5825_v51 = vpop.permute.xlu1 %1089 }
 0x16e   : > { %1465 = vrot.lane.b32.xlu1 %v1442_v19, %s5276_s10  ;;  %1319 = vrot.lane.b32.xlu2 %v1295_v21, %s5274_s28  ;;  %v1592_v19 = vmul.f32 %v5646_v20, %v5688_v33 }
 0x16f   : > { %1179 = vrot.lane.b32.xlu0 %v1151_v23, %s8463_s27 }
 0x170   : > { %v5799_v41 = vpop.permute.xlu2 %1461 }
 0x175   : > { %v5846_v63 = vpop.permute.xlu1 %1163 }
 0x176   : > { %1395 = vrot.lane.b32.xlu1 %v1370_v29, %s8403_s7  ;;  %1393 = vrot.lane.b32.xlu2 %v1369_v30, %s8403_s7  ;;  %v1591_v29 = vmul.f32 %v5646_v20, %v5729_v0  ;;  %v1446_v30 = vmul.f32 %v5635_v16, %v5707_v52 }
 0x177   : > { %1535 = vrot.lane.b32.xlu0 %v1514_v32, %s5277_s5 }
 0x178   : > { %v5820_v50 = vpop.permute.xlu2 %1311 }
 0x17d   : > { %v5864_v8 = vpop.permute.xlu1 %1237 }
 0x17e   : > { %1467 = vrot.lane.b32.xlu2 %v1443_v37, %s5276_s10  ;;  %1101 = vrot.lane.b32.xlu1 %v1075_v38, %s8401_s4  ;;  %v1300_v38 = vmul.f32 %v5638_v17, %v5616_v3  ;;  %v1445_v17 = vmul.f32 %v5635_v16, %v5782_v34  ;;  %s8589_s4 = smov 69  }
 0x17f   : > { %1541 = vrot.lane.b32.xlu0 %v1517_v39, %s5277_s5  ;;  %v1371_v39 = vmul.f32 %v5650_v22, %v5782_v34 }
 0x180   : > { %v5838_v57 = vpop.permute.xlu2 %1093 }
 0x186   : > { %1249 = vrot.lane.b32.xlu2 %v1223_v42, %s8405_s0  ;;  %1175 = vrot.lane.b32.xlu1 %v1149_v43, %s8463_s27  ;;  %v1374_v42 = vmul.f32 %v5650_v22, %v5616_v3  ;;  %v1521_v22 = vmul.f32 %v5769_v27, %v5742_v9 }
 0x187   : > { %1323 = vrot.lane.b32.xlu0 %v1297_v1, %s5274_s28 }
 0x189   : > { %v5812_v45 = vpop.permute.xlu0 %1241  ;;  %v5879_v21 = vpop.permute.xlu1 %1167 }
 0x18e   : > { %1253 = vrot.lane.b32.xlu1 %v1225_v47, %s8405_s0  ;;  %1539 = vrot.lane.b32.xlu2 %v1516_v48, %s5277_s5  ;;  %v1439_v48 = vmul.f32 %v5635_v16, %v5626_v12 }
 0x18f   : > { %1385 = vrot.lane.b32.xlu0 %v1365_v49, %s8403_s7 }
 0x191   : > { %v5831_v55 = vpop.permute.xlu0 %1315 }
 0x196   : > { %1469 = vrot.lane.b32.xlu2 %v1444_v53, %s5276_s10  ;;  %1537 = vrot.lane.b32.xlu1 %v1515_v54, %s5277_s5 }
 0x197   : > { %1613 = vrot.lane.b32.xlu0 %v1590_v56, %s5278_s3 }
 0x199   : > { %v5850_v4 = vpop.permute.xlu0 %1389 }
 0x19e   : > { %1327 = vrot.lane.b32.xlu2 %v1299_v58, %s5274_s28  ;;  %1181 = vrot.lane.b32.xlu1 %v1152_v59, %s8463_s27  ;;  %v1513_v58 = vmul.f32 %v5769_v27, %v5626_v12  ;;  %v1593_v59 = vmul.f32 %v5646_v20, %v5782_v34 }
 0x19f   : > { %1543 = vrot.lane.b32.xlu0 %v1518_v60, %s5277_s5 }
 0x1a0   : > { %v5853_v5 = vpop.permute.xlu2 %1169 }
 0x1a1   : > { %v5868_v11 = vpop.permute.xlu0 %1463 }
 0x1a2   : > { %8503 = vst [vmem:[#allocation15_spill] sm:$0xff] %v5868_v11 }
 0x1a6   : > { %1611 = vrot.lane.b32.xlu2 %v1589_v6, %s5278_s3  ;;  %1325 = vrot.lane.b32.xlu1 %v1298_v62, %s5274_s28  ;;  %v1447_v62 = vmul.f32 %v5635_v16, %v5742_v9 }
 0x1a7   : > { %1401 = vrot.lane.b32.xlu0 %v1373_v7, %s8403_s7  ;;  %v1520_v7 = vmul.f32 %v5769_v27, %v5707_v52 }
 0x1a8   : > { %v5866_v10 = vpop.permute.xlu2 %1103 }
 0x1ae   : > { %1255 = vrot.lane.b32.xlu2 %v1226_v13, %s8405_s0  ;;  %1609 = vrot.lane.b32.xlu1 %v1588_v18, %s5278_s3  ;;  %s8507_s0 = sld [smem:[#allocation48_spill]]  ;;  %v1522_v13 = vmul.f32 %v5769_v27, %v5616_v3 }
 0x1af   : > { %1617 = vrot.lane.b32.xlu0 %v1592_v19, %s5278_s3 }
 0x1b0   : > { %v5881_v23 = vpop.permute.xlu2 %1177 }
 0x1b1   : > { %v5883_v26 = vpop.permute.xlu0 %1173 }
 0x1b4   : > { %v1657_v54 = vld [vmem:[%s8507_s0] sm:$0xf]  ;;  %s8573_s0 = smov 94  }
 0x1b6   : > { %1399 = vrot.lane.b32.xlu2 %v1372_v14, %s8403_s7  ;;  %1615 = vrot.lane.b32.xlu1 %v1591_v29, %s5278_s3  ;;  %v1519_v29 = vmul.f32 %v5769_v27, %v5782_v34 }
 0x1b7   : > { %1473 = vrot.lane.b32.xlu0 %v1446_v30, %s5276_s10  ;;  %v1448_v30 = vmul.f32 %v5635_v16, %v5616_v3 }
 0x1b8   : > { %v5894_v31 = vpop.permute.xlu2 %1097  ;;  %v5896_v32 = vpop.permute.xlu1 %1095 }
 0x1b9   : > { %8504 = vst [vmem:[#allocation16_spill] sm:$0xff] %v5894_v31  ;;  %v5898_v37 = vpop.permute.xlu0 %1247 }
 0x1be   : > { %1329 = vrot.lane.b32.xlu2 %v1300_v38, %s5274_s28  ;;  %1397 = vrot.lane.b32.xlu1 %v1371_v39, %s8403_s7 }
 0x1bf   : > { %1403 = vrot.lane.b32.xlu0 %v1374_v42, %s8403_s7  ;;  %s8572_s7 = sld [smem:[#allocation49_spill]] }
 0x1c0   : > { %v5909_v43 = vpop.permute.xlu1 %1099  ;;  %v5913_v47 = vpop.permute.xlu2 %1245 }
 0x1c1   : > { %v5911_v1 = vpop.permute.xlu0 %1321  ;;  %8505 = vst [vmem:[#allocation17_spill] sm:$0xff] %v5913_v47 }
 0x1c6   : > { %1471 = vrot.lane.b32.xlu2 %v1445_v17, %s5276_s10  ;;  %1459 = vrot.lane.b32.xlu1 %v1439_v48, %s5276_s10  ;;  %v1587_v17 = vmul.f32 %v5646_v20, %v5626_v12  ;;  %v1595_v48 = vmul.f32 %v5646_v20, %v5742_v9 }
 0x1c7   : > { %1549 = vrot.lane.b32.xlu0 %v1521_v22, %s5277_s5 }
 0x1c8   : > { %v5924_v49 = vpop.permute.xlu1 %1243  ;;  %v5931_v56 = vpop.permute.xlu2 %1319 }
 0x1c9   : > { %v5926_v53 = vpop.permute.xlu0 %1251  ;;  %8508 = vst [vmem:[#allocation19_spill] sm:$0xff] %v5931_v56 }
 0x1ca   : > { %8506 = vst [vmem:[#allocation18_spill] sm:$0xff] %v5926_v53 }
 0x1ce   : > { %1660 = vperm.xlu1 %4656, %v1657_v54   ;;  %1533 = vrot.lane.b32.xlu2 %v1513_v58, %s5277_s5  ;;  %v1594_v54 = vmul.f32 %v5646_v20, %v5707_v52 }
 0x1cf   : > { %1619 = vrot.lane.b32.xlu0 %v1593_v59, %s5278_s3 }
 0x1d0   : > { %v5939_v60 = vpop.permute.xlu1 %1317  ;;  %v5949_v18 = vpop.permute.xlu2 %1393 }
 0x1d1   : > { %v5941_v6 = vpop.permute.xlu0 %1171  ;;  %8510 = vst [vmem:[#allocation21_spill] sm:$0xff] %v5949_v18 }
 0x1d2   : > { %8509 = vst [vmem:[#allocation20_spill] sm:$0xff] %v5941_v6 }
 0x1d6   : > { %1475 = vrot.lane.b32.xlu1 %v1447_v62, %s5276_s10  ;;  %1547 = vrot.lane.b32.xlu2 %v1520_v7, %s5277_s5  ;;  %v1596_v7 = vmul.f32 %v5646_v20, %v5616_v3 }
 0x1d7   : > { %1551 = vrot.lane.b32.xlu0 %v1522_v13, %s5277_s5 }
 0x1d8   : > { %v5954_v19 = vpop.permute.xlu1 %1391  ;;  %v5964_v38 = vpop.permute.xlu2 %1467 }
 0x1d9   : > { %v5956_v14 = vpop.permute.xlu0 %1105  ;;  %8511 = vst [vmem:[#allocation22_spill] sm:$0xff] %v5964_v38 }
 0x1de   : > { %1545 = vrot.lane.b32.xlu1 %v1519_v29, %s5277_s5  ;;  %1477 = vrot.lane.b32.xlu2 %v1448_v30, %s5276_s10 }
 0x1e0   : > { %v5966_v39 = vpop.permute.xlu1 %1465  ;;  %v5980_v22 = vpop.permute.xlu2 %1249 }
 0x1e1   : > { %v5968_v42 = vpop.permute.xlu0 %1179 }
 0x1e6   : > { %1607 = vrot.lane.b32.xlu1 %v1587_v17, %s5278_s3  ;;  %1623 = vrot.lane.b32.xlu2 %v1595_v48, %s5278_s3 }
 0x1e8   : > { %v5976_v16 = vpop.permute.xlu1 %1395  ;;  %v5989_v62 = vpop.permute.xlu2 %1539 }
 0x1e9   : > { %v5978_v27 = vpop.permute.xlu0 %1535 }
 0x1ea   : > { %8512 = vst [vmem:[#allocation23_spill] sm:$0xff] %v5978_v27 }
 0x1ee   : > { %1621 = vrot.lane.b32.xlu1 %v1594_v54, %s5278_s3 }
 0x1f0   : > { %v5985_v58 = vpop.permute.xlu1 %1101  ;;  %v5998_v30 = vpop.permute.xlu2 %1469 }
 0x1f1   : > { %v5987_v59 = vpop.permute.xlu0 %1541  ;;  %8515 = vst [vmem:[#allocation26_spill] sm:$0xff] %v5998_v30 }
 0x1f2   : > { %8513 = vst [vmem:[#allocation24_spill] sm:$0xff] %v5987_v59 }
 0x1f6   : > { %1625 = vrot.lane.b32.xlu1 %v1596_v7, %s5278_s3 }
 0x1f8   : > { %v5994_v13 = vpop.permute.xlu1 %1175  ;;  %v6004_v54 = vpop.permute.xlu2 %1327 }
 0x1f9   : > { %v5996_v29 = vpop.permute.xlu0 %1323  ;;  %8517 = vst [vmem:[#allocation28_spill] sm:$0xff] %v6004_v54 }
 0x1fa   : > { %8514 = vst [vmem:[#allocation25_spill] sm:$0xff] %v5996_v29 }
 0x200   : > { %v6000_v17 = vpop.permute.xlu1 %1253  ;;  %v6012_v20 = vpop.permute.xlu2 %1611 }
 0x201   : > { %8516 = vst [vmem:[#allocation27_spill] sm:$0xff] %v6000_v17  ;;  %v6002_v48 = vpop.permute.xlu0 %1385 }
 0x202   : > { %8520 = vst [vmem:[#allocation31_spill] sm:$0xff] %v6012_v20 }
 0x208   : > { %v6006_v2 = vpop.permute.xlu1 %1537  ;;  %v6018_v27 = vpop.permute.xlu2 %1255 }
 0x209   : > { %8518 = vst [vmem:[#allocation29_spill] sm:$0xff] %v6006_v2  ;;  %v6008_v34 = vpop.permute.xlu0 %1613  ;;  %v1113_v2 = vsel %vm1109_vm6, %v5896_v32, %v5894_v31 }
 0x20a   : > { %8523 = vst [vmem:[#allocation34_spill] sm:$0xff] %v6018_v27  ;;  %v1187_v27 = vsel %vm1183_vm15, %v5853_v5, %v5941_v6 }
 0x210   : > { %v6010_v0 = vpop.permute.xlu1 %1181  ;;  %v6024_v53 = vpop.permute.xlu2 %1399 }
 0x211   : > { %8519 = vst [vmem:[#allocation30_spill] sm:$0xff] %v6010_v0  ;;  %v6014_v7 = vpop.permute.xlu0 %1543 }
 0x212   : > { %8521 = vst [vmem:[#allocation32_spill] sm:$0xff] %v6014_v7 }
 0x213   : > { %8526 = vst [vmem:[#allocation37_spill] sm:$0xff] %v6024_v53  ;;  %v1261_v53 = vsel %vm1257_vm3, %v5924_v49, %v5913_v47 }
 0x218   : > { %v6016_v61 = vpop.permute.xlu1 %1325  ;;  %v6041_v31 = vpop.permute.xlu2 %1329 }
 0x219   : > { %8522 = vst [vmem:[#allocation33_spill] sm:$0xff] %v6016_v61  ;;  %v6020_v11 = vpop.permute.xlu0 %1401  ;;  %v1058_v61 = vmul.f32 %v5694_v46, %v5766_v25  ;;  %v1335_v46 = vsel %vm1331_vm0, %v5939_v60, %v5931_v56 }
 0x21a   : > { %8524 = vst [vmem:[#allocation35_spill] sm:$0xff] %v6020_v11 }
 0x21b   : > { %v1132_v11 = vadd.f32 %v1113_v2, %v1058_v61  ;;  %v1409_v2 = vsel %vm8467_vm10, %v5954_v19, %v5949_v18 }
 0x220   : > { %v6022_v9 = vpop.permute.xlu1 %1609  ;;  %v6059_v47 = vpop.permute.xlu2 %1471 }
 0x221   : > { %8525 = vst [vmem:[#allocation36_spill] sm:$0xff] %v6022_v9  ;;  %v6029_v54 = vpop.permute.xlu0 %1617  ;;  %v1206_v9 = vadd.f32 %v1187_v27, %v1132_v11  ;;  %v1483_v11 = vsel %vm1479_vm11, %v5966_v39, %v5964_v38  ;;  %v1557_v27 = vsel %vm1553_vm14, %v5989_v62, %v5987_v59  ;;  %v1115_v38 = vsel %vm1109_vm6, %v5909_v43, %v5985_v58 }
 0x222   : > { %8527 = vst [vmem:[#allocation38_spill] sm:$0xff] %v6029_v54 }
 0x223   : > { %v1280_v17 = vadd.f32 %v1261_v53, %v1206_v9  ;;  %8531 = vst [vmem:[#allocation42_spill] sm:$0xff] %v6059_v47 }
 0x225   : > { %v1354_v61 = vadd.f32 %v1335_v46, %v1280_v17 }
 0x227   : > { %v1428_v53 = vadd.f32 %v1409_v2, %v1354_v61  ;;  %v1060_v61 = vmul.f32 %v5688_v33, %v5766_v25  ;;  %v1189_v2 = vsel %vm1183_vm15, %v5883_v26, %v5994_v13  ;;  %v1263_v33 = vsel %vm1257_vm3, %v5898_v37, %v5980_v22 }
 0x228   : > { %v6031_v20 = vpop.permute.xlu1 %1615 }
 0x229   : > { %8528 = vst [vmem:[#allocation39_spill] sm:$0xff] %v6031_v20  ;;  %v6045_v40 = vpop.permute.xlu0 %1473  ;;  %v1502_v56 = vadd.f32 %v1483_v11, %v1428_v53  ;;  %v1631_v17 = vsel %vm1627_vm9, %v6008_v34, %v6031_v20  ;;  %v1134_v53 = vadd.f32 %v1115_v38, %v1060_v61 }
 0x22a   : > { %8530 = vst [vmem:[#allocation41_spill] sm:$0xff] %v6045_v40  ;;  %v1534_v40 = vpop.permute.xlu2 %1533 }
 0x22b   : > { %v1576_v18 = vadd.f32 %v1557_v27, %v1502_v56  ;;  %v1208_v6 = vadd.f32 %v1189_v2, %v1134_v53  ;;  %v1110_v56 = vsel %vm1109_vm6, %v5825_v51, %v5810_v44  ;;  %v1258_v51 = vsel %vm1257_vm3, %v5864_v8, %v5750_v15 }
 0x22c   : > { %v1057_v2 = vmul.f32 %v5659_v28, %v5766_v25  ;;  %v1406_v28 = vsel %vm8467_vm10, %v6002_v48, %v5786_v36 }
 0x22d   : > { %v1650_v11 = vadd.f32 %v1631_v17, %v1576_v18  ;;  %v1055_v18 = vmul.f32 %v5626_v12, %v5766_v25  ;;  %v1282_v38 = vadd.f32 %v1263_v33, %v1208_v6  ;;  %v1337_v12 = vsel %vm1331_vm0, %v5911_v1, %v5996_v29 }
 0x22f   : > { %v1129_v17 = vadd.f32 %v1110_v56, %v1055_v18  ;;  %v1186_v18 = vsel %vm1183_vm15, %v5879_v21, %v5853_v5  ;;  %v1334_v5 = vsel %vm1331_vm0, %v5831_v55, %v5939_v60  ;;  %v1408_v60 = vsel %vm8467_vm10, %v5850_v4, %v5954_v19  ;;  %v8536_v19 = vld [vmem:[#allocation27_spill] sm:$0xff] }
 0x230   : > { %v6043_v0 = vpop.permute.xlu1 %1397 }
 0x231   : > { %8529 = vst [vmem:[#allocation40_spill] sm:$0xff] %v6043_v0  ;;  %v6064_v46 = vpop.permute.xlu0 %1403  ;;  %v1411_v6 = vsel %vm8467_vm10, %v5976_v16, %v6043_v0 }
 0x232   : > { %8532 = vst [vmem:[#allocation43_spill] sm:$0xff] %v6064_v46  ;;  %v6110_v33 = vpop.permute.xlu2 %1547 }
 0x238   : > { %v1460_v9 = vpop.permute.xlu1 %1459 }
 0x239   : > { %v6086_v27 = vpop.permute.xlu0 %1549  ;;  %v1480_v48 = vsel %vm1479_vm11, %v1460_v9, %v5799_v41 }
 0x240   : > { %v6074_v59 = vpop.permute.xlu1 %1660 }
 0x241   : > { %v1666_v20 = vadd.f32 %v6074_v59, %v1650_v11  ;;  %v1356_v11 = vadd.f32 %v1337_v12, %v1282_v38  ;;  %v1485_v38 = vsel %vm1479_vm11, %v5998_v30, %v6059_v47 }
 0x243   : > { %v1676_v46 = vmax.f32 %v1666_v20, 0.0  ;;  %v1184_v20 = vsel %vm1183_vm15, %v5846_v63, %v5784_v35  ;;  %v1430_v8 = vadd.f32 %v1411_v6, %v1356_v11 }
 0x244   : > { %v1203_v63 = vadd.f32 %v1184_v20, %v1129_v17  ;;  %v1260_v20 = vsel %vm1257_vm3, %v5812_v45, %v5924_v49  ;;  %v1117_v49 = vsel %vm1109_vm6, %v5866_v10, %v5956_v14 }
 0x245   : > { %1699 = vrot.lane.b32.xlu1 %v1676_v46, %s5258_s15  ;;  %v1112_v46 = vsel %vm1109_vm6, %v5838_v57, %v5896_v32  ;;  %v1332_v32 = vsel %vm1331_vm0, %v5820_v50, %v5764_v24 }
 0x246   : > { %v1277_v53 = vadd.f32 %v1258_v51, %v1203_v63  ;;  %v1131_v56 = vadd.f32 %v1112_v46, %v1057_v2  ;;  %v6124_v51 = vpop.permute.xlu0 %1619  ;;  %v1504_v46 = vadd.f32 %v1485_v38, %v1430_v8  ;;  %v1062_v2 = vmul.f32 %v5707_v52, %v5766_v25 }
 0x247   : > { %8533 = vst [vmem:[#allocation44_spill] sm:$0xff] %v6124_v51  ;;  %v1633_v9 = vsel %vm1627_vm9, %v6029_v54, %v6124_v51  ;;  %v1064_v52 = vmul.f32 %v5616_v3, %v5766_v25  ;;  %v8540_v3 = vld [vmem:[#allocation30_spill] sm:$0xff] }
 0x248   : > { %v6091_v61 = vpop.permute.xlu1 %1475  ;;  %v1205_v17 = vadd.f32 %v1186_v18, %v1131_v56  ;;  %v1351_v50 = vadd.f32 %v1332_v32, %v1277_v53  ;;  %v1191_v56 = vsel %vm1183_vm15, %v5881_v23, %v5968_v42  ;;  %v1136_v32 = vadd.f32 %v1117_v49, %v1062_v2  ;;  %v8539_v49 = vld [vmem:[#allocation15_spill] sm:$0xff]  ;;  %v8542_v2 = vld [vmem:[#allocation33_spill] sm:$0xff] }
 0x24a   : > { %v1279_v63 = vadd.f32 %v1260_v20, %v1205_v17  ;;  %v1425_v11 = vadd.f32 %v1406_v28, %v1351_v50  ;;  %v8535_v28 = vld [vmem:[#allocation14_spill] sm:$0xff]  ;;  %v1210_v51 = vadd.f32 %v1191_v56, %v1136_v32  ;;  %v1478_v56 = vpop.permute.xlu2 %1477 }
 0x24b   : > { %v1118_v38 = vsel %vm1109_vm6, %v5956_v14, %v8535_v28  ;;  %v8537_v17 = vld [vmem:[#allocation18_spill] sm:$0xff]  ;;  %v8541_v14 = vld [vmem:[#allocation28_spill] sm:$0xff]  ;;  %v1138_v47 = vadd.f32 %v8535_v28, %v1064_v52 }
 0x24c   : > { %v1353_v8 = vadd.f32 %v1334_v5, %v1279_v63  ;;  %v1499_v18 = vadd.f32 %v1480_v48, %v1425_v11  ;;  %v1265_v50 = vsel %vm1257_vm3, %v8537_v17, %v8536_v19  ;;  %v1482_v48 = vsel %vm1479_vm11, %v8539_v49, %v5966_v39  ;;  %v8544_v39 = vld [vmem:[#allocation29_spill] sm:$0xff]  ;;  %v8548_v52 = vld [vmem:[#allocation10_spill] sm:$0xff] }
 0x24d   : > { %v1192_v63 = vsel %vm1183_vm15, %v5968_v42, %v8540_v3  ;;  %v1339_v11 = vsel %vm1331_vm0, %v8542_v2, %v8541_v14  ;;  %v1556_v54 = vsel %vm1553_vm14, %v8544_v39, %v5989_v62  ;;  %v8545_v42 = vld [vmem:[#allocation36_spill] sm:$0xff]  ;;  %v1056_v28 = vmul.f32 %v8548_v52, %v5766_v25 }
 0x24e   : > { %v1111_v62 = vsel %vm1109_vm6, %v5810_v44, %v5838_v57  ;;  %v1185_v44 = vsel %vm1183_vm15, %v5784_v35, %v5879_v21  ;;  %v1488_v21 = vsel %vm1479_vm11, %v6091_v61, %v1478_v56 }
 0x250   : > { %v6126_v12 = vpop.permute.xlu1 %1545 }
 0x251   : > { %8534 = vst [vmem:[#allocation45_spill] sm:$0xff] %v6126_v12  ;;  %v1559_v6 = vsel %vm1553_vm14, %v6014_v7, %v6126_v12 }
 0x252   : > { %v1578_v53 = vadd.f32 %v1559_v6, %v1504_v46  ;;  %v1427_v46 = vadd.f32 %v1408_v60, %v1353_v8  ;;  %v8538_v6 = vld [vmem:[#allocation12_spill] sm:$0xff]  ;;  %v1284_v8 = vadd.f32 %v1265_v50, %v1210_v51  ;;  %v8546_v51 = vld [vmem:[#allocation35_spill] sm:$0xff] }
 0x253   : > { %v1063_v12 = vmul.f32 %v8538_v6, %v5766_v25 }
 0x254   : > { %v1652_v20 = vadd.f32 %v1633_v9, %v1578_v53  ;;  %v8543_v53 = vld [vmem:[#allocation23_spill] sm:$0xff]  ;;  %v1501_v7 = vadd.f32 %v1482_v48, %v1427_v46  ;;  %v1358_v2 = vadd.f32 %v1339_v11, %v1284_v8  ;;  %v8549_v46 = vld [vmem:[#allocation34_spill] sm:$0xff]  ;;  %v1340_v48 = vsel %vm1331_vm0, %v8541_v14, %v6041_v31 }
 0x255   : > { %v1554_v60 = vsel %vm1553_vm14, %v1534_v40, %v8543_v53  ;;  %v1137_v9 = vadd.f32 %v1118_v38, %v1063_v12  ;;  %v1212_v40 = vadd.f32 %v8540_v3, %v1138_v47  ;;  %v8547_v12 = vld [vmem:[#allocation37_spill] sm:$0xff]  ;;  %v8550_v47 = vld [vmem:[#allocation31_spill] sm:$0xff] }
 0x256   : > { %v1668_v5 = vadd.f32 %v6074_v59, %v1652_v20  ;;  %v1573_v32 = vadd.f32 %v1554_v60, %v1499_v18  ;;  %v1413_v18 = vsel %vm8467_vm10, %v8547_v12, %v8546_v51  ;;  %v1575_v38 = vadd.f32 %v1556_v54, %v1501_v7  ;;  %v8551_v3 = vld [vmem:[#allocation41_spill] sm:$0xff]  ;;  %v8552_v11 = vld [vmem:[#allocation43_spill] sm:$0xff] }
 0x257   : > { %v1211_v29 = vadd.f32 %v1192_v63, %v1137_v9  ;;  %v1487_v63 = vsel %vm1479_vm11, %v8551_v3, %v6091_v61  ;;  %v1130_v7 = vadd.f32 %v1111_v62, %v1056_v28  ;;  %v1259_v28 = vsel %vm1257_vm3, %v5750_v15, %v5812_v45 }
 0x258   : > { %v1608_v20 = vpop.permute.xlu1 %1607  ;;  %v1678_v6 = vmax.f32 %v1668_v5, 0.0  ;;  %v1630_v5 = vsel %vm1627_vm9, %v8550_v47, %v6008_v34  ;;  %v1414_v34 = vsel %vm8467_vm10, %v8546_v51, %v8552_v11  ;;  %v1624_v51 = vpop.permute.xlu2 %1623  ;;  %v1561_v61 = vsel %vm1553_vm14, %v6110_v33, %v6086_v27 }
 0x259   : > { %v1628_v0 = vsel %vm1627_vm9, %v1608_v20, %v8545_v42  ;;  %v1649_v60 = vadd.f32 %v1630_v5, %v1575_v38  ;;  %v8554_v20 = vld [vmem:[#allocation16_spill] sm:$0xff] }
 0x25a   : > { %v1647_v30 = vadd.f32 %v1628_v0, %v1573_v32  ;;  %1703 = vrot.lane.b32.xlu1 %v1678_v6, %s5258_s15  ;;  %v1266_v0 = vsel %vm1257_vm3, %v8536_v19, %v8549_v46  ;;  %v1286_v19 = vadd.f32 %v8549_v46, %v1212_v40  ;;  %v1204_v32 = vadd.f32 %v1185_v44, %v1130_v7  ;;  %v8555_v38 = vld [vmem:[#allocation20_spill] sm:$0xff] }
 0x25b   : > { %v1285_v57 = vadd.f32 %v1266_v0, %v1211_v29  ;;  %v8553_v29 = vld [vmem:[#allocation11_spill] sm:$0xff]  ;;  %v1114_v6 = vsel %vm1109_vm6, %v8554_v20, %v5909_v43  ;;  %v1665_v52 = vadd.f32 %v6074_v59, %v1649_v60  ;;  %v1333_v43 = vsel %vm1331_vm0, %v5764_v24, %v5831_v55 }
 0x25c   : > { %v1663_v50 = vadd.f32 %v6074_v59, %v1647_v30  ;;  %v1432_v30 = vadd.f32 %v1413_v18, %v1358_v2  ;;  %v1360_v35 = vadd.f32 %v6041_v31, %v1286_v19  ;;  %v1059_v2 = vmul.f32 %v8553_v29, %v5766_v25  ;;  %v1552_v18 = vpop.permute.xlu0 %1551  ;;  %v8557_v19 = vld [vmem:[#allocation17_spill] sm:$0xff]  ;;  %v8558_v29 = vld [vmem:[#allocation19_spill] sm:$0xff] }
 0x25d   : > { %v1359_v14 = vadd.f32 %v1340_v48, %v1285_v57  ;;  %v1278_v15 = vadd.f32 %v1259_v28, %v1204_v32  ;;  %v1562_v48 = vsel %vm1553_vm14, %v6086_v27, %v1552_v18  ;;  %v1675_v57 = vmax.f32 %v1665_v52, 0.0  ;;  %v8562_v28 = vld [vmem:[#allocation33_spill] sm:$0xff] }
 0x25e   : > { %v1673_v54 = vmax.f32 %v1663_v50, 0.0  ;;  %v1506_v9 = vadd.f32 %v1487_v63, %v1432_v30  ;;  %v1434_v31 = vadd.f32 %v8552_v11, %v1360_v35  ;;  %v1188_v50 = vsel %vm1183_vm15, %v8555_v38, %v5883_v26  ;;  %v8565_v38 = vld [vmem:[#allocation24_spill] sm:$0xff] }
 0x25f   : > { %v1433_v40 = vadd.f32 %v1414_v34, %v1359_v14  ;;  %v1133_v45 = vadd.f32 %v1114_v6, %v1059_v2  ;;  %v1407_v63 = vsel %vm8467_vm10, %v5786_v36, %v5850_v4  ;;  %v1352_v30 = vadd.f32 %v1333_v43, %v1278_v15  ;;  %v8564_v43 = vld [vmem:[#allocation32_spill] sm:$0xff]  ;;  %v8567_v15 = vld [vmem:[#allocation38_spill] sm:$0xff] }
 0x260   : > { %1693 = vrot.lane.b32.xlu0 %v1673_v54, %s5258_s15  ;;  %v6209_v8 = vpop.permute.xlu1 %1621  ;;  %v1580_v0 = vadd.f32 %v1561_v61, %v1506_v9  ;;  %v1508_v5 = vadd.f32 %v1478_v56, %v1434_v31  ;;  %v1481_v26 = vsel %vm1479_vm11, %v5799_v41, %v8539_v49  ;;  %v8556_v54 = vld [vmem:[#allocation13_spill] sm:$0xff]  ;;  %v1116_v27 = vsel %vm1109_vm6, %v5985_v58, %v5866_v10 }
 0x261   : > { %v1635_v62 = vsel %vm1627_vm9, %v6209_v8, %v1624_v51  ;;  %v1507_v46 = vadd.f32 %v1488_v21, %v1433_v40  ;;  %v1207_v24 = vadd.f32 %v1188_v50, %v1133_v45  ;;  %v1061_v7 = vmul.f32 %v8556_v54, %v5766_v25  ;;  %v8568_v45 = vld [vmem:[#allocation39_spill] sm:$0xff] }
 0x262   : > { %v1654_v44 = vadd.f32 %v1635_v62, %v1580_v0  ;;  %v1582_v55 = vadd.f32 %v1552_v18, %v1508_v5  ;;  %v1426_v4 = vadd.f32 %v1407_v63, %v1352_v30  ;;  %v1262_v11 = vsel %vm1257_vm3, %v8557_v19, %v5898_v37  ;;  %v8561_v18 = vld [vmem:[#allocation22_spill] sm:$0xff] }
 0x263   : > { %v1581_v56 = vadd.f32 %v1562_v48, %v1507_v46  ;;  %v1190_v25 = vsel %vm1183_vm15, %v5994_v13, %v5881_v23  ;;  %v1555_v41 = vsel %vm1553_vm14, %v8543_v53, %v8544_v39  ;;  %v1281_v14 = vadd.f32 %v1262_v11, %v1207_v24  ;;  %v8559_v39 = vld [vmem:[#allocation21_spill] sm:$0xff]  ;;  %v8569_v30 = vld [vmem:[#allocation42_spill] sm:$0xff] }
 0x264   : > { %v1670_v58 = vadd.f32 %v6074_v59, %v1654_v44  ;;  %v1500_v49 = vadd.f32 %v1481_v26, %v1426_v4  ;;  %v1135_v9 = vadd.f32 %v1116_v27, %v1061_v7  ;;  %v1629_v37 = vsel %vm1627_vm9, %v8545_v42, %v8550_v47  ;;  %v8560_v47 = vld [vmem:[#allocation26_spill] sm:$0xff]  ;;  %v8571_v7 = vld [vmem:[#allocation44_spill] sm:$0xff] }
 0x265   : > { %v1336_v53 = vsel %vm1331_vm0, %v8558_v29, %v5911_v1  ;;  %v1410_v2 = vsel %vm8467_vm10, %v8559_v39, %v5976_v16  ;;  %v1264_v42 = vsel %vm1257_vm3, %v5980_v22, %v8537_v17  ;;  %v1484_v52 = vsel %vm1479_vm11, %v8561_v18, %v8560_v47  ;;  %v8563_v1 = vld [vmem:[#allocation25_spill] sm:$0xff]  ;;  %v8566_v17 = vld [vmem:[#allocation40_spill] sm:$0xff]  ;;  %v1734_v18 = vld [vmem:[%s8572_s7 + $0x8] sm:$0x3] }
 0x266   : > { %v1209_v21 = vadd.f32 %v1190_v25, %v1135_v9  ;;  %v1574_v23 = vadd.f32 %v1555_v41, %v1500_v49  ;;  %v1680_v20 = vmax.f32 %v1670_v58, 0.0  ;;  %v1355_v40 = vadd.f32 %v1336_v53, %v1281_v14 }
 0x267   : > { %v1338_v31 = vsel %vm1331_vm0, %v8563_v1, %v8562_v28  ;;  %v1558_v22 = vsel %vm1553_vm14, %v8565_v38, %v8564_v43  ;;  %v1412_v50 = vsel %vm8467_vm10, %v8566_v17, %v8547_v12  ;;  %v1632_v5 = vsel %vm1627_vm9, %v8568_v45, %v8567_v15 }
 0x268   : > { %1697 = vrot.lane.b32.xlu0 %v1675_v57, %s5258_s15  ;;  %v1626_v36 = vpop.permute.xlu1 %1625  ;;  %v1429_v16 = vadd.f32 %v1410_v2, %v1355_v40  ;;  %v1283_v61 = vadd.f32 %v1264_v42, %v1209_v21  ;;  %v1486_v24 = vsel %vm1479_vm11, %v8569_v30, %v8551_v3  ;;  %v1634_v27 = vsel %vm1627_vm9, %v8571_v7, %v6209_v8 }
 0x269   : > { %v1636_v34 = vsel %vm1627_vm9, %v1624_v51, %v1626_v36  ;;  %v1656_v60 = vadd.f32 %v1626_v36, %v1582_v55  ;;  %v1648_v51 = vadd.f32 %v1629_v37, %v1574_v23  ;;  %v8570_v55 = vld [vmem:[#allocation45_spill] sm:$0xff]  ;;  %v1745_v1 = vperm.slane %v1734_v18, 0 }
 0x26a   : > { %v1655_v10 = vadd.f32 %v1636_v34, %v1581_v56  ;;  %v1503_v46 = vadd.f32 %v1484_v52, %v1429_v16  ;;  %v1357_v0 = vadd.f32 %v1338_v31, %v1283_v61  ;;  %v1560_v12 = vsel %vm1553_vm14, %v8570_v55, %v6110_v33  ;;  %v1733_v33 = vld [vmem:[%s8572_s7] sm:$0xff]  ;;  %s8590_s7 = smov 102  }
 0x26b   : > { %v1672_v32 = vadd.f32 %v6074_v59, %v1656_v60  ;;  %v1664_v62 = vadd.f32 %v6074_v59, %v1648_v51  ;;  %v1737_v34 = vperm.slane %v1733_v33, 0  ;;  %v1738_v60 = vperm.slane %v1733_v33, 1 }
 0x26c   : > { %v1671_v35 = vadd.f32 %v6074_v59, %v1655_v10  ;;  %v1577_v48 = vadd.f32 %v1558_v22, %v1503_v46  ;;  %v1431_v63 = vadd.f32 %v1412_v50, %v1357_v0  ;;  %v1740_v14 = vperm.slane %v1733_v33, 3 }
 0x26d   : > { %v1682_v13 = vmax.f32 %v1672_v32, 0.0  ;;  %v1674_v44 = vmax.f32 %v1664_v62, 0.0  ;;  %v1741_v29 = vperm.slane %v1733_v33, 4  ;;  %v1743_v51 = vperm.slane %v1733_v33, 6 }
 0x26e   : > { %v1681_v6 = vmax.f32 %v1671_v35, 0.0  ;;  %v1651_v57 = vadd.f32 %v1632_v5, %v1577_v48  ;;  %v1505_v26 = vadd.f32 %v1486_v24, %v1431_v63  ;;  %v1744_v16 = vperm.slane %v1733_v33, 7 }
 0x26f   : > { %1711 = vrot.lane.b32.xlu2 %v1682_v13, %s5258_s15  ;;  %v1742_v17 = vperm.slane %v1733_v33, 5  ;;  %v1746_v46 = vperm.slane %v1734_v18, 1 }
 0x270   : > { %1707 = vrot.lane.b32.xlu0 %v1680_v20, %s5258_s15  ;;  %1709 = vrot.lane.b32.xlu1 %v1681_v6, %s5258_s15  ;;  %v1667_v54 = vadd.f32 %v6074_v59, %v1651_v57  ;;  %v1579_v56 = vadd.f32 %v1560_v12, %v1505_v26 }
 0x272   : > { %v1653_v36 = vadd.f32 %v1634_v27, %v1579_v56  ;;  %v1677_v4 = vmax.f32 %v1667_v54, 0.0 }
 0x274   : > { %v1669_v19 = vadd.f32 %v6074_v59, %v1653_v36  ;;  %v1739_v59 = vperm.slane %v1733_v33, 2 }
 0x276   : > { %v1679_v11 = vmax.f32 %v1669_v19, 0.0 }
 0x277   : > { %1695 = vrot.lane.b32.xlu2 %v1674_v44, %s5258_s15 }
 0x27f   : > { %1701 = vrot.lane.b32.xlu2 %v1677_v4, %s5258_s15 }
 0x287   : > { %1705 = vrot.lane.b32.xlu2 %v1679_v11, %s5258_s15  ;;  %s8574_s15 = smov 92  }
 0x2b7   : > { %v1700_v9 = vpop.permute.xlu1 %1699 }
 0x2c9   : > { %v1712_v3 = vpop.permute.xlu2 %1711 }
 0x2cc   : > { %v1704_v6 = vpop.permute.xlu1 %1703 }
 0x2d1   : > { %v1696_v25 = vpop.permute.xlu2 %1695 }
 0x2d2   : > { %v1694_v41 = vpop.permute.xlu0 %1693 }
 0x2d3   : > { %v1713_v8 = vsel %vm806_vm12, %v1694_v41, %v1696_v25  ;;  %v1732_v10 = vsel %vm806_vm12, 0.0, %v1694_v41 }
 0x2d4   : > { %v6312_v58 = vmul.f32 %v1737_v34, %v1732_v10  ;;  %v6314_v49 = vmul.f32 %v1738_v60, %v1713_v8 }
 0x2d6   : > { %2053 = vrot.lane.b32.xlu0 %v6312_v58, %s5278_s3  ;;  %2055 = vrot.lane.b32.xlu1 %v6314_v49, %s5278_s3  ;;  %v1777_v30 = vrot.slane %v6312_v58, 4  ;;  %v1778_v12 = vrot.slane %v6314_v49, 4 }
 0x2d9   : > { %v1702_v21 = vpop.permute.xlu2 %1701 }
 0x2da   : > { %v1698_v32 = vpop.permute.xlu0 %1697  ;;  %v1716_v39 = vsel %vm806_vm12, %v1700_v9, %v1702_v21  ;;  %v1717_v50 = vsel %vm806_vm12, %v1702_v21, %v1704_v6 }
 0x2db   : > { %v1714_v37 = vsel %vm806_vm12, %v1696_v25, %v1698_v32  ;;  %v1715_v35 = vsel %vm806_vm12, %v1698_v32, %v1700_v9  ;;  %v6334_v2 = vmul.f32 %v1741_v29, %v1716_v39  ;;  %v6372_v15 = vmul.f32 %v1742_v17, %v1717_v50 }
 0x2dc   : > { %v6322_v23 = vmul.f32 %v1739_v59, %v1714_v37  ;;  %v6324_v13 = vmul.f32 %v1740_v14, %v1715_v35 }
 0x2dd   : > { %v4677_v20 = vpack.i.bf16 %v6314_v49, %v6334_v2  ;;  %v1781_v24 = vrot.slane %v6334_v2, 4  ;;  %v1782_v36 = vrot.slane %v6372_v15, 4 }
 0x2de   : > { %2057 = vrot.lane.b32.xlu0 %v6322_v23, %s5278_s3  ;;  %2059 = vrot.lane.b32.xlu1 %v6324_v13, %s5278_s3  ;;  %v4657_v53 = vpack.i.bf16 %v6324_v13, %v6322_v23  ;;  %v1779_v48 = vrot.slane %v6322_v23, 4  ;;  %v1780_v63 = vrot.slane %v6324_v13, 4 }
 0x2df   : > { %v4732_v26 = vpack.i.bf16 %v1778_v12, %v1781_v24 }
 0x2e0   : > { %4658 = vrot.lane.b32.xlu2 %v4657_v53, %s5276_s10  ;;  %v4737_v44 = vpack.i.bf16 %v1780_v63, %v1779_v48 }
 0x2e1   : > { %v1706_v40 = vpop.permute.xlu2 %1705 }
 0x2e2   : > { %v1718_v42 = vsel %vm806_vm12, %v1704_v6, %v1706_v40  ;;  %v1708_v52 = vpop.permute.xlu0 %1707  ;;  %v1710_v28 = vpop.permute.xlu1 %1709 }
 0x2e3   : > { %v6343_v47 = vmul.f32 %v1743_v51, %v1718_v42  ;;  %v1720_v31 = vsel %vm806_vm12, %v1708_v52, %v1710_v28  ;;  %v1719_v62 = vsel %vm806_vm12, %v1706_v40, %v1708_v52  ;;  %v1721_v0 = vsel %vm806_vm12, %v1710_v28, %v1712_v3 }
 0x2e4   : > { %v6356_v43 = vmul.f32 %v1745_v1, %v1720_v31  ;;  %v6360_v38 = vmul.f32 %v1744_v16, %v1719_v62  ;;  %v1766_v45 = vmul.f32 %v1746_v46, %v1721_v0  ;;  %vm8468_vm12 = vcmask 1043456  }
 0x2e5   : > { %v4687_v61 = vpack.i.bf16 %v6343_v47, %v6312_v58  ;;  %v1783_v57 = vrot.slane %v6343_v47, 4 }
 0x2e6   : > { %2061 = vrot.lane.b32.xlu0 %v6334_v2, %s5278_s3  ;;  %4663 = vrot.lane.b32.xlu1 %v4657_v53, %s5274_s28  ;;  %v4692_v22 = vpack.i.bf16 %v6356_v43, %v6360_v38  ;;  %v4717_v5 = vpack.i.bf16 %v1766_v45, %v6372_v15  ;;  %v1784_v54 = vrot.slane %v6360_v38, 4  ;;  %v1785_v7 = vrot.slane %v6356_v43, 4 }
 0x2e7   : > { %v4757_v55 = vpack.i.bf16 %v1783_v57, %v1777_v30  ;;  %v1786_v19 = vrot.slane %v1766_v45, 4 }
 0x2e8   : > { %4678 = vrot.lane.b32.xlu2 %v4677_v20, %s5274_s28  ;;  %v4777_v27 = vpack.i.bf16 %v1785_v7, %v1784_v54 }
 0x2e9   : > { %v4802_v11 = vpack.i.bf16 %v1786_v19, %v1782_v36 }
 0x2ee   : > { %4673 = vrot.lane.b32.xlu0 %v4657_v53, %s8463_s27  ;;  %4668 = vrot.lane.b32.xlu1 %v4677_v20, %s5276_s10 }
 0x2f0   : > { %2065 = vrot.lane.b32.xlu2 %v6343_v47, %s5278_s3 }
 0x2f6   : > { %4683 = vrot.lane.b32.xlu1 %v4677_v20, %s8463_s27  ;;  %4688 = vrot.lane.b32.xlu0 %v4687_v61, %s5276_s10 }
 0x2f8   : > { %2069 = vrot.lane.b32.xlu2 %v6356_v43, %s5278_s3 }
 0x2fe   : > { %2067 = vrot.lane.b32.xlu0 %v6360_v38, %s5278_s3  ;;  %4693 = vrot.lane.b32.xlu1 %v4692_v22, %s5276_s10 }
 0x300   : > { %4713 = vrot.lane.b32.xlu2 %v4692_v22, %s8463_s27 }
 0x306   : > { %4703 = vrot.lane.b32.xlu0 %v4692_v22, %s5274_s28  ;;  %4698 = vrot.lane.b32.xlu1 %v4687_v61, %s5274_s28 }
 0x308   : > { %2063 = vrot.lane.b32.xlu2 %v6372_v15, %s5278_s3 }
 0x30e   : > { %4708 = vrot.lane.b32.xlu0 %v4687_v61, %s8463_s27  ;;  %4718 = vrot.lane.b32.xlu1 %v4717_v5, %s5276_s10  ;;  %s8575_s10 = smov 127  }
 0x310   : > { %1835 = vrot.lane.b32.xlu2 %v6372_v15, %s8463_s27 }
 0x316   : > { %1911 = vrot.lane.b32.xlu0 %v6372_v15, %s5274_s28  ;;  %4738 = vrot.lane.b32.xlu1 %v4737_v44, %s8573_s0 }
 0x318   : > { %4728 = vrot.lane.b32.xlu2 %v4737_v44, %s8574_s15 }
 0x31e   : > { %4723 = vrot.lane.b32.xlu0 %v4737_v44, %s5277_s5  ;;  %4758 = vrot.lane.b32.xlu1 %v4757_v55, %s5277_s5 }
 0x320   : > { %4733 = vrot.lane.b32.xlu2 %v4732_v26, %s5277_s5 }
 0x326   : > { %4743 = vrot.lane.b32.xlu0 %v4732_v26, %s8574_s15  ;;  %4778 = vrot.lane.b32.xlu1 %v4777_v27, %s8574_s15 }
 0x328   : > { %4748 = vrot.lane.b32.xlu2 %v4737_v44, %s8575_s10 }
 0x32e   : > { %4768 = vrot.lane.b32.xlu0 %v4732_v26, %s8575_s10  ;;  %4783 = vrot.lane.b32.xlu1 %v4757_v55, %s8573_s0 }
 0x330   : > { %4753 = vrot.lane.b32.xlu2 %v4732_v26, %s8573_s0 }
 0x336   : > { %4788 = vrot.lane.b32.xlu0 %v4777_v27, %s8573_s0  ;;  %4793 = vrot.lane.b32.xlu1 %v4757_v55, %s8575_s10 }
 0x338   : > { %4763 = vrot.lane.b32.xlu2 %v4777_v27, %s5277_s5 }
 0x33a   : > { %v6407_v56 = vpop.permute.xlu2 %4658 }
 0x33b   : > { %v4661_v62 = vunpack.i.h.bf16 %v6407_v56  ;;  %v4660_v22 = vunpack.i.l.bf16 %v6407_v56 }
 0x33d   : > { %v1999_v30 = vsel %vm1479_vm11, %v4660_v22, %v4661_v62 }
 0x33e   : > { %4798 = vrot.lane.b32.xlu0 %v4777_v27, %s8575_s10  ;;  %1949 = vrot.lane.b32.xlu1 %v1782_v36, %s8574_s15 }
 0x340   : > { %4773 = vrot.lane.b32.xlu2 %v4757_v55, %s8574_s15 }
 0x342   : > { %v6413_v4 = vpop.permute.xlu2 %4678 }
 0x343   : > { %v4681_v63 = vunpack.i.h.bf16 %v6413_v4  ;;  %v8453_v57 = vunpack.i.l.bf16 %v6413_v4 }
 0x346   : > { %1873 = vrot.lane.b32.xlu0 %v1782_v36, %s8573_s0  ;;  %1797 = vrot.lane.b32.xlu1 %v1782_v36, %s8575_s10 }
 0x348   : > { %v2054_v3 = vpop.permute.xlu0 %2053  ;;  %4803 = vrot.lane.b32.xlu2 %v4802_v11, %s5277_s5  ;;  %v2056_v33 = vpop.permute.xlu1 %2055  ;;  %s8588_s5 = smov 70  }
 0x349   : > { %v2073_v34 = vsel %vm1627_vm9, %v2054_v3, %v2056_v33 }
 0x34a   : > { %v6419_v60 = vpop.permute.xlu2 %2065  ;;  %4495 = vmatpush.msk.msra.mxu0 %vm8468_vm12, %v2073_v34 }
 0x34e   : > { %1919 = vrot.lane.b32.xlu0 %v1766_v45, %s5274_s28  ;;  %1957 = vrot.lane.b32.xlu1 %v1786_v19, %s8574_s15  ;;  %s8578_s28 = sld [smem:[#allocation50_spill]] }
 0x350   : > { %v2058_v25 = vpop.permute.xlu0 %2057  ;;  %2071 = vrot.lane.b32.xlu2 %v1766_v45, %s5278_s3  ;;  %v2060_v41 = vpop.permute.xlu1 %2059  ;;  %s8465_s3 = smov 102  }
 0x351   : > { %v2074_v8 = vsel %vm1627_vm9, %v2056_v33, %v2058_v25  ;;  %v2075_v10 = vsel %vm1627_vm9, %v2058_v25, %v2060_v41 }
 0x352   : > { %v6427_v59 = vpop.permute.xlu2 %2069  ;;  %4497 = vmatpush.msk.msra.mxu1 %vm8468_vm12, %v2074_v8  ;;  %4499 = vmatpush.msk.msra.mxu2 %vm8468_vm12, %v2075_v10 }
 0x356   : > { %1881 = vrot.lane.b32.xlu0 %v1786_v19, %s8573_s0  ;;  %1805 = vrot.lane.b32.xlu1 %v1786_v19, %s8575_s10  ;;  %s8585_s10 = sld [smem:[#allocation51_spill]]  ;;  %s5281_s0 = smov 37  }
 0x358   : > { %v6433_v14 = vpop.permute.xlu0 %2061  ;;  %1843 = vrot.lane.b32.xlu2 %v1766_v45, %s8463_s27  ;;  %v4664_v9 = vpop.permute.xlu1 %4663  ;;  %s5283_s27 = smov 38  }
 0x359   : > { %v2076_v32 = vsel %vm1627_vm9, %v2060_v41, %v6433_v14  ;;  %v4666_v17 = vunpack.i.h.bf16 %v4664_v9  ;;  %v4665_v50 = vunpack.i.l.bf16 %v4664_v9 }
 0x35a   : > { %v6438_v37 = vpop.permute.xlu2 %4713  ;;  %4501 = vmatpush.msk.msra.mxu3 %vm8468_vm12, %v2076_v32 }
 0x35b   : > { %v1923_v12 = vsel %vm1331_vm0, %v4665_v50, %v4666_v17  ;;  %v6493_v26 = vsel %vm1331_vm0, %v4681_v63, %v4665_v50  ;;  %v6503_v56 = vsel %vm1331_vm0, %v4666_v17, %v8453_v57 }
 0x360   : > { %v6441_v35 = vpop.permute.xlu0 %4673  ;;  %v6443_v21 = vpop.permute.xlu1 %4668 }
 0x361   : > { %v4676_v0 = vunpack.i.h.bf16 %v6441_v35  ;;  %v4675_v45 = vunpack.i.l.bf16 %v6441_v35  ;;  %v4671_v5 = vunpack.i.h.bf16 %v6443_v21  ;;  %v8454_v48 = vunpack.i.l.bf16 %v6443_v21 }
 0x362   : > { %v6445_v29 = vpop.permute.xlu2 %2063 }
 0x363   : > { %v1998_v54 = vsel %vm1479_vm11, %v4671_v5, %v4660_v22  ;;  %v2000_v7 = vsel %vm1479_vm11, %v4661_v62, %v8454_v48  ;;  %v1847_v27 = vsel %vm1183_vm15, %v4675_v45, %v4676_v0 }
 0x368   : > { %v6447_v53 = vpop.permute.xlu0 %4688  ;;  %v6449_v39 = vpop.permute.xlu1 %4683 }
 0x369   : > { %v4690_v44 = vunpack.i.l.bf16 %v6447_v53  ;;  %v4686_v36 = vunpack.i.h.bf16 %v6449_v39  ;;  %v8457_v19 = vunpack.i.l.bf16 %v6449_v39 }
 0x36a   : > { %v6451_v20 = vpop.permute.xlu2 %1835 }
 0x36b   : > { %v1997_v34 = vsel %vm1479_vm11, %v4690_v44, %v4671_v5 }
 0x370   : > { %v6453_v6 = vpop.permute.xlu0 %2067  ;;  %v6455_v40 = vpop.permute.xlu1 %4693 }
 0x371   : > { %v8459_v11 = vunpack.i.l.bf16 %v6455_v40 }
 0x372   : > { %v6457_v51 = vpop.permute.xlu2 %4728 }
 0x373   : > { %v8455_v24 = vunpack.i.h.bf16 %v6457_v51  ;;  %v8456_v55 = vunpack.i.l.bf16 %v6457_v51 }
 0x375   : > { %v1961_v22 = vsel %vm8467_vm10, %v8456_v55, %v8455_v24  ;;  %v8460_v24 = vunpack.i.h.bf16 %v6447_v53 }
 0x378   : > { %v6459_v42 = vpop.permute.xlu0 %4703  ;;  %v6461_v18 = vpop.permute.xlu1 %4698 }
 0x37a   : > { %v6463_v52 = vpop.permute.xlu2 %4733 }
 0x37b   : > { %v4736_v25 = vunpack.i.h.bf16 %v6463_v52  ;;  %v8458_v9 = vunpack.i.l.bf16 %v6463_v52 }
 0x380   : > { %v6465_v28 = vpop.permute.xlu0 %4708  ;;  %v6467_v1 = vpop.permute.xlu1 %4718 }
 0x382   : > { %v6469_v31 = vpop.permute.xlu2 %4748 }
 0x383   : > { %v8461_v17 = vunpack.i.h.bf16 %v6469_v31  ;;  %v4750_v50 = vunpack.i.l.bf16 %v6469_v31 }
 0x388   : > { %v6471_v16 = vpop.permute.xlu0 %1911  ;;  %v6473_v61 = vpop.permute.xlu1 %4738 }
 0x389   : > { %v4741_v32 = vunpack.i.h.bf16 %v6473_v61  ;;  %v4740_v35 = vunpack.i.l.bf16 %v6473_v61 }
 0x38a   : > { %v6477_v46 = vpop.permute.xlu2 %4753 }
 0x390   : > { %v4724_v3 = vpop.permute.xlu0 %4723  ;;  %v6508_v33 = vpop.permute.xlu1 %4758 }
 0x391   : > { %v4726_v41 = vunpack.i.h.bf16 %v4724_v3  ;;  %v4725_v8 = vunpack.i.l.bf16 %v4724_v3  ;;  %v4760_v10 = vunpack.i.l.bf16 %v6508_v33 }
 0x392   : > { %v6516_v62 = vpop.permute.xlu2 %4763 }
 0x393   : > { %v2035_v5 = vsel %vm1553_vm14, %v4760_v10, %v4736_v25  ;;  %v2036_v44 = vsel %vm1553_vm14, %v4736_v25, %v4725_v8  ;;  %v2037_v57 = vsel %vm1553_vm14, %v4725_v8, %v4726_v41  ;;  %v2038_v48 = vsel %vm1553_vm14, %v4726_v41, %v8458_v9 }
 0x394   : > { %v2110_v3 = vsel %vm8468_vm12, %v1997_v34, %v2035_v5  ;;  %v2111_v61 = vsel %vm8468_vm12, %v1998_v54, %v2036_v44  ;;  %v2112_v55 = vsel %vm8468_vm12, %v1999_v30, %v2037_v57  ;;  %v2113_v10 = vsel %vm8468_vm12, %v2000_v7, %v2038_v48 }
 0x395   : > { %2159 = vmatpush.msra.mxu0 %v2110_v3  ;;  %2179 = vmatpush.msra.mxu1 %v2111_v61  ;;  %v1846_v34 = vsel %vm1183_vm15, %v4686_v36, %v4675_v45  ;;  %v4700_v54 = vunpack.i.l.bf16 %v6461_v18  ;;  %v8462_v25 = vunpack.i.l.bf16 %v6516_v62  ;;  %v1885_v41 = vsel %vm1257_vm3, %v4740_v35, %v4741_v32 }
 0x396   : > { %2199 = vmatpush.msra.mxu2 %v2112_v55  ;;  %2219 = vmatpush.msra.mxu3 %v2113_v10  ;;  %v1848_v8 = vsel %vm1183_vm15, %v4676_v0, %v8457_v19  ;;  %v2103_v57 = vsel %vm8468_vm12, %v1923_v12, %v1961_v22  ;;  %v1809_v45 = vsel %vm1109_vm6, %v4750_v50, %v8461_v17  ;;  %v4705_v0 = vunpack.i.l.bf16 %v6459_v42 }
 0x397   : > { %v2079_v48 = vsel %vm1627_vm9, %v6419_v60, %v6453_v6  ;;  %v2003_v30 = vsel %vm1479_vm11, %v8460_v24, %v8459_v11  ;;  %v4756_v55 = vunpack.i.h.bf16 %v6477_v46  ;;  %v4755_v12 = vunpack.i.l.bf16 %v6477_v46 }
 0x398   : > { %v4761_v7 = vunpack.i.h.bf16 %v6508_v33  ;;  %2200 = vmatpush.msra.mxu2 %v2103_v57  ;;  %v6563_v22 = vpop.permute.xlu0 %4743  ;;  %v6565_v5 = vpop.permute.xlu1 %4778  ;;  %v4701_v44 = vunpack.i.h.bf16 %v6461_v18  ;;  %v2094_v10 = vsel %vm8468_vm12, %v1847_v27, %v1885_v41  ;;  %v2085_v57 = vsel %vm8468_vm12, %v6322_v23, %v1809_v45 }
 0x399   : > { %v4746_v3 = vunpack.i.h.bf16 %v6563_v22  ;;  %v4745_v61 = vunpack.i.l.bf16 %v6563_v22  ;;  %v4780_v19 = vunpack.i.l.bf16 %v6565_v5  ;;  %v1921_v24 = vsel %vm1331_vm0, %v4700_v54, %v4681_v63 }
 0x39a   : > { %2201 = vmatpush.msra.mxu2 %v2094_v10  ;;  %v6572_v9 = vpop.permute.xlu2 %4773  ;;  %v2041_v11 = vsel %vm1553_vm14, %v4761_v7, %v8462_v25  ;;  %v8576_v10 = vunpack.i.l.bf16 %v6457_v51  ;;  %v8577_v23 = vunpack.i.h.bf16 %v6457_v51  ;;  %v6597_v25 = vld [vmem:[%s8578_s28] sm:$0xf]  ;;  %v1886_v51 = vsel %vm1257_vm3, %v4741_v32, %v4755_v12  ;;  %s5280_s28 = smov 101  }
 0x39b   : > { %v4776_v27 = vunpack.i.h.bf16 %v6572_v9  ;;  %v4775_v41 = vunpack.i.l.bf16 %v6572_v9  ;;  %v2116_v32 = vsel %vm8468_vm12, %v2003_v30, %v2041_v11 }
 0x39c   : > { %v1960_v17 = vsel %vm8467_vm10, %v4746_v3, %v8576_v10  ;;  %v1962_v45 = vsel %vm8467_vm10, %v8577_v23, %v4745_v61  ;;  %2202 = vmatpush.msra.mxu2 %v2085_v57  ;;  %v1884_v10 = vsel %vm1257_vm3, %v4756_v55, %v4740_v35  ;;  %v4710_v35 = vunpack.i.l.bf16 %v6465_v28 }
 0x39d   : > { %v2102_v63 = vsel %vm8468_vm12, %v6493_v26, %v1960_v17  ;;  %v2104_v54 = vsel %vm8468_vm12, %v6503_v56, %v1962_v45  ;;  %v1959_v23 = vsel %vm8467_vm10, %v4775_v41, %v4746_v3  ;;  %v1927_v26 = vsel %vm1331_vm0, %v4701_v44, %v4705_v0  ;;  %4500 = vmatmul.msk.f32.vlgmr.msra.gmra.mxu2 %vm8471_vm2, %v6597_v25 }
 0x39e   : > { %4507 = vmatpush.msk.msrb.mxu2 %vm8468_vm12, %v2079_v48  ;;  %2180 = vmatpush.msra.mxu1 %v2102_v63  ;;  %v1965_v56 = vsel %vm8467_vm10, %v4776_v27, %v4780_v19  ;;  %v2101_v17 = vsel %vm8468_vm12, %v1921_v24, %v1959_v23  ;;  %v2093_v3 = vsel %vm8468_vm12, %v1846_v34, %v1884_v10  ;;  %v4720_v41 = vunpack.i.l.bf16 %v6467_v1 }
 0x39f   : > { %2220 = vmatpush.msra.mxu3 %v2104_v54  ;;  %v2107_v48 = vsel %vm8468_vm12, %v1927_v26, %v1965_v56  ;;  %2160 = vmatpush.msra.mxu0 %v2101_v17  ;;  %v2095_v57 = vsel %vm8468_vm12, %v1848_v8, %v1886_v51  ;;  %v4766_v24 = vunpack.i.h.bf16 %v6516_v62  ;;  %v4696_v34 = vunpack.i.h.bf16 %v6455_v40 }
 0x3a0   : > { %2279 = vmatpush.msrb.mxu2 %v2116_v32  ;;  %2181 = vmatpush.msra.mxu1 %v2093_v3  ;;  %v6628_v45 = vpop.permute.xlu0 %4768  ;;  %v6630_v11 = vpop.permute.xlu1 %4783  ;;  %v4706_v8 = vunpack.i.h.bf16 %v6459_v42  ;;  %v1845_v51 = vsel %vm1183_vm15, %v4710_v35, %v4686_v36  ;;  %v2078_v23 = vsel %vm1627_vm9, %v6445_v29, %v6419_v60  ;;  %v4781_v26 = vunpack.i.h.bf16 %v6565_v5 }
 0x3a1   : > { %2221 = vmatpush.msra.mxu3 %v2095_v57  ;;  %v4771_v30 = vunpack.i.h.bf16 %v6628_v45  ;;  %v4770_v63 = vunpack.i.l.bf16 %v6628_v45  ;;  %v4785_v54 = vunpack.i.l.bf16 %v6630_v11  ;;  %v8579_v36 = vunpack.i.h.bf16 %v6469_v31 }
 0x3a2   : > { %2280 = vmatpush.msrb.mxu2 %v2107_v48  ;;  %v6638_v10 = vpop.permute.xlu2 %4803  ;;  %v8580_v35 = vunpack.i.h.bf16 %v6447_v53  ;;  %v8581_v31 = vunpack.i.l.bf16 %v6516_v62  ;;  %v4716_v53 = vunpack.i.h.bf16 %v6438_v37 }
 0x3a3   : > { %v4805_v56 = vunpack.i.l.bf16 %v6638_v10  ;;  %v1883_v32 = vsel %vm1257_vm3, %v4785_v54, %v4756_v55  ;;  %v1808_v17 = vsel %vm1109_vm6, %v4771_v30, %v4750_v50  ;;  %v1810_v60 = vsel %vm1109_vm6, %v8579_v36, %v4770_v63 }
 0x3a4   : > { %v2092_v48 = vsel %vm8468_vm12, %v1845_v51, %v1883_v32  ;;  %v2084_v3 = vsel %vm8468_vm12, %v6314_v49, %v1808_v17  ;;  %v2002_v55 = vsel %vm1479_vm11, %v4720_v41, %v8580_v35  ;;  %v2086_v50 = vsel %vm8468_vm12, %v6324_v13, %v1810_v60 }
 0x3a5   : > { %2161 = vmatpush.msra.mxu0 %v2092_v48  ;;  %2182 = vmatpush.msra.mxu1 %v2084_v3  ;;  %v2040_v49 = vsel %vm1553_vm14, %v4805_v56, %v4761_v7  ;;  %v2042_v57 = vsel %vm1553_vm14, %v8581_v31, %v4766_v24  ;;  %v4715_v54 = vunpack.i.l.bf16 %v6438_v37  ;;  %v2080_v13 = vsel %vm1627_vm9, %v6453_v6, %v6427_v59 }
 0x3a6   : > { %2222 = vmatpush.msra.mxu3 %v2086_v50  ;;  %v2115_v33 = vsel %vm8468_vm12, %v2002_v55, %v2040_v49  ;;  %v4711_v7 = vunpack.i.h.bf16 %v6465_v28  ;;  %v8582_v51 = vunpack.i.l.bf16 %v6455_v40  ;;  %4498 = vmatmul.msk.f32.vlgmr.msra.gmra.mxu1 %vm8471_vm2, %v6597_v25  ;;  %v1928_v3 = vsel %vm1331_vm0, %v4705_v0, %v4706_v8 }
 0x3a7   : > { %4505 = vmatpush.msk.msrb.mxu1 %vm8468_vm12, %v2078_v23  ;;  %v1966_v23 = vsel %vm8467_vm10, %v4780_v19, %v4781_v26  ;;  %4502 = vmatmul.msk.f32.vlgmr.msra.gmra.mxu3 %vm8471_vm2, %v6597_v25  ;;  %v4786_v19 = vunpack.i.h.bf16 %v6630_v11  ;;  %v1852_v50 = vsel %vm1183_vm15, %v4715_v54, %v4716_v53  ;;  %v4806_v9 = vunpack.i.h.bf16 %v6638_v10 }
 0x3a8   : > { %4509 = vmatpush.msk.msrb.mxu3 %vm8468_vm12, %v2080_v13  ;;  %v2004_v32 = vsel %vm1479_vm11, %v8582_v51, %v4696_v34  ;;  %v6696_v6 = vpop.permute.xlu0 %4788  ;;  %v6698_v17 = vpop.permute.xlu1 %4793  ;;  %v2108_v55 = vsel %vm8468_vm12, %v1928_v3, %v1966_v23  ;;  %v1851_v11 = vsel %vm1183_vm15, %v4711_v7, %v4715_v54  ;;  %v8583_v51 = vunpack.i.l.bf16 %v6463_v52  ;;  %v2120_v52 = vld [vmem:[%s8585_s10] sm:$0xf]  ;;  %s5282_s10 = smov 5  }
 0x3a9   : > { %2259 = vmatpush.msrb.mxu1 %v2115_v33  ;;  %v2117_v48 = vsel %vm8468_vm12, %v2004_v32, %v2042_v57  ;;  %v4791_v36 = vunpack.i.h.bf16 %v6696_v6  ;;  %v4790_v60 = vunpack.i.l.bf16 %v6696_v6  ;;  %v4795_v35 = vunpack.i.l.bf16 %v6698_v17  ;;  %2123 = vperm.xlu2 %4807, %v2120_v52  }
 0x3aa   : > { %2299 = vmatpush.msrb.mxu3 %v2117_v48  ;;  %v2077_v54 = vsel %vm1627_vm9, %v6433_v14, %v6445_v29  ;;  %v4796_v14 = vunpack.i.h.bf16 %v6698_v17  ;;  %v1926_v48 = vsel %vm1331_vm0, %v6471_v16, %v4701_v44  ;;  %v4721_v28 = vunpack.i.h.bf16 %v6467_v1 }
 0x3ab   : > { %v1807_v0 = vsel %vm1109_vm6, %v4795_v35, %v4771_v30  ;;  %v1889_v49 = vsel %vm1257_vm3, %v4786_v19, %v4790_v60  ;;  %v1890_v31 = vsel %vm1257_vm3, %v4790_v60, %v4791_v36  ;;  %v2039_v30 = vsel %vm1553_vm14, %v8583_v51, %v4805_v56 }
 0x3ac   : > { %2300 = vmatpush.msrb.mxu3 %v2108_v55  ;;  %v2083_v57 = vsel %vm8468_vm12, %v6312_v58, %v1807_v0  ;;  %v2098_v13 = vsel %vm8468_vm12, %v1851_v11, %v1889_v49  ;;  %v2099_v33 = vsel %vm8468_vm12, %v1852_v50, %v1890_v31  ;;  %v8584_v58 = vunpack.i.l.bf16 %v6443_v21 }
 0x3ad   : > { %2162 = vmatpush.msra.mxu0 %v2083_v57  ;;  %2281 = vmatpush.msrb.mxu2 %v2098_v13  ;;  %v8586_v21 = vunpack.i.l.bf16 %v6413_v4  ;;  %v8587_v50 = vunpack.i.l.bf16 %v6449_v39  ;;  %v2072_v57 = vpop.permute.xlu2 %2071 }
 0x3ae   : > { %2301 = vmatpush.msrb.mxu3 %v2099_v33  ;;  %v2001_v32 = vsel %vm1479_vm11, %v8584_v58, %v4720_v41  ;;  %4496 = vmatmul.msk.f32.vlgmr.msra.gmra.mxu0 %vm8471_vm2, %v6597_v25  ;;  %v2081_v45 = vsel %vm1627_vm9, %v6427_v59, %v2072_v57  ;;  %vm2377_vm9 = vcmask 441344  }
 0x3af   : > { %4503 = vmatpush.msk.msrb.mxu0 %vm8468_vm12, %v2077_v54  ;;  %v2114_v56 = vsel %vm8468_vm12, %v2001_v32, %v2039_v30  ;;  %v1925_v41 = vsel %vm1331_vm0, %v8586_v21, %v6471_v16 }
 0x3b0   : > { %v4799_v29 = vpop.permute.xlu0 %4798  ;;  %v1950_v23 = vpop.permute.xlu1 %1949 }
 0x3b1   : > { %2239 = vmatpush.msrb.mxu0 %v2114_v56  ;;  %v4801_v3 = vunpack.i.h.bf16 %v4799_v29  ;;  %v4800_v60 = vunpack.i.l.bf16 %v4799_v29  ;;  %v1963_v35 = vsel %vm8467_vm10, %v4745_v61, %v1950_v23  ;;  %v1964_v17 = vsel %vm8467_vm10, %v1950_v23, %v4776_v27 }
 0x3b2   : > { %v2105_v55 = vsel %vm8468_vm12, %v1925_v41, %v1963_v35  ;;  %v2106_v4 = vsel %vm8468_vm12, %v1926_v48, %v1964_v17 }
 0x3b3   : > { %2240 = vmatpush.msrb.mxu0 %v2105_v55  ;;  %2260 = vmatpush.msrb.mxu1 %v2106_v4  ;;  %v1813_v18 = vsel %vm1109_vm6, %v4796_v14, %v4800_v60  ;;  %v1814_v16 = vsel %vm1109_vm6, %v4800_v60, %v4801_v3 }
 0x3b4   : > { %v2089_v44 = vsel %vm8468_vm12, %v6343_v47, %v1813_v18  ;;  %v2090_v22 = vsel %vm8468_vm12, %v6360_v38, %v1814_v16  ;;  %v1849_v47 = vsel %vm1183_vm15, %v8587_v50, %v6451_v20  ;;  %v1850_v38 = vsel %vm1183_vm15, %v6451_v20, %v4711_v7 }
 0x3b5   : > { %2282 = vmatpush.msrb.mxu2 %v2089_v44  ;;  %2302 = vmatpush.msrb.mxu3 %v2090_v22  ;;  %v1844_v7 = vpop.permute.xlu2 %1843  ;;  %v8591_v16 = vmov 0.0  }
 0x3b6   : > { %4508 = vmatmul.msk.f32.vlgmr.msrb.gmra.mxu2 %vm8471_vm2, %v6597_v25  ;;  %4510 = vmatmul.msk.f32.vlgmr.msrb.gmra.mxu3 %vm8471_vm2, %v6597_v25 }
 0x3b8   : > { %v1874_v61 = vpop.permute.xlu0 %1873  ;;  %v1798_v27 = vpop.permute.xlu1 %1797 }
 0x3b9   : > { %v1887_v0 = vsel %vm1257_vm3, %v4755_v12, %v1874_v61  ;;  %v1888_v11 = vsel %vm1257_vm3, %v1874_v61, %v4786_v19  ;;  %v1811_v10 = vsel %vm1109_vm6, %v4770_v63, %v1798_v27  ;;  %v1812_v49 = vsel %vm1109_vm6, %v1798_v27, %v4796_v14 }
 0x3ba   : > { %v2096_v39 = vsel %vm8468_vm12, %v1849_v47, %v1887_v0  ;;  %v2097_v31 = vsel %vm8468_vm12, %v1850_v38, %v1888_v11  ;;  %v2087_v20 = vsel %vm8468_vm12, %v6334_v2, %v1811_v10  ;;  %v2088_v46 = vsel %vm8468_vm12, %v6372_v15, %v1812_v49 }
 0x3bb   : > { %2241 = vmatpush.msrb.mxu0 %v2096_v39  ;;  %2261 = vmatpush.msrb.mxu1 %v2097_v31  ;;  %v2043_v12 = vsel %vm1553_vm14, %v4766_v24, %v4806_v9  ;;  %v2005_v2 = vsel %vm1479_vm11, %v4696_v34, %v4721_v28  ;;  %v1853_v34 = vsel %vm1183_vm15, %v4716_v53, %v1844_v7  ;;  %vm8470_vm11 = vcmask 7168  }
 0x3bc   : > { %v2118_v62 = vsel %vm8468_vm12, %v2005_v2, %v2043_v12  ;;  %vm2408_vm14 = vcmask 39936  }
 0x3bd   : > { %2242 = vmatpush.msrb.mxu0 %v2087_v20  ;;  %2262 = vmatpush.msrb.mxu1 %v2088_v46 }
 0x3be   : > { %4504 = vmatmul.msk.f32.vlgmr.msrb.gmra.mxu0 %vm8471_vm2, %v6597_v25  ;;  %4506 = vmatmul.msk.f32.vlgmr.msrb.gmra.mxu1 %vm8471_vm2, %v6597_v25 }
 0x3bf   : > { %4511 = vmatpush.msk.msra.mxu0 %vm8468_vm12, %v2081_v45 }
 0x3c0   : > { %v1920_v15 = vpop.permute.xlu0 %1919  ;;  %v1958_v1 = vpop.permute.xlu1 %1957 }
 0x3c1   : > { %v1929_v59 = vsel %vm1331_vm0, %v4706_v8, %v1920_v15  ;;  %v1967_v24 = vsel %vm8467_vm10, %v4781_v26, %v1958_v1  ;;  %2319 = vmatpush.msra.mxu0 %v2118_v62  ;;  %vm2379_vm10 = vcmask 695296  }
 0x3c2   : > { %v2109_v63 = vsel %vm8468_vm12, %v1929_v59, %v1967_v24 }
 0x3c3   : > { %2320 = vmatpush.msra.mxu0 %v2109_v63 }
 0x3c8   : > { %v1882_v40 = vpop.permute.xlu0 %1881  ;;  %v1806_v19 = vpop.permute.xlu1 %1805 }
 0x3c9   : > { %v1891_v42 = vsel %vm1257_vm3, %v4791_v36, %v1882_v40  ;;  %v1815_v8 = vsel %vm1109_vm6, %v4801_v3, %v1806_v19  ;;  %vm2372_vm3 = vcmask 105472   ;;  %vm2374_vm6 = vcmask 146432  }
 0x3ca   : > { %v2100_v5 = vsel %vm8468_vm12, %v1853_v34, %v1891_v42  ;;  %v2091_v26 = vsel %vm8468_vm12, %v6356_v43, %v1815_v8  ;;  %vm2383_vm12 = vcmask 990208  }
 0x3cb   : > { %2321 = vmatpush.msra.mxu0 %v2100_v5 }
 0x3cd   : > { %2322 = vmatpush.msra.mxu0 %v2091_v26 }
 0x3ce   : > { %4512 = vmatmul.msk.f32.vlgmr.msra.gmra.mxu0 %vm8471_vm2, %v6597_v25 }
 0x403   : > { %v2124_v13 = vpop.permute.xlu2 %2123 }
 0x420   : > { %v2204_v36 = vpop.f32.mrf.mxu2 }
 0x421   : > { %v2205_v60 = vadd.f32 %v2204_v36, %v2124_v13 }
 0x423   : > { %v2184_v37 = vpop.f32.mrf.mxu1  ;;  %v2329_v17 = vmax.f32 %v2205_v60, 0.0 }
 0x424   : > { %v2185_v33 = vadd.f32 %v2184_v37, %v2124_v13 }
 0x426   : > { %v2328_v53 = vmax.f32 %v2185_v33, 0.0 }
 0x428   : > { %2344 = vrot.lane.b32.xlu0 %v2328_v53, %s8465_s3  ;;  %2347 = vrot.lane.b32.xlu1 %v2328_v53, %s8588_s5  ;;  %s5284_s3 = smov 6  }
 0x42a   : > { %v2224_v43 = vpop.f32.mrf.mxu3 }
 0x42b   : > { %v2164_v6 = vpop.f32.mrf.mxu0  ;;  %v2225_v4 = vadd.f32 %v2224_v43, %v2124_v13 }
 0x42c   : > { %v2165_v35 = vadd.f32 %v2164_v6, %v2124_v13 }
 0x42d   : > { %v2330_v18 = vmax.f32 %v2225_v4, 0.0 }
 0x42e   : > { %v2327_v55 = vmax.f32 %v2165_v35, 0.0 }
 0x439   : > { %v2284_v56 = vpop.f32.mrf.mxu2  ;;  %v2304_v29 = vpop.f32.mrf.mxu3 }
 0x43a   : > { %v2285_v25 = vadd.f32 %v2284_v56, %v2124_v13  ;;  %v2305_v23 = vadd.f32 %v2304_v29, %v2124_v13 }
 0x43b   : > { %v2244_v51 = vpop.f32.mrf.mxu0  ;;  %v2264_v30 = vpop.f32.mrf.mxu1 }
 0x43c   : > { %v2245_v54 = vadd.f32 %v2244_v51, %v2124_v13  ;;  %v2265_v58 = vadd.f32 %v2264_v30, %v2124_v13  ;;  %v2333_v14 = vmax.f32 %v2285_v25, 0.0  ;;  %v2334_v48 = vmax.f32 %v2305_v23, 0.0 }
 0x43e   : > { %v2331_v32 = vmax.f32 %v2245_v54, 0.0  ;;  %v2332_v52 = vmax.f32 %v2265_v58, 0.0 }
 0x440   : > { %2390 = vrot.lane.b32.xlu2 %v2331_v32, %s5280_s28  ;;  %2396 = vrot.lane.b32.xlu1 %v2332_v52, %s8589_s4 }
 0x441   : > { %2394 = vrot.lane.b32.xlu0 %v2331_v32, %s8589_s4 }
 0x448   : > { %2400 = vrot.lane.b32.xlu2 %v2332_v52, %s5281_s0  ;;  %2406 = vrot.lane.b32.xlu1 %v2333_v14, %s5282_s10 }
 0x449   : > { %2404 = vrot.lane.b32.xlu0 %v2332_v52, %s5282_s10 }
 0x44b   : > { %v2324_v21 = vpop.f32.mrf.mxu0 }
 0x44c   : > { %v2325_v41 = vadd.f32 %v2324_v21, %v2124_v13 }
 0x44e   : > { %v2335_v3 = vmax.f32 %v2325_v41, 0.0 }
 0x450   : > { %2428 = vrot.lane.b32.xlu2 %v2335_v3, %s5282_s10  ;;  %2418 = vrot.lane.b32.xlu1 %v2334_v48, %s8589_s4 }
 0x451   : > { %2416 = vrot.lane.b32.xlu0 %v2333_v14, %s8589_s4  ;;  %s5285_s4 = smov 52  }
 0x458   : > { %2412 = vrot.lane.b32.xlu2 %v2333_v14, %s5280_s28  ;;  %2426 = vrot.lane.b32.xlu1 %v2334_v48, %s5282_s10  ;;  %s5289_s28 = smov 124   ;;  %s8595_s10 = smov 126  }
 0x459   : > { %2422 = vrot.lane.b32.xlu0 %v2334_v48, %s5281_s0  ;;  %s5290_s0 = smov 54  }
 0x460   : > { %2351 = vrot.lane.b32.xlu2 %v2329_v17, %s5283_s27  ;;  %2354 = vrot.lane.b32.xlu1 %v2329_v17, %s5284_s3 }
 0x461   : > { %2337 = vrot.lane.b32.xlu0 %v2327_v55, %s5283_s27  ;;  %s8592_s27 = smov 65  }
 0x468   : > { %2358 = vrot.lane.b32.xlu2 %v2330_v18, %s8590_s7  ;;  %2361 = vrot.lane.b32.xlu1 %v2330_v18, %s8588_s5  ;;  %s5286_s7 = smov 90   ;;  %s5288_s5 = smov 88  }
 0x469   : > { %2340 = vrot.lane.b32.xlu0 %v2327_v55, %s5284_s3  ;;  %s8474_s3 = smov 56  }
 0x470   : > { %2649 = vrot.lane.b32.xlu1 %v8591_v16, %s5285_s4 }
 0x49a   : > { %v2391_v44 = vpop.permute.xlu2 %2390  ;;  %v2348_v22 = vpop.permute.xlu1 %2347 }
 0x49b   : > { %v6840_v9 = vpop.permute.xlu0 %2344  ;;  %v2432_v2 = vsel %vm2408_vm14, 0.0, %v2391_v44 }
 0x49c   : > { %v2373_v39 = vsel %vm2372_vm3, %v6840_v9, 0.0  ;;  %vm8472_vm3 = vcmask 736256   ;;  %v2433_v62 = vsel %vm8471_vm2, %v2432_v2, 0.0  ;;  %vm2440_vm2 = vcmask 924672  }
 0x49d   : > { %v2375_v57 = vsel %vm2374_vm6, %v2373_v39, %v2348_v22  ;;  %vm8473_vm6 = vcmask 588800   ;;  %v2483_v39 = vrot.slane %v8591_v16, 4 }
 0x49e   : > { %v2376_v45 = vsel %vm8469_vm7, %v2375_v57, 0.0  ;;  %vm2442_vm7 = vcmask 130048  }
 0x4a2   : > { %v2401_v61 = vpop.permute.xlu2 %2400 }
 0x4aa   : > { %v2429_v47 = vpop.permute.xlu2 %2428 }
 0x4b2   : > { %v2397_v27 = vpop.permute.xlu1 %2396  ;;  %v2413_v11 = vpop.permute.xlu2 %2412 }
 0x4b3   : > { %v2395_v50 = vpop.permute.xlu0 %2394 }
 0x4b4   : > { %v2398_v1 = vsel %vm810_vm5, %v2395_v50, %v2397_v27 }
 0x4b5   : > { %v2434_v63 = vsel %vm820_vm4, %v2433_v62, %v2398_v1  ;;  %vm2438_vm4 = vcmask 883712  }
 0x4b6   : > { %v2436_v5 = vsel %vm8473_vm6, %v2434_v63, 0.0  ;;  %vm2448_vm6 = vcmask 465920  }
 0x4b7   : > { %v2437_v37 = vsel %vm826_vm8, %v2436_v5, %v2401_v61  ;;  %vm2450_vm8 = vcmask 719872  }
 0x4b8   : > { %v2439_v36 = vsel %vm2438_vm4, %v2437_v37, 0.0  ;;  %vm8598_vm4 = vcmask 793600  }
 0x4ba   : > { %v2407_v38 = vpop.permute.xlu1 %2406  ;;  %v2352_v31 = vpop.permute.xlu2 %2351 }
 0x4bb   : > { %v2405_v0 = vpop.permute.xlu0 %2404  ;;  %v2378_v15 = vsel %vm2377_vm9, %v2376_v45, %v2352_v31 }
 0x4bc   : > { %v2380_v59 = vsel %vm2379_vm10, %v2378_v15, 0.0  ;;  %v2409_v42 = vsel %vm2408_vm14, %v2405_v0, %v2407_v38  ;;  %vm2444_vm10 = vcmask 171008   ;;  %v2441_v54 = vsel %vm2440_vm2, %v2439_v36, %v2405_v0 }
 0x4bd   : > { %v2443_v26 = vsel %vm2442_vm7, %v2409_v42, 0.0 }
 0x4be   : > { %v2445_v33 = vsel %vm2444_vm10, %v2443_v26, %v2413_v11 }
 0x4c2   : > { %v2419_v10 = vpop.permute.xlu1 %2418  ;;  %v2359_v19 = vpop.permute.xlu2 %2358 }
 0x4c3   : > { %v2417_v49 = vpop.permute.xlu0 %2416 }
 0x4c4   : > { %v2420_v51 = vsel %vm810_vm5, %v2417_v49, %v2419_v10 }
 0x4ca   : > { %v2427_v28 = vpop.permute.xlu1 %2426 }
 0x4cb   : > { %v2430_v20 = vsel %vm2408_vm14, %v2427_v28, %v2429_v47  ;;  %v2423_v46 = vpop.permute.xlu0 %2422  ;;  %vm2446_vm14 = vcmask 424960   ;;  %v2677_v28 = vld [vmem:[%s8599_s26] sm:$0xff]  ;;  %s5294_s26 = smov 48  }
 0x4cc   : > { %v2456_v12 = vsel %vm8470_vm11, 0.0, %v2430_v20  ;;  %vm2364_vm11 = vcmask 310272   ;;  %v2447_v43 = vsel %vm2446_vm14, %v2445_v33, 0.0 }
 0x4cd   : > { %2464 = vrot.lane.b32.xlu1 %v2456_v12, %s8592_s27  ;;  %v2449_v52 = vsel %vm2448_vm6, %v2447_v43, %v2420_v51 }
 0x4ce   : > { %v2451_v56 = vsel %vm2450_vm8, %v2449_v52, 0.0 }
 0x4cf   : > { %v2452_v25 = vsel %vm1331_vm0, %v2451_v56, %v2423_v46 }
 0x4d2   : > { %v2355_v24 = vpop.permute.xlu1 %2354 }
 0x4d3   : > { %v2382_v7 = vsel %vm8472_vm3, %v2380_v59, %v2355_v24  ;;  %v2338_v40 = vpop.permute.xlu0 %2337  ;;  %vm2369_vm3 = vcmask 859136  }
 0x4d4   : > { %v2384_v34 = vsel %vm2383_vm12, %v2382_v7, 0.0  ;;  %v2365_v13 = vsel %vm2364_vm11, 0.0, %v2338_v40  ;;  %vm2367_vm12 = vcmask 605184   ;;  %vm8593_vm11 = vcmask 531456  }
 0x4d5   : > { %v6855_v8 = vsel %vm1183_vm15, %v2384_v34, %v2359_v19  ;;  %v2366_v53 = vsel %vm810_vm5, %v2365_v13, 0.0  ;;  %vm2453_vm5 = vcmask 1014784   ;;  %vm8596_vm0 = vmmov %vm8593_vm11 }
 0x4d6   : > { %2641 = vrot.lane.b32.xlu2 %v6855_v8, %s5285_s4  ;;  %v2454_v14 = vsel %vm2453_vm5, %v2452_v25, 0.0  ;;  %v2479_v17 = vrot.slane %v6855_v8, 4  ;;  %vm8597_vm10 = vmmov %vm8596_vm0 }
 0x4da   : > { %v2362_v23 = vpop.permute.xlu1 %2361 }
 0x4db   : > { %v2341_v6 = vpop.permute.xlu0 %2340 }
 0x4dc   : > { %v2368_v30 = vsel %vm2367_vm12, %v2366_v53, %v2341_v6 }
 0x4dd   : > { %v2370_v58 = vsel %vm2369_vm3, %v2368_v30, 0.0 }
 0x4de   : > { %v6869_v32 = vsel %vm894_vm13, %v2370_v58, %v6840_v9  ;;  %2460 = vrot.lane.b32.xlu2 %v2441_v54, %s8592_s27  ;;  %vm2386_vm13 = vcmask 236544  }
 0x4df   : > { %2639 = vrot.lane.b32.xlu0 %v6869_v32, %s5285_s4  ;;  %v2387_v21 = vsel %vm2386_vm13, %v2359_v19, 0.0  ;;  %v2478_v38 = vrot.slane %v6869_v32, 4  ;;  %vm2606_vm13 = vcmask 457728  }
 0x4e0   : > { %v2388_v41 = vsel %vm870_vm1, %v2387_v21, %v2362_v23  ;;  %vm8594_vm1 = vcmask 1043456  }
 0x4e1   : > { %vm8600_vm12 = vmmov %vm8594_vm1 }
 0x4e2   : > { %v6896_v18 = vpop.permute.xlu1 %2649 }
 0x4e7   : > { %2462 = vrot.lane.b32.xlu0 %v2454_v14, %s8592_s27  ;;  %s5293_s27 = smov 12  }
 0x530   : > { %v6879_v29 = vpop.permute.xlu2 %2641 }
 0x538   : > { %v2461_v48 = vpop.permute.xlu2 %2460 }
 0x539   : > { %v6883_v3 = vsel %vm8593_vm11, %v2388_v41, %v2461_v48  ;;  %vm8601_vm11 = vmmov %vm8594_vm1 }
 0x53a   : > { %2643 = vrot.lane.b32.xlu0 %v6883_v3, %s5285_s4  ;;  %v4813_v60 = vpack.i.bf16 %v6883_v3, %v6855_v8  ;;  %v2480_v35 = vrot.slane %v6883_v3, 4 }
 0x53c   : > { %4814 = vrot.lane.b32.xlu1 %v4813_v60, %s5286_s7  ;;  %4809 = vrot.lane.b32.xlu2 %v4813_v60, %s8474_s3  ;;  %v4828_v55 = vpack.i.bf16 %v2480_v35, %v2479_v17 }
 0x53f   : > { %v2465_v27 = vpop.permute.xlu1 %2464 }
 0x542   : > { %4829 = vrot.lane.b32.xlu0 %v4828_v55, %s5288_s5 }
 0x544   : > { %4819 = vrot.lane.b32.xlu2 %v4813_v60, %s5289_s28  ;;  %4824 = vrot.lane.b32.xlu1 %v4828_v55, %s5290_s0 }
 0x54c   : > { %4834 = vrot.lane.b32.xlu1 %v4828_v55, %s8574_s15 }
 0x551   : > { %v2640_v4 = vpop.permute.xlu0 %2639 }
 0x552   : > { %v2651_v44 = vsel %vm2446_vm14, %v2640_v4, %v6879_v29 }
 0x553   : > { %4513 = vmatpush.msk.msra.mxu1 %vm8594_vm1, %v2651_v44  ;;  %vm8602_vm1 = vcmask 736256  }
 0x554   : > { %4839 = vrot.lane.b32.xlu1 %v4828_v55, %s8595_s10 }
 0x559   : > { %v2463_v22 = vpop.permute.xlu0 %2462 }
 0x55a   : > { %v6903_v9 = vsel %vm8596_vm0, %v2461_v48, %v2463_v22  ;;  %v2467_v50 = vsel %vm8597_vm10, %v2463_v22, %v2465_v27  ;;  %vm8603_vm0 = vmmov %vm8601_vm11  ;;  %vm8604_vm10 = vcmask 752640  }
 0x55b   : > { %v4848_v61 = vpack.i.bf16 %v6869_v32, %v6903_v9  ;;  %v2481_v47 = vrot.slane %v6903_v9, 4  ;;  %v6915_v0 = vsel %vm8598_vm4, %v2467_v50, 0.0  ;;  %vm8605_vm4 = vmmov %vm8603_vm0 }
 0x55c   : > { %2645 = vrot.lane.b32.xlu1 %v6903_v9, %s5285_s4  ;;  %v4863_v10 = vpack.i.bf16 0.0, %v6915_v0  ;;  %v2482_v49 = vrot.slane %v6915_v0, 4 }
 0x55d   : > { %4849 = vrot.lane.b32.xlu2 %v4848_v61, %s5286_s7  ;;  %4844 = vrot.lane.b32.xlu0 %v4848_v61, %s8474_s3  ;;  %v4873_v11 = vpack.i.bf16 %v2478_v38, %v2481_v47 }
 0x55e   : > { %v4893_v31 = vpack.i.bf16 %v2483_v39, %v2482_v49 }
 0x564   : > { %4874 = vrot.lane.b32.xlu1 %v4873_v11, %s5288_s5 }
 0x565   : > { %4864 = vrot.lane.b32.xlu2 %v4863_v10, %s5286_s7  ;;  %4854 = vrot.lane.b32.xlu0 %v4848_v61, %s5289_s28  ;;  %s8638_s7 = smov 44  }
 0x56c   : > { %4894 = vrot.lane.b32.xlu1 %v4893_v31, %s5290_s0 }
 0x56d   : > { %2647 = vrot.lane.b32.xlu0 %v6915_v0, %s5285_s4  ;;  %4869 = vrot.lane.b32.xlu2 %v4873_v11, %s5290_s0  ;;  %s8606_s4 = sld [smem:[#allocation52_spill]]  ;;  %s5291_s0 = smov 108  }
 0x573   : > { %v6976_v21 = vld [vmem:[%s8606_s4] sm:$0xff]  ;;  %s5296_s4 = smov 84  }
 0x574   : > { %2492 = vrot.lane.b32.xlu1 %v2482_v49, %s8595_s10 }
 0x575   : > { %4859 = vrot.lane.b32.xlu0 %v4863_v10, %s8474_s3  ;;  %4879 = vrot.lane.b32.xlu2 %v4873_v11, %s8574_s15  ;;  %s5303_s3 = smov 16  }
 0x57d   : > { %4899 = vrot.lane.b32.xlu0 %v4893_v31, %s5288_s5  ;;  %4884 = vrot.lane.b32.xlu2 %v4873_v11, %s8595_s10 }
 0x585   : > { %4904 = vrot.lane.b32.xlu0 %v4893_v31, %s8574_s15  ;;  %4889 = vrot.lane.b32.xlu2 %v4863_v10, %s5289_s28  ;;  %s5295_s15 = smov 40  }
 0x58d   : > { %2680 = vperm.xlu0 %4655, %v2677_v28   ;;  %2494 = vrot.lane.b32.xlu2 %v2483_v39, %s8595_s10  ;;  %s5292_s10 = smov 76  }
 0x596   : > { %v4810_v57 = vpop.permute.xlu2 %4809 }
 0x597   : > { %v4812_v15 = vunpack.i.h.bf16 %v4810_v57  ;;  %v4811_v1 = vunpack.i.l.bf16 %v4810_v57 }
 0x599   : > { %v2608_v42 = vsel %vm2606_vm13, %v4811_v1, %v4812_v15 }
 0x59e   : > { %v6941_v45 = vpop.permute.xlu2 %4819 }
 0x59f   : > { %v4822_v53 = vunpack.i.h.bf16 %v6941_v45  ;;  %v4821_v6 = vunpack.i.l.bf16 %v6941_v45 }
 0x5a1   : > { %v2519_v58 = vsel %vm2453_vm5, %v4821_v6, %v4822_v53 }
 0x5ac   : > { %v2644_v20 = vpop.permute.xlu0 %2643 }
 0x5ad   : > { %v2652_v46 = vsel %vm2446_vm14, %v6879_v29, %v2644_v20 }
 0x5ae   : > { %v6938_v12 = vpop.permute.xlu1 %4814  ;;  %4515 = vmatpush.msk.msra.mxu2 %vm8600_vm12, %v2652_v46  ;;  %vm8607_vm12 = vmmov %vm8603_vm0 }
 0x5af   : > { %v4817_v63 = vunpack.i.h.bf16 %v6938_v12  ;;  %v4816_v7 = vunpack.i.l.bf16 %v6938_v12 }
 0x5b1   : > { %v2563_v37 = vsel %vm8602_vm1, %v4816_v7, %v4817_v63  ;;  %vm8609_vm1 = vmmov %vm8603_vm0 }
 0x5b4   : > { %v6943_v2 = vpop.permute.xlu0 %4829 }
 0x5b5   : > { %v4832_v62 = vunpack.i.h.bf16 %v6943_v2  ;;  %v4831_v59 = vunpack.i.l.bf16 %v6943_v2 }
 0x5b6   : > { %v4825_v24 = vpop.permute.xlu1 %4824 }
 0x5b7   : > { %v4827_v40 = vunpack.i.h.bf16 %v4825_v24  ;;  %v4826_v19 = vunpack.i.l.bf16 %v4825_v24  ;;  %v6949_v34 = vpop.permute.xlu2 %4849  ;;  %v2585_v26 = vsel %vm2450_vm8, %v4831_v59, %v4832_v62 }
 0x5b8   : > { %v2667_v33 = vsel %vm8603_vm0, %v2563_v37, %v2585_v26  ;;  %v4852_v11 = vunpack.i.h.bf16 %v6949_v34  ;;  %v4851_v10 = vunpack.i.l.bf16 %v6949_v34 }
 0x5b9   : > { %v2630_v5 = vsel %vm2377_vm9, %v4826_v19, %v4827_v40 }
 0x5ba   : > { %v2672_v13 = vsel %vm8601_vm11, %v2608_v42, %v2630_v5  ;;  %vm8608_vm11 = vcmask 293888  }
 0x5bb   : > { %2728 = vmatpush.msra.mxu2 %v2672_v13 }
 0x5bd   : > { %2729 = vmatpush.msra.mxu2 %v2667_v33 }
 0x5be   : > { %v4835_v36 = vpop.permute.xlu1 %4834 }
 0x5bf   : > { %v4837_v51 = vunpack.i.h.bf16 %v4835_v36  ;;  %v4836_v30 = vunpack.i.l.bf16 %v4835_v36  ;;  %v6965_v54 = vpop.permute.xlu2 %4864 }
 0x5c1   : > { %v2541_v43 = vsel %vm8604_vm10, %v4836_v30, %v4837_v51  ;;  %vm8610_vm10 = vmmov %vm8603_vm0 }
 0x5c2   : > { %v2662_v52 = vsel %vm8605_vm4, %v2519_v58, %v2541_v43  ;;  %vm8611_vm4 = vcmask 736256  }
 0x5c3   : > { %2730 = vmatpush.msra.mxu2 %v2662_v52 }
 0x5c6   : > { %v4840_v56 = vpop.permute.xlu1 %4839 }
 0x5c7   : > { %v4842_v25 = vunpack.i.h.bf16 %v4840_v56  ;;  %v4841_v14 = vunpack.i.l.bf16 %v4840_v56  ;;  %v6970_v29 = vpop.permute.xlu2 %4869 }
 0x5c8   : > { %v4872_v48 = vunpack.i.h.bf16 %v6970_v29  ;;  %v4871_v60 = vunpack.i.l.bf16 %v6970_v29 }
 0x5c9   : > { %v2497_v23 = vsel %vm1183_vm15, %v4841_v14, %v4842_v25 }
 0x5ca   : > { %v2657_v41 = vsel %vm8607_vm12, %v6855_v8, %v2497_v23  ;;  %v2629_v61 = vsel %vm2377_vm9, %v4872_v48, %v4826_v19  ;;  %v2631_v50 = vsel %vm2377_vm9, %v4827_v40, %v4871_v60  ;;  %v2562_v40 = vsel %vm8611_vm4, %v4852_v11, %v4816_v7  ;;  %vm8612_vm12 = vmmov %vm8611_vm4 }
 0x5cb   : > { %2731 = vmatpush.msra.mxu2 %v2657_v41  ;;  %v2564_v34 = vsel %vm8612_vm12, %v4817_v63, %v4851_v10 }
 0x5cc   : > { %4516 = vmatmul.msk.f32.vlgmr.msra.gmra.mxu2 %vm8608_vm11, %v6976_v21  ;;  %vm8613_vm11 = vmmov %vm8603_vm0 }
 0x5ce   : > { %v2646_v35 = vpop.permute.xlu1 %2645 }
 0x5cf   : > { %v2653_v17 = vsel %vm2446_vm14, %v2644_v20, %v2646_v35  ;;  %v6985_v55 = vpop.permute.xlu0 %4844  ;;  %v6987_v4 = vpop.permute.xlu2 %4879 }
 0x5d0   : > { %v4847_v44 = vunpack.i.h.bf16 %v6985_v55  ;;  %v4846_v22 = vunpack.i.l.bf16 %v6985_v55  ;;  %4517 = vmatpush.msk.msra.mxu3 %vm8609_vm1, %v2653_v17  ;;  %v4882_v39 = vunpack.i.h.bf16 %v6987_v4  ;;  %v4881_v31 = vunpack.i.l.bf16 %v6987_v4  ;;  %vm8614_vm1 = vmmov %vm8603_vm0 }
 0x5d1   : > { %vm8617_vm4 = vmmov %vm8614_vm1  ;;  %v4866_v17 = vunpack.i.l.bf16 %v6965_v54 }
 0x5d2   : > { %v2607_v8 = vsel %vm2606_vm13, %v4847_v44, %v4811_v1  ;;  %v2609_v27 = vsel %vm2606_vm13, %v4812_v15, %v4846_v22  ;;  %vm8618_vm12 = vmmov %vm8614_vm1 }
 0x5d3   : > { %v2671_v47 = vsel %vm8603_vm0, %v2607_v8, %v2629_v61  ;;  %v2673_v38 = vsel %vm8610_vm10, %v2609_v27, %v2631_v50  ;;  %vm8615_vm0 = vcmask 752640  }
 0x5d4   : > { %2708 = vmatpush.msra.mxu1 %v2671_v47  ;;  %2748 = vmatpush.msra.mxu3 %v2673_v38  ;;  %v2540_v12 = vsel %vm8615_vm0, %v4882_v39, %v4836_v30  ;;  %vm8616_vm10 = vmmov %vm8615_vm0  ;;  %vm8620_vm0 = vcmask 293888  }
 0x5d5   : > { %v2542_v2 = vsel %vm8616_vm10, %v4837_v51, %v4881_v31  ;;  %vm8621_vm10 = vmmov %vm8620_vm0 }
 0x5d6   : > { %v7002_v49 = vpop.permute.xlu1 %4874 }
 0x5d7   : > { %v7006_v28 = vpop.permute.xlu0 %4854  ;;  %v4877_v57 = vunpack.i.h.bf16 %v7002_v49  ;;  %v4876_v20 = vunpack.i.l.bf16 %v7002_v49  ;;  %v7010_v46 = vpop.permute.xlu2 %4884 }
 0x5d8   : > { %v4857_v45 = vunpack.i.h.bf16 %v7006_v28  ;;  %v4856_v15 = vunpack.i.l.bf16 %v7006_v28  ;;  %v4887_v1 = vunpack.i.h.bf16 %v7010_v46  ;;  %v4886_v24 = vunpack.i.l.bf16 %v7010_v46 }
 0x5d9   : > { %v2584_v19 = vsel %vm2450_vm8, %v4877_v57, %v4831_v59  ;;  %v2586_v42 = vsel %vm2450_vm8, %v4832_v62, %v4876_v20 }
 0x5da   : > { %v2666_v5 = vsel %vm8613_vm11, %v2562_v40, %v2584_v19  ;;  %v2668_v26 = vsel %vm8614_vm1, %v2564_v34, %v2586_v42  ;;  %v2518_v13 = vsel %vm2453_vm5, %v4857_v45, %v4821_v6  ;;  %v2520_v7 = vsel %vm2453_vm5, %v4822_v53, %v4856_v15  ;;  %vm8619_vm11 = vmmov %vm8614_vm1 }
 0x5db   : > { %2709 = vmatpush.msra.mxu1 %v2666_v5  ;;  %2749 = vmatpush.msra.mxu3 %v2668_v26  ;;  %v2496_v62 = vsel %vm1183_vm15, %v4887_v1, %v4841_v14  ;;  %v2661_v59 = vsel %vm8617_vm4, %v2518_v13, %v2540_v12  ;;  %v2663_v63 = vsel %vm8618_vm12, %v2520_v7, %v2542_v2  ;;  %vm8622_vm4 = vmmov %vm8614_vm1 }
 0x5dc   : > { %v2498_v37 = vsel %vm1183_vm15, %v4842_v25, %v4886_v24  ;;  %v2656_v33 = vsel %vm8619_vm11, %v6869_v32, %v2496_v62  ;;  %vm8623_vm12 = vmmov %vm8614_vm1 }
 0x5dd   : > { %2710 = vmatpush.msra.mxu1 %v2661_v59  ;;  %2750 = vmatpush.msra.mxu3 %v2663_v63  ;;  %v2658_v53 = vsel %vm8614_vm1, %v6883_v3, %v2498_v37  ;;  %vm8625_vm11 = vmmov %vm8614_vm1 }
 0x5de   : > { %v4895_v32 = vpop.permute.xlu1 %4894 }
 0x5df   : > { %v2648_v6 = vpop.permute.xlu0 %2647  ;;  %2711 = vmatpush.msra.mxu1 %v2656_v33  ;;  %2751 = vmatpush.msra.mxu3 %v2658_v53  ;;  %v4897_v3 = vunpack.i.h.bf16 %v4895_v32  ;;  %v4896_v30 = vunpack.i.l.bf16 %v4895_v32  ;;  %v4890_v48 = vpop.permute.xlu2 %4889 }
 0x5e0   : > { %v2654_v36 = vsel %vm2446_vm14, %v2646_v35, %v2648_v6  ;;  %v2655_v51 = vsel %vm2446_vm14, %v2648_v6, %v6896_v18  ;;  %4514 = vmatmul.msk.f32.vlgmr.msra.gmra.mxu1 %vm8620_vm0, %v6976_v21  ;;  %4518 = vmatmul.msk.f32.vlgmr.msra.gmra.mxu3 %vm8621_vm10, %v6976_v21  ;;  %vm8624_vm14 = vmmov %vm8614_vm1  ;;  %v4867_v35 = vunpack.i.h.bf16 %v6965_v54  ;;  %vm8626_vm1 = vcmask 736256  }
 0x5e1   : > { %4519 = vmatpush.msk.msrb.mxu0 %vm8622_vm4, %v2654_v36  ;;  %4521 = vmatpush.msk.msrb.mxu1 %vm8623_vm12, %v2655_v51  ;;  %v2632_v18 = vsel %vm2377_vm9, %v4871_v60, %v4896_v30  ;;  %v2633_v14 = vsel %vm2377_vm9, %v4896_v30, %v4897_v3  ;;  %v2565_v60 = vsel %vm8626_vm1, %v4851_v10, %v4866_v17  ;;  %vm8627_vm0 = vmmov %vm8626_vm1  ;;  %v7071_v47 = vunpack.i.h.bf16 %v4890_v48 }
 0x5e2   : > { %v2566_v8 = vsel %vm8627_vm0, %v4866_v17, %v4867_v35  ;;  %vm8628_vm9 = vmmov %vm8622_vm4  ;;  %v4891_v54 = vunpack.i.l.bf16 %v4890_v48 }
 0x5e3   : > { %vm8629_vm10 = vmmov %vm8622_vm4  ;;  %vm8630_vm4 = vcmask 752640  }
 0x5e4   : > { %v2521_v57 = vsel %vm2453_vm5, %v4856_v15, %v4891_v54  ;;  %vm8631_vm12 = vmmov %vm8630_vm4 }
 0x5e5   : > { %vm8634_vm1 = vmmov %vm8628_vm9 }
 0x5e6   : > { %v2493_v38 = vpop.permute.xlu1 %2492  ;;  %vm8635_vm0 = vmmov %vm8634_vm1 }
 0x5e7   : > { %v4860_v58 = vpop.permute.xlu0 %4859  ;;  %v2495_v11 = vpop.permute.xlu2 %2494  ;;  %v2499_v45 = vsel %vm1183_vm15, %v4886_v24, %v2493_v38 }
 0x5e8   : > { %v4862_v43 = vunpack.i.h.bf16 %v4860_v58  ;;  %v4861_v52 = vunpack.i.l.bf16 %v4860_v58  ;;  %v2500_v1 = vsel %vm1183_vm15, %v2493_v38, %v2495_v11  ;;  %v2659_v15 = vsel %vm8634_vm1, %v6903_v9, %v2499_v45  ;;  %v2985_v11 = vld [vmem:[%s8647_s11] sm:$0xff]  ;;  %s763_s11 = sand.u32 1, %s5232_s2  }
 0x5e9   : > { %v2660_v46 = vsel %vm8635_vm0, %v6915_v0, %v2500_v1  ;;  %vm8636_vm15 = vcmask 293888   ;;  %vm2839_vm1 = vcmask 596992   ;;  %vm2841_vm0 = vcmask 687104  }
 0x5ea   : > { %v2610_v56 = vsel %vm2606_vm13, %v4846_v22, %v4861_v52  ;;  %v2611_v25 = vsel %vm2606_vm13, %v4861_v52, %v4862_v43 }
 0x5eb   : > { %v2674_v23 = vsel %vm8624_vm14, %v2610_v56, %v2632_v18  ;;  %v2675_v41 = vsel %vm8625_vm11, %v2611_v25, %v2633_v14  ;;  %vm8632_vm14 = vmmov %vm8628_vm9 }
 0x5ec   : > { %2768 = vmatpush.msrb.mxu0 %v2674_v23  ;;  %2788 = vmatpush.msrb.mxu1 %v2675_v41  ;;  %vm8633_vm11 = vmmov %vm8628_vm9 }
 0x5ef   : > { %v4900_v55 = vpop.permute.xlu0 %4899 }
 0x5f0   : > { %v4902_v44 = vunpack.i.h.bf16 %v4900_v55  ;;  %v4901_v29 = vunpack.i.l.bf16 %v4900_v55 }
 0x5f2   : > { %v2587_v22 = vsel %vm2450_vm8, %v4876_v20, %v4901_v29  ;;  %v2588_v61 = vsel %vm2450_vm8, %v4901_v29, %v4902_v44  ;;  %v2522_v20 = vsel %vm2453_vm5, %v4891_v54, %v7071_v47 }
 0x5f3   : > { %v2669_v27 = vsel %vm8628_vm9, %v2565_v60, %v2587_v22  ;;  %v2670_v50 = vsel %vm8629_vm10, %v2566_v8, %v2588_v61  ;;  %vm8637_vm9 = vmmov %vm8636_vm15  ;;  %vm2845_vm10 = vcmask 203776  }
 0x5f4   : > { %2769 = vmatpush.msrb.mxu0 %v2669_v27  ;;  %2789 = vmatpush.msrb.mxu1 %v2670_v50 }
 0x5f7   : > { %v4905_v49 = vpop.permute.xlu0 %4904 }
 0x5f8   : > { %v4907_v39 = vunpack.i.h.bf16 %v4905_v49  ;;  %v4906_v10 = vunpack.i.l.bf16 %v4905_v49 }
 0x5fa   : > { %v2543_v40 = vsel %vm8630_vm4, %v4881_v31, %v4906_v10  ;;  %v2544_v19 = vsel %vm8631_vm12, %v4906_v10, %v4907_v39  ;;  %vm8639_vm4 = vmmov %vm8637_vm9  ;;  %vm8640_vm12 = vcmask 531456  }
 0x5fb   : > { %v2664_v34 = vsel %vm8632_vm14, %v2521_v57, %v2543_v40  ;;  %v2665_v28 = vsel %vm8633_vm11, %v2522_v20, %v2544_v19  ;;  %vm8641_vm14 = vcmask 621568   ;;  %vm8642_vm11 = vcmask 359424  }
 0x5fc   : > { %2770 = vmatpush.msrb.mxu0 %v2664_v34  ;;  %2790 = vmatpush.msrb.mxu1 %v2665_v28 }
 0x5fe   : > { %2771 = vmatpush.msrb.mxu0 %v2659_v15  ;;  %2791 = vmatpush.msrb.mxu1 %v2660_v46 }
 0x5ff   : > { %4520 = vmatmul.msk.f32.vlgmr.msrb.gmra.mxu0 %vm8636_vm15, %v6976_v21  ;;  %4522 = vmatmul.msk.f32.vlgmr.msrb.gmra.mxu1 %vm8637_vm9, %v6976_v21  ;;  %v2681_v4 = vpop.permute.xlu0 %2680  ;;  %vm2851_vm15 = vcmask 949248   ;;  %vm8643_vm9 = vcmask 138240  }
 0x64f   : > { %v2733_v31 = vpop.f32.mrf.mxu2 }
 0x650   : > { %v2734_v24 = vadd.f32 %v2733_v31, %v2681_v4 }
 0x652   : > { %v2797_v42 = vmax.f32 %v2734_v24, 0.0 }
 0x654   : > { %2809 = vrot.lane.b32.xlu1 %v2797_v42, %s5291_s0  ;;  %2812 = vrot.lane.b32.xlu2 %v2797_v42, %s5292_s10 }
 0x65d   : > { %v2713_v9 = vpop.f32.mrf.mxu1 }
 0x65e   : > { %v2714_v5 = vadd.f32 %v2713_v9, %v2681_v4 }
 0x660   : > { %v2796_v13 = vmax.f32 %v2714_v5, 0.0 }
 0x663   : > { %v2753_v26 = vpop.f32.mrf.mxu3 }
 0x664   : > { %v2754_v0 = vadd.f32 %v2753_v26, %v2681_v4 }
 0x666   : > { %v2798_v7 = vmax.f32 %v2754_v0, 0.0 }
 0x668   : > { %v4908_v12 = vpack.i.bf16 %v2798_v7, %v2796_v13  ;;  %2820 = vrot.lane.b32.xlu2 %v2798_v7, %s5293_s27 }
 0x66a   : > { %4909 = vrot.lane.b32.xlu1 %v4908_v12, %s8638_s7 }
 0x672   : > { %2805 = vrot.lane.b32.xlu1 %v2796_v13, %s5293_s27 }
 0x67c   : > { %v2773_v21 = vpop.f32.mrf.mxu0  ;;  %v2793_v59 = vpop.f32.mrf.mxu1 }
 0x67d   : > { %v2774_v2 = vadd.f32 %v2773_v21, %v2681_v4  ;;  %v2794_v63 = vadd.f32 %v2793_v59, %v2681_v4 }
 0x67f   : > { %v2799_v62 = vmax.f32 %v2774_v2, 0.0  ;;  %v2800_v37 = vmax.f32 %v2794_v63, 0.0 }
 0x681   : > { %2822 = vrot.lane.b32.xlu0 %v2799_v62, %s5293_s27  ;;  %2832 = vrot.lane.b32.xlu2 %v2799_v62, %s5292_s10  ;;  %s8672_s27 = smov 56  }
 0x689   : > { %2828 = vrot.lane.b32.xlu0 %v2799_v62, %s5291_s0  ;;  %s8477_s0 = smov 80  }
 0x691   : > { %2834 = vrot.lane.b32.xlu0 %v2800_v37, %s5292_s10  ;;  %s8475_s10 = smov 120  }
 0x6ae   : > { %v2813_v6 = vpop.permute.xlu2 %2812 }
 0x6c2   : > { %v2821_v14 = vpop.permute.xlu2 %2820 }
 0x6c6   : > { %v2810_v33 = vpop.permute.xlu1 %2809 }
 0x6c7   : > { %v2846_v53 = vsel %vm2845_vm10, %v2810_v33, 0.0  ;;  %vm8644_vm10 = vmmov %vm8641_vm14 }
 0x6c8   : > { %v2847_v51 = vsel %vm8639_vm4, %v2846_v53, %v2813_v6  ;;  %vm8645_vm4 = vcmask 556032  }
 0x6c9   : > { %v2848_v30 = vsel %vm8640_vm12, %v2847_v51, 0.0  ;;  %vm8646_vm12 = vcmask 793600  }
 0x6db   : > { %v2833_v22 = vpop.permute.xlu2 %2832 }
 0x6dc   : > { %v4910_v36 = vpop.permute.xlu1 %4909 }
 0x6dd   : > { %v4912_v32 = vunpack.i.h.bf16 %v4910_v36  ;;  %v4911_v3 = vunpack.i.l.bf16 %v4910_v36 }
 0x6df   : > { %v2849_v58 = vsel %vm8641_vm14, %v2848_v30, %v4912_v32  ;;  %v2838_v43 = vsel %vm8642_vm11, 0.0, %v4911_v3  ;;  %vm2945_vm14 = vcmask 392192  }
 0x6e0   : > { %v2850_v52 = vsel %vm2369_vm3, %v2849_v58, 0.0  ;;  %v2840_v18 = vsel %vm2839_vm1, %v2838_v43, 0.0  ;;  %vm2854_vm3 = vcmask 228352   ;;  %vm2929_vm1 = vcmask 654336  }
 0x6e1   : > { %v7104_v41 = vsel %vm2851_vm15, %v2850_v52, %v2821_v14  ;;  %vm2883_vm15 = vcmask 982016  }
 0x6e4   : > { %v2806_v56 = vpop.permute.xlu1 %2805 }
 0x6e5   : > { %v2842_v25 = vsel %vm2841_vm0, %v2840_v18, %v2806_v56 }
 0x6e6   : > { %v2843_v23 = vsel %vm2440_vm2, %v2842_v25, 0.0  ;;  %vm2824_vm2 = vcmask 97280  }
 0x6e7   : > { %v7107_v48 = vsel %vm2453_vm5, %v2843_v23, %v2810_v33 }
 0x6e8   : > { %v4923_v35 = vpack.i.bf16 %v7104_v41, %v7107_v48 }
 0x6ea   : > { %4924 = vrot.lane.b32.xlu2 %v4923_v35, %s5294_s26  ;;  %4919 = vrot.lane.b32.xlu0 %v4923_v35, %s8638_s7 }
 0x6eb   : > { %4914 = vrot.lane.b32.xlu1 %v4923_v35, %s5295_s15 }
 0x6f2   : > { %4939 = vrot.lane.b32.xlu2 %v4923_v35, %s5288_s5  ;;  %4934 = vrot.lane.b32.xlu0 %v4923_v35, %s5296_s4 }
 0x6f3   : > { %v2823_v17 = vpop.permute.xlu0 %2822  ;;  %4929 = vrot.lane.b32.xlu1 %v4923_v35, %s8477_s0 }
 0x6f4   : > { %v2825_v44 = vsel %vm2824_vm2, %v2821_v14, %v2823_v17  ;;  %vm8649_vm2 = vcmask 588800  }
 0x6f5   : > { %v2853_v29 = vsel %vm8643_vm9, %v2825_v44, 0.0 }
 0x6fa   : > { %4949 = vrot.lane.b32.xlu0 %v4923_v35, %s5289_s28 }
 0x6fb   : > { %v2829_v55 = vpop.permute.xlu0 %2828  ;;  %4944 = vrot.lane.b32.xlu1 %v4923_v35, %s8475_s10 }
 0x6fc   : > { %v2855_v60 = vsel %vm2854_vm3, %v2853_v29, %v2829_v55  ;;  %vm8650_vm3 = vmmov %vm8642_vm11 }
 0x6fd   : > { %v2856_v61 = vsel %vm2448_vm6, %v2855_v60, 0.0  ;;  %vm2976_vm6 = vcmask 326656   ;;  %vm8651_vm9 = vmmov %vm8650_vm3 }
 0x703   : > { %v2835_v8 = vpop.permute.xlu0 %2834 }
 0x704   : > { %v2836_v27 = vsel %vm8644_vm10, %v2833_v22, %v2835_v8  ;;  %vm8652_vm10 = vmmov %vm8649_vm2 }
 0x705   : > { %v7123_v50 = vsel %vm8645_vm4, %v2856_v61, %v2836_v27  ;;  %vm8653_vm4 = vmmov %vm8646_vm12 }
 0x706   : > { %v2858_v54 = vsel %vm8646_vm12, %v7123_v50, 0.0  ;;  %vm8654_vm12 = vmmov %vm8649_vm2 }
 0x707   : > { %v4963_v38 = vpack.i.bf16 0.0, %v2858_v54 }
 0x709   : > { %4964 = vrot.lane.b32.xlu0 %v4963_v38, %s5294_s26  ;;  %4959 = vrot.lane.b32.xlu1 %v4963_v38, %s8638_s7 }
 0x70a   : > { %4954 = vrot.lane.b32.xlu2 %v4963_v38, %s5295_s15 }
 0x711   : > { %2895 = vrot.lane.b32.xlu0 %v2858_v54, %s5288_s5  ;;  %2910 = vrot.lane.b32.xlu1 %v2858_v54, %s5296_s4 }
 0x712   : > { %4969 = vrot.lane.b32.xlu2 %v4963_v38, %s8477_s0 }
 0x719   : > { %2897 = vrot.lane.b32.xlu0 %v8591_v16, %s5288_s5  ;;  %2866 = vrot.lane.b32.xlu1 %v2858_v54, %s5289_s28 }
 0x71a   : > { %2879 = vrot.lane.b32.xlu2 %v2858_v54, %s8475_s10 }
 0x721   : > { %2881 = vrot.lane.b32.xlu1 %v8591_v16, %s8475_s10  ;;  %s8648_s10 = sld [smem:[#allocation54_spill]] }
 0x722   : > { %2912 = vrot.lane.b32.xlu2 %v8591_v16, %s5296_s4 }
 0x727   : > { %v2984_v58 = vld [vmem:[%s8648_s10] sm:$0xff]  ;;  %s5301_s10 = smov 64  }
 0x72a   : > { %2988 = vperm.xlu2 %4807, %v2985_v11  }
 0x744   : > { %v7144_v49 = vpop.permute.xlu2 %4924 }
 0x745   : > { %v4927_v19 = vunpack.i.h.bf16 %v7144_v49  ;;  %v4926_v34 = vunpack.i.l.bf16 %v7144_v49 }
 0x747   : > { %v2946_v31 = vsel %vm2945_vm14, %v4926_v34, %v4927_v19 }
 0x74c   : > { %v7146_v39 = vpop.permute.xlu2 %4939 }
 0x74d   : > { %v4942_v21 = vunpack.i.h.bf16 %v7146_v39  ;;  %v4941_v2 = vunpack.i.l.bf16 %v7146_v39 }
 0x74f   : > { %v2899_v37 = vsel %vm2450_vm8, %v4941_v2, %v4942_v21 }
 0x75c   : > { %v7148_v10 = vpop.permute.xlu0 %4919 }
 0x75d   : > { %v4915_v57 = vpop.permute.xlu1 %4914  ;;  %v4922_v20 = vunpack.i.h.bf16 %v7148_v10  ;;  %v4921_v45 = vunpack.i.l.bf16 %v7148_v10 }
 0x75e   : > { %v4917_v1 = vunpack.i.h.bf16 %v4915_v57  ;;  %v4916_v40 = vunpack.i.l.bf16 %v4915_v57 }
 0x75f   : > { %v2961_v15 = vsel %vm8642_vm11, %v4921_v45, %v4922_v20  ;;  %vm8655_vm11 = vmmov %vm8649_vm2 }
 0x760   : > { %v2977_v28 = vsel %vm2976_vm6, %v4916_v40, %v4917_v1 }
 0x761   : > { %3001 = vmatpush.msrb.mxu2 %v2977_v28 }
 0x763   : > { %3002 = vmatpush.msrb.mxu2 %v2961_v15 }
 0x764   : > { %v4955_v46 = vpop.permute.xlu2 %4954  ;;  %v7156_v4 = vpop.permute.xlu0 %4934 }
 0x765   : > { %v4957_v24 = vunpack.i.h.bf16 %v4955_v46  ;;  %v4956_v42 = vunpack.i.l.bf16 %v4955_v46  ;;  %v4930_v9 = vpop.permute.xlu1 %4929  ;;  %3003 = vmatpush.msrb.mxu2 %v2946_v31  ;;  %v4937_v5 = vunpack.i.h.bf16 %v7156_v4  ;;  %v4936_v26 = vunpack.i.l.bf16 %v7156_v4 }
 0x766   : > { %v4932_v0 = vunpack.i.h.bf16 %v4930_v9  ;;  %v4931_v13 = vunpack.i.l.bf16 %v4930_v9 }
 0x767   : > { %3061 = vmatpush.msra.mxu1 %v4957_v24  ;;  %v2978_v7 = vsel %vm2976_vm6, %v4917_v1, %v4956_v42  ;;  %v2979_v12 = vsel %vm2976_vm6, %v4956_v42, %v4957_v24  ;;  %v2914_v59 = vsel %vm2841_vm0, %v4936_v26, %v4937_v5 }
 0x768   : > { %3021 = vmatpush.msrb.mxu3 %v2978_v7  ;;  %3041 = vmatpush.msra.mxu0 %v2979_v12  ;;  %v2930_v62 = vsel %vm2929_vm1, %v4931_v13, %v4932_v0 }
 0x769   : > { %3004 = vmatpush.msrb.mxu2 %v2930_v62 }
 0x76b   : > { %3005 = vmatpush.msrb.mxu2 %v2914_v59 }
 0x76c   : > { %v4950_v63 = vpop.permute.xlu0 %4949  ;;  %v4970_v53 = vpop.permute.xlu2 %4969 }
 0x76d   : > { %v4945_v33 = vpop.permute.xlu1 %4944  ;;  %3006 = vmatpush.msrb.mxu2 %v2899_v37  ;;  %v4952_v6 = vunpack.i.h.bf16 %v4950_v63  ;;  %v4951_v36 = vunpack.i.l.bf16 %v4950_v63  ;;  %v7177_v35 = vunpack.i.h.bf16 %v4970_v53  ;;  %v4971_v17 = vunpack.i.l.bf16 %v4970_v53 }
 0x76e   : > { %v4947_v51 = vunpack.i.h.bf16 %v4945_v33  ;;  %v4946_v32 = vunpack.i.l.bf16 %v4945_v33 }
 0x76f   : > { %v2868_v30 = vsel %vm2453_vm5, %v4951_v36, %v4952_v6  ;;  %v2931_v22 = vsel %vm2929_vm1, %v4932_v0, %v4971_v17  ;;  %v2932_v8 = vsel %vm2929_vm1, %v4971_v17, %v7177_v35 }
 0x770   : > { %v2884_v3 = vsel %vm2883_vm15, %v4946_v32, %v4947_v51 }
 0x771   : > { %3007 = vmatpush.msrb.mxu2 %v2884_v3 }
 0x773   : > { %3008 = vmatpush.msrb.mxu2 %v2868_v30  ;;  %v3231_v30 = vld [vmem:[%s8376_s14 + $0x8] sm:$0xff] }
 0x774   : > { %v2880_v43 = vpop.permute.xlu2 %2879 }
 0x775   : > { %3009 = vmatpush.msrb.mxu2 %v7107_v48  ;;  %v2885_v49 = vsel %vm2883_vm15, %v4947_v51, %v2880_v43 }
 0x776   : > { %4523 = vmatmul.msk.f32.vlgmr.msrb.gmra.mxu2 %vm8649_vm2, %v2984_v58  ;;  %vm8657_vm2 = vmmov %vm8650_vm3 }
 0x77b   : > { %v4965_v52 = vpop.permute.xlu0 %4964  ;;  %v4960_v56 = vpop.permute.xlu1 %4959 }
 0x77c   : > { %v4967_v18 = vunpack.i.h.bf16 %v4965_v52  ;;  %v4966_v25 = vunpack.i.l.bf16 %v4965_v52  ;;  %v4962_v14 = vunpack.i.h.bf16 %v4960_v56  ;;  %v4961_v23 = vunpack.i.l.bf16 %v4960_v56  ;;  %v2913_v60 = vpop.permute.xlu2 %2912 }
 0x77e   : > { %3062 = vmatpush.msra.mxu1 %v4962_v14  ;;  %v2962_v55 = vsel %vm8650_vm3, %v4922_v20, %v4961_v23  ;;  %v2963_v44 = vsel %vm8651_vm9, %v4961_v23, %v4962_v14  ;;  %v2947_v48 = vsel %vm2945_vm14, %v4927_v19, %v4966_v25  ;;  %v2948_v29 = vsel %vm2945_vm14, %v4966_v25, %v4967_v18  ;;  %vm8658_vm3 = vmmov %vm8657_vm2 }
 0x77f   : > { %3022 = vmatpush.msrb.mxu3 %v2962_v55  ;;  %3042 = vmatpush.msra.mxu0 %v2963_v44  ;;  %vm8659_vm9 = vmmov %vm8657_vm2 }
 0x780   : > { %3063 = vmatpush.msra.mxu1 %v4967_v18 }
 0x781   : > { %3023 = vmatpush.msrb.mxu3 %v2947_v48  ;;  %3043 = vmatpush.msra.mxu0 %v2948_v29 }
 0x782   : > { %3064 = vmatpush.msra.mxu1 %v7177_v35 }
 0x783   : > { %v2896_v61 = vpop.permute.xlu0 %2895  ;;  %v2911_v27 = vpop.permute.xlu1 %2910  ;;  %3024 = vmatpush.msrb.mxu3 %v2931_v22  ;;  %3044 = vmatpush.msra.mxu0 %v2932_v8 }
 0x784   : > { %v2915_v54 = vsel %vm2841_vm0, %v4937_v5, %v2911_v27  ;;  %v2916_v38 = vsel %vm2841_vm0, %v2911_v27, %v2913_v60  ;;  %3065 = vmatpush.msra.mxu1 %v2913_v60  ;;  %v2900_v11 = vsel %vm2450_vm8, %v4942_v21, %v2896_v61  ;;  %v3098_v5 = vld [vmem:[%s8656_s12] sm:$0xf]  ;;  %s764_s12 = scalar_lea.vmem [#allocation6], %s763_s11 }
 0x785   : > { %3025 = vmatpush.msrb.mxu3 %v2915_v54  ;;  %3045 = vmatpush.msra.mxu0 %v2916_v38  ;;  %v3100_v0 = vperm.slane %v3098_v5, 0  ;;  %v3101_v13 = vperm.slane %v3098_v5, 1  ;;  %v3102_v2 = vperm.slane %v3098_v5, 2  ;;  %v3103_v59 = vperm.slane %v3098_v5, 3 }
 0x787   : > { %3026 = vmatpush.msrb.mxu3 %v2900_v11 }
 0x789   : > { %3027 = vmatpush.msrb.mxu3 %v2885_v49 }
 0x78b   : > { %v2898_v39 = vpop.permute.xlu0 %2897  ;;  %v2867_v10 = vpop.permute.xlu1 %2866 }
 0x78c   : > { %v2869_v57 = vsel %vm2453_vm5, %v4952_v6, %v2867_v10  ;;  %v2901_v20 = vsel %vm2450_vm8, %v2896_v61, %v2898_v39  ;;  %3066 = vmatpush.msra.mxu1 %v2898_v39  ;;  %v2870_v40 = vsel %vm2453_vm5, %v2867_v10, %v7071_v47 }
 0x78d   : > { %3028 = vmatpush.msrb.mxu3 %v2869_v57  ;;  %3046 = vmatpush.msra.mxu0 %v2901_v20 }
 0x78f   : > { %3029 = vmatpush.msrb.mxu3 %v7104_v41  ;;  %v2989_v41 = vpop.permute.xlu2 %2988 }
 0x790   : > { %4524 = vmatmul.msk.f32.vlgmr.msrb.gmra.mxu3 %vm8652_vm10, %v2984_v58  ;;  %vm8660_vm10 = vmmov %vm8657_vm2 }
 0x793   : > { %v7197_v45 = vpop.permute.xlu1 %2881 }
 0x794   : > { %3067 = vmatpush.msra.mxu1 %v7197_v45  ;;  %v2886_v1 = vsel %vm2883_vm15, %v2880_v43, %v7197_v45 }
 0x795   : > { %3047 = vmatpush.msra.mxu0 %v2886_v1 }
 0x796   : > { %3068 = vmatpush.msra.mxu1 %v7071_v47 }
 0x797   : > { %3048 = vmatpush.msra.mxu0 %v2870_v40 }
 0x798   : > { %3069 = vmatpush.msra.mxu1 %v8591_v16 }
 0x799   : > { %4525 = vmatpush.msk.msra.mxu0 %vm8653_vm4, %v7123_v50  ;;  %4527 = vmatmul.msk.f32.vlgmr.msra.gmra.mxu1 %vm8654_vm12, %v2984_v58  ;;  %vm8662_vm4 = vmmov %vm8657_vm2 }
 0x79a   : > { %4526 = vmatmul.msk.f32.vlgmr.msra.gmra.mxu0 %vm8655_vm11, %v2984_v58  ;;  %v3230_v58 = vld [vmem:[%s8376_s14] sm:$0xff]  ;;  %vm8663_vm12 = vmmov %vm8657_vm2 }
 0x79b   : > { %vm8664_vm11 = vmmov %vm8657_vm2 }
 0x7f9   : > { %v3011_v19 = vpop.f32.mrf.mxu2 }
 0x7fa   : > { %v3012_v34 = vadd.f32 %v3011_v19, %v2989_v41 }
 0x7fc   : > { %v3074_v28 = vmax.f32 %v3012_v34, 0.0 }
 0x7fe   : > { %3082 = vrot.lane.b32.xlu0 %v3074_v28, %s8638_s7 }
 0x813   : > { %v3031_v15 = vpop.f32.mrf.mxu3 }
 0x814   : > { %v3032_v46 = vadd.f32 %v3031_v15, %v2989_v41 }
 0x816   : > { %v3075_v4 = vmax.f32 %v3032_v46, 0.0  ;;  %v3071_v47 = vpop.f32.mrf.mxu1 }
 0x817   : > { %v3072_v31 = vadd.f32 %v3071_v47, %v2989_v41  ;;  %v3051_v24 = vpop.f32.mrf.mxu0 }
 0x818   : > { %v3052_v42 = vadd.f32 %v3051_v24, %v2989_v41  ;;  %3084 = vrot.lane.b32.xlu1 %v3075_v4, %s8638_s7 }
 0x819   : > { %v3077_v50 = vmax.f32 %v3072_v31, 0.0 }
 0x81a   : > { %v3076_v9 = vmax.f32 %v3052_v42, 0.0 }
 0x81b   : > { %3088 = vrot.lane.b32.xlu0 %v3077_v50, %s8638_s7 }
 0x81c   : > { %3086 = vrot.lane.b32.xlu2 %v3076_v9, %s8638_s7 }
 0x870   : > { %v3083_v26 = vpop.permute.xlu0 %3082 }
 0x871   : > { %v3097_v7 = vsel %vm8657_vm2, 0.0, %v3083_v26 }
 0x872   : > { %v7219_v63 = vmul.f32 %v3100_v0, %v3097_v7 }
 0x876   : > { %v3087_v21 = vpop.permute.xlu2 %3086 }
 0x88a   : > { %v3085_v12 = vpop.permute.xlu1 %3084 }
 0x88b   : > { %v3090_v62 = vsel %vm8658_vm3, %v3083_v26, %v3085_v12  ;;  %v3091_v37 = vsel %vm8659_vm9, %v3085_v12, %v3087_v21 }
 0x88c   : > { %v7222_v33 = vmul.f32 %v3101_v13, %v3090_v62  ;;  %v7227_v51 = vmul.f32 %v3102_v2, %v3091_v37 }
 0x88d   : > { %v3089_v53 = vpop.permute.xlu0 %3088 }
 0x88e   : > { %v3092_v6 = vsel %vm8660_vm10, %v3087_v21, %v3089_v53  ;;  %v4983_v36 = vpack.i.bf16 %v7222_v33, %v7219_v63 }
 0x88f   : > { %v3111_v32 = vmul.f32 %v3103_v59, %v3092_v6 }
 0x890   : > { %4984 = vrot.lane.b32.xlu0 %v4983_v36, %s8638_s7  ;;  %4974 = vrot.lane.b32.xlu1 %v4983_v36, %s5295_s15 }
 0x891   : > { %v4978_v3 = vpack.i.bf16 %v3111_v32, %v7227_v51 }
 0x893   : > { %4979 = vrot.lane.b32.xlu2 %v4978_v3, %s5295_s15  ;;  %s8661_s15 = smov 120  }
 0x898   : > { %4999 = vrot.lane.b32.xlu0 %v4978_v3, %s5294_s26  ;;  %4989 = vrot.lane.b32.xlu1 %v4978_v3, %s8638_s7  ;;  %s8697_s7 = smov 96  }
 0x89b   : > { %4994 = vrot.lane.b32.xlu2 %v4983_v36, %s5294_s26  ;;  %s5299_s26 = smov 24  }
 0x8a0   : > { %5014 = vrot.lane.b32.xlu0 %v4983_v36, %s5296_s4  ;;  %5004 = vrot.lane.b32.xlu1 %v4983_v36, %s8477_s0 }
 0x8a3   : > { %5009 = vrot.lane.b32.xlu2 %v4978_v3, %s8477_s0 }
 0x8a8   : > { %3148 = vrot.lane.b32.xlu0 %v7227_v51, %s5288_s5  ;;  %3162 = vrot.lane.b32.xlu1 %v7227_v51, %s5296_s4 }
 0x8ab   : > { %5019 = vrot.lane.b32.xlu2 %v4983_v36, %s5288_s5 }
 0x8b0   : > { %5029 = vrot.lane.b32.xlu0 %v4983_v36, %s5289_s28  ;;  %5024 = vrot.lane.b32.xlu1 %v4983_v36, %s8661_s15 }
 0x8b3   : > { %3134 = vrot.lane.b32.xlu2 %v7227_v51, %s8661_s15 }
 0x8b8   : > { %3150 = vrot.lane.b32.xlu0 %v3111_v32, %s5288_s5  ;;  %3120 = vrot.lane.b32.xlu1 %v7227_v51, %s5289_s28 }
 0x8bb   : > { %3164 = vrot.lane.b32.xlu2 %v3111_v32, %s5296_s4  ;;  %s8685_s4 = smov 112  }
 0x8c0   : > { %3239 = vperm.xlu0 %4655, %v3231_v30   ;;  %3136 = vrot.lane.b32.xlu1 %v3111_v32, %s8661_s15 }
 0x8c3   : > { %3122 = vrot.lane.b32.xlu2 %v3111_v32, %s5289_s28  ;;  %s5302_s28 = smov 72  }
 0x8c8   : > { %3234 = vperm.xlu1 %4656, %v3230_v58  }
 0x8ed   : > { %v4980_v43 = vpop.permute.xlu2 %4979 }
 0x8ee   : > { %v4982_v52 = vunpack.i.h.bf16 %v4980_v43  ;;  %v4981_v56 = vunpack.i.l.bf16 %v4980_v43 }
 0x8f0   : > { %v3224_v18 = vsel %vm2976_vm6, %v4981_v56, %v4982_v52 }
 0x8f1   : > { %3301 = vmatpush.msrb.mxu0 %v3224_v18 }
 0x8f5   : > { %v4995_v25 = vpop.permute.xlu2 %4994 }
 0x8f6   : > { %v4997_v60 = vunpack.i.h.bf16 %v4995_v25  ;;  %v4996_v22 = vunpack.i.l.bf16 %v4995_v25 }
 0x8f8   : > { %v3194_v38 = vsel %vm2945_vm14, %v4996_v22, %v4997_v60 }
 0x8fd   : > { %v5010_v14 = vpop.permute.xlu2 %5009 }
 0x8fe   : > { %v5012_v1 = vunpack.i.h.bf16 %v5010_v14  ;;  %v5011_v40 = vunpack.i.l.bf16 %v5010_v14 }
 0x900   : > { %v3182_v46 = vsel %vm2929_vm1, %v5011_v40, %v5012_v1 }
 0x902   : > { %v4975_v23 = vpop.permute.xlu1 %4974  ;;  %v4985_v17 = vpop.permute.xlu0 %4984 }
 0x903   : > { %v4977_v55 = vunpack.i.h.bf16 %v4975_v23  ;;  %v4976_v44 = vunpack.i.l.bf16 %v4975_v23  ;;  %v4987_v48 = vunpack.i.h.bf16 %v4985_v17  ;;  %v4986_v29 = vunpack.i.l.bf16 %v4985_v17  ;;  %v3229_v17 = vld [vmem:[%s8665_s13 + $0x8] sm:$0xff] }
 0x905   : > { %v5020_v8 = vpop.permute.xlu2 %5019  ;;  %v3222_v61 = vsel %vm2976_vm6, %v4976_v44, %v4977_v55  ;;  %v3223_v27 = vsel %vm2976_vm6, %v4977_v55, %v4981_v56  ;;  %v3208_v54 = vsel %vm8662_vm4, %v4986_v29, %v4987_v48  ;;  %v3228_v56 = vld [vmem:[%s8665_s13] sm:$0xff]  ;;  %vm8675_vm4 = vcmask 850944   ;;  %s4432_s13 = sshll.u32 %s764_s12, 4  ;;  %s4433_s13 = int_to_ptr.vmem [resolvable:$true] %s4432_s13 }
 0x906   : > { %3255 = vmatpush.msra.mxu2 %v3222_v61  ;;  %3278 = vmatpush.msra.mxu3 %v3223_v27  ;;  %v5022_v9 = vunpack.i.h.bf16 %v5020_v8  ;;  %v5021_v5 = vunpack.i.l.bf16 %v5020_v8 }
 0x908   : > { %3256 = vmatpush.msra.mxu2 %v3208_v54  ;;  %v3152_v12 = vsel %vm2450_vm8, %v5021_v5, %v5022_v9 }
 0x90a   : > { %v4990_v11 = vpop.permute.xlu1 %4989  ;;  %v5000_v49 = vpop.permute.xlu0 %4999  ;;  %3257 = vmatpush.msra.mxu2 %v3194_v38 }
 0x90b   : > { %v4992_v39 = vunpack.i.h.bf16 %v4990_v11  ;;  %v4991_v10 = vunpack.i.l.bf16 %v4990_v11  ;;  %v5002_v57 = vunpack.i.h.bf16 %v5000_v49  ;;  %v5001_v20 = vunpack.i.l.bf16 %v5000_v49 }
 0x90d   : > { %v3209_v41 = vsel %vm8663_vm12, %v4987_v48, %v4991_v10  ;;  %v3210_v19 = vsel %vm8664_vm11, %v4991_v10, %v4992_v39  ;;  %v3135_v34 = vpop.permute.xlu2 %3134  ;;  %v3195_v28 = vsel %vm2945_vm14, %v4997_v60, %v5001_v20  ;;  %v3196_v15 = vsel %vm2945_vm14, %v5001_v20, %v5002_v57  ;;  %vm8676_vm12 = vmmov %vm8675_vm4 }
 0x90e   : > { %3279 = vmatpush.msra.mxu3 %v3209_v41  ;;  %3302 = vmatpush.msrb.mxu0 %v3210_v19  ;;  %vm8677_vm11 = vcmask 7168  }
 0x910   : > { %3280 = vmatpush.msra.mxu3 %v3195_v28  ;;  %3303 = vmatpush.msrb.mxu0 %v3196_v15 }
 0x912   : > { %v5005_v4 = vpop.permute.xlu1 %5004  ;;  %v5015_v47 = vpop.permute.xlu0 %5014  ;;  %3304 = vmatpush.msrb.mxu0 %v3182_v46 }
 0x913   : > { %v5007_v31 = vunpack.i.h.bf16 %v5005_v4  ;;  %v5006_v24 = vunpack.i.l.bf16 %v5005_v4  ;;  %v5017_v42 = vunpack.i.h.bf16 %v5015_v47  ;;  %v5016_v50 = vunpack.i.l.bf16 %v5015_v47 }
 0x915   : > { %v3180_v26 = vsel %vm2929_vm1, %v5006_v24, %v5007_v31  ;;  %v3181_v0 = vsel %vm2929_vm1, %v5007_v31, %v5011_v40  ;;  %v3166_v13 = vsel %vm2841_vm0, %v5016_v50, %v5017_v42  ;;  %v3165_v7 = vpop.permute.xlu2 %3164 }
 0x916   : > { %3258 = vmatpush.msra.mxu2 %v3180_v26  ;;  %3281 = vmatpush.msra.mxu3 %v3181_v0 }
 0x918   : > { %3259 = vmatpush.msra.mxu2 %v3166_v13 }
 0x91a   : > { %v3163_v21 = vpop.permute.xlu1 %3162  ;;  %v3149_v2 = vpop.permute.xlu0 %3148  ;;  %3260 = vmatpush.msra.mxu2 %v3152_v12 }
 0x91b   : > { %v3167_v62 = vsel %vm2841_vm0, %v5017_v42, %v3163_v21  ;;  %v3168_v59 = vsel %vm2841_vm0, %v3163_v21, %v3165_v7  ;;  %v3153_v37 = vsel %vm2450_vm8, %v5022_v9, %v3149_v2  ;;  %vm8666_vm0 = vcmask 588800  }
 0x91c   : > { %3282 = vmatpush.msra.mxu3 %v3167_v62  ;;  %3305 = vmatpush.msrb.mxu0 %v3168_v59  ;;  %vm8667_vm6 = vmmov %vm8666_vm0 }
 0x91d   : > { %vm8668_vm14 = vmmov %vm8666_vm0  ;;  %v3123_v44 = vpop.permute.xlu2 %3122 }
 0x91e   : > { %3283 = vmatpush.msra.mxu3 %v3153_v37  ;;  %vm8669_vm2 = vmmov %vm8666_vm0 }
 0x91f   : > { %vm8670_vm3 = vmmov %vm8666_vm0 }
 0x920   : > { %vm8671_vm9 = vmmov %vm8666_vm0 }
 0x922   : > { %v5025_v53 = vpop.permute.xlu1 %5024  ;;  %v5030_v6 = vpop.permute.xlu0 %5029 }
 0x923   : > { %v5027_v36 = vunpack.i.h.bf16 %v5025_v53  ;;  %v5026_v32 = vunpack.i.l.bf16 %v5025_v53  ;;  %v5032_v3 = vunpack.i.h.bf16 %v5030_v6  ;;  %v5031_v30 = vunpack.i.l.bf16 %v5030_v6 }
 0x925   : > { %v3138_v58 = vsel %vm2883_vm15, %v5026_v32, %v5027_v36  ;;  %v3139_v43 = vsel %vm2883_vm15, %v5027_v36, %v3135_v34  ;;  %v3124_v52 = vsel %vm2453_vm5, %v5031_v30, %v5032_v3 }
 0x926   : > { %3261 = vmatpush.msra.mxu2 %v3138_v58  ;;  %3284 = vmatpush.msra.mxu3 %v3139_v43 }
 0x928   : > { %3262 = vmatpush.msra.mxu2 %v3124_v52 }
 0x92a   : > { %v3121_v18 = vpop.permute.xlu1 %3120  ;;  %v3151_v25 = vpop.permute.xlu0 %3150  ;;  %3263 = vmatpush.msra.mxu2 %v7219_v63 }
 0x92b   : > { %4528 = vmatmul.msk.f32.vlgmr.msra.gmra.mxu2 %vm8666_vm0, %v3228_v56  ;;  %v3125_v14 = vsel %vm2453_vm5, %v5032_v3, %v3121_v18  ;;  %v3154_v23 = vsel %vm2450_vm8, %v3149_v2, %v3151_v25  ;;  %v3126_v48 = vsel %vm2453_vm5, %v3121_v18, %v3123_v44  ;;  %vm8673_vm5 = vcmask 662528  }
 0x92c   : > { %3285 = vmatpush.msra.mxu3 %v3125_v14  ;;  %3306 = vmatpush.msrb.mxu0 %v3154_v23  ;;  %vm8674_vm10 = vmmov %vm8673_vm5  ;;  %vm8678_vm0 = vcmask 400384  }
 0x92e   : > { %3286 = vmatpush.msra.mxu3 %v7222_v33 }
 0x92f   : > { %4530 = vmatmul.msk.f32.vlgmr.msra.gmra.mxu3 %vm8667_vm6, %v3228_v56  ;;  %vm8679_vm6 = vmmov %vm8669_vm2 }
 0x932   : > { %v3137_v55 = vpop.permute.xlu1 %3136  ;;  %v3240_v61 = vpop.permute.xlu0 %3239 }
 0x933   : > { %4529 = vmatmul.msk.f32.gmra.mxu2 %vm8668_vm14, %v3229_v17  ;;  %v3140_v63 = vsel %vm2883_vm15, %v3135_v34, %v3137_v55  ;;  %vm8680_vm14 = vcmask 793600   ;;  %v3527_v55 = vld [vmem:[%s8378_s17 + $0x8] sm:$0xff] }
 0x934   : > { %3307 = vmatpush.msrb.mxu0 %v3140_v63 }
 0x936   : > { %3308 = vmatpush.msrb.mxu0 %v3126_v48 }
 0x937   : > { %4531 = vmatmul.msk.f32.gmra.mxu3 %vm8669_vm2, %v3229_v17  ;;  %vm8681_vm2 = vmmov %vm8677_vm11 }
 0x938   : > { %3309 = vmatpush.msrb.mxu0 %v7227_v51 }
 0x939   : > { %4532 = vmatmul.msk.f32.vlgmr.msrb.gmra.mxu0 %vm8670_vm3, %v3228_v56  ;;  %vm8682_vm3 = vmmov %vm8678_vm0 }
 0x93a   : > { %v3235_v33 = vpop.permute.xlu1 %3234 }
 0x941   : > { %4533 = vmatmul.msk.f32.gmra.mxu0 %vm8671_vm9, %v3229_v17  ;;  %vm8683_vm9 = vmmov %vm8679_vm6  ;;  %v3526_v17 = vld [vmem:[%s8378_s17] sm:$0xff] }
 0x9ae   : > { %v3265_v29 = vpop.f32.mrf.mxu2 }
 0x9af   : > { %v3266_v60 = vadd.f32 %v3265_v29, %v3235_v33 }
 0x9b1   : > { %v3317_v22 = vmax.f32 %v3266_v60, 0.0 }
 0x9b2   : > { %v3288_v8 = vpop.f32.mrf.mxu3 }
 0x9b3   : > { %3331 = vrot.lane.b32.xlu1 %v3317_v22, %s5299_s26  ;;  %v3289_v27 = vadd.f32 %v3288_v8, %v3235_v33 }
 0x9b5   : > { %v3318_v49 = vmax.f32 %v3289_v27, 0.0 }
 0x9b6   : > { %v3268_v54 = vpop.f32.mrf.mxu2  ;;  %v3311_v38 = vpop.f32.mrf.mxu0 }
 0x9b7   : > { %v3269_v11 = vadd.f32 %v3268_v54, %v3240_v61  ;;  %v3312_v19 = vadd.f32 %v3311_v38, %v3235_v33 }
 0x9b9   : > { %v3320_v39 = vmax.f32 %v3269_v11, 0.0  ;;  %v3319_v34 = vmax.f32 %v3312_v19, 0.0 }
 0x9ba   : > { %v3291_v51 = vpop.f32.mrf.mxu3 }
 0x9bb   : > { %3333 = vrot.lane.b32.xlu2 %v3320_v39, %s5299_s26  ;;  %3339 = vrot.lane.b32.xlu1 %v3318_v49, %s8661_s15  ;;  %v3292_v10 = vadd.f32 %v3291_v51, %v3240_v61  ;;  %v5033_v41 = vpack.i.bf16 %v3317_v22, %v3320_v39 }
 0x9bd   : > { %v3321_v1 = vmax.f32 %v3292_v10, 0.0 }
 0x9be   : > { %v3314_v57 = vpop.f32.mrf.mxu0 }
 0x9bf   : > { %v3315_v20 = vadd.f32 %v3314_v57, %v3240_v61 }
 0x9c1   : > { %v3322_v40 = vmax.f32 %v3315_v20, 0.0 }
 0x9c3   : > { %3353 = vrot.lane.b32.xlu0 %v3322_v40, %s5288_s5  ;;  %3351 = vrot.lane.b32.xlu2 %v3321_v1, %s5288_s5 }
 0x9c4   : > { %5034 = vrot.lane.b32.xlu1 %v5033_v41, %s8672_s27  ;;  %s8696_s27 = smov 80  }
 0x9cb   : > { %3341 = vrot.lane.b32.xlu0 %v3321_v1, %s8661_s15  ;;  %3347 = vrot.lane.b32.xlu2 %v3318_v49, %s5288_s5 }
 0x9d3   : > { %3349 = vrot.lane.b32.xlu0 %v3319_v34, %s5288_s5  ;;  %s5300_s5 = smov 32  }
 0xa15   : > { %v3334_v46 = vpop.permute.xlu2 %3333 }
 0xa16   : > { %v3366_v12 = vsel %vm8677_vm11, %v3334_v46, 0.0 }
 0xa1d   : > { %v3352_v26 = vpop.permute.xlu2 %3351 }
 0xa25   : > { %v3332_v28 = vpop.permute.xlu1 %3331  ;;  %v3348_v3 = vpop.permute.xlu2 %3347 }
 0xa26   : > { %v3365_v6 = vsel %vm8681_vm2, %v3332_v28, 0.0 }
 0xa2d   : > { %v3340_v15 = vpop.permute.xlu1 %3339 }
 0xa35   : > { %v3354_v4 = vpop.permute.xlu0 %3353 }
 0xa36   : > { %v5035_v47 = vpop.permute.xlu1 %5034  ;;  %v3356_v62 = vsel %vm2450_vm8, %v3352_v26, %v3354_v4 }
 0xa37   : > { %v5037_v31 = vunpack.i.h.bf16 %v5035_v47  ;;  %v5036_v24 = vunpack.i.l.bf16 %v5035_v47 }
 0xa39   : > { %v3359_v42 = vsel %vm2606_vm13, 0.0, %v5037_v31  ;;  %v3360_v50 = vsel %vm2606_vm13, 0.0, %v5036_v24  ;;  %vm3367_vm13 = vcmask 195584  }
 0xa3a   : > { %v3361_v9 = vsel %vm8673_vm5, %v3359_v42, 0.0  ;;  %v3362_v5 = vsel %vm8674_vm10, %v3360_v50, 0.0  ;;  %v3368_v32 = vsel %vm3367_vm13, %v3365_v6, %v3340_v15  ;;  %vm8684_vm5 = vmmov %vm8680_vm14  ;;  %vm3458_vm10 = vcmask 523264  }
 0xa3b   : > { %v7313_v0 = vsel %vm8675_vm4, %v3361_v9, %v3332_v28  ;;  %v7316_v13 = vsel %vm8676_vm12, %v3362_v5, %v3334_v46  ;;  %v3370_v58 = vsel %vm8682_vm3, %v3368_v32, 0.0  ;;  %vm8686_vm4 = vmmov %vm8679_vm6  ;;  %vm3689_vm3 = vcmask 785408  }
 0xa3c   : > { %3486 = vrot.lane.b32.xlu0 %v7313_v0, %s5299_s26  ;;  %v5063_v7 = vpack.i.bf16 %v7313_v0, %v7316_v13  ;;  %vm8687_vm12 = vmmov %vm8686_vm4 }
 0xa3d   : > { %v3342_v21 = vpop.permute.xlu0 %3341  ;;  %vm8688_vm11 = vmmov %vm8686_vm4 }
 0xa3e   : > { %v3369_v2 = vsel %vm3367_vm13, %v3366_v12, %v3342_v21  ;;  %5064 = vrot.lane.b32.xlu1 %v5063_v7, %s8477_s0 }
 0xa3f   : > { %v3371_v59 = vsel %vm8678_vm0, %v3369_v2, 0.0  ;;  %vm8690_vm0 = vcmask 916480  }
 0xa40   : > { %v7328_v37 = vsel %vm8679_vm6, %v3371_v59, %v3356_v62  ;;  %vm8691_vm6 = vmmov %vm8690_vm0 }
 0xa41   : > { %v3375_v53 = vsel %vm8680_vm14, %v7328_v37, 0.0  ;;  %vm8692_vm14 = vmmov %vm8690_vm0 }
 0xa42   : > { %v5073_v36 = vpack.i.bf16 %v3375_v53, %v8591_v16  ;;  %v5108_v14 = vpack.i.bf16 %v3375_v53, %v7316_v13  ;;  %vm8693_vm2 = vmmov %vm8690_vm0 }
 0xa44   : > { %3467 = vrot.lane.b32.xlu0 %v7313_v0, %s5300_s5 }
 0xa45   : > { %v3350_v30 = vpop.permute.xlu0 %3349 }
 0xa46   : > { %v3355_v43 = vsel %vm2450_vm8, %v3348_v3, %v3350_v30  ;;  %5074 = vrot.lane.b32.xlu1 %v5073_v36, %s5300_s5  ;;  %vm3477_vm8 = vcmask 261120  }
 0xa47   : > { %v7339_v52 = vsel %vm8683_vm9, %v3370_v58, %v3355_v43 }
 0xa48   : > { %v3374_v56 = vsel %vm8684_vm5, %v7339_v52, 0.0 }
 0xa49   : > { %v5043_v18 = vpack.i.bf16 %v7316_v13, %v3374_v56  ;;  %v5088_v25 = vpack.i.bf16 %v3374_v56, %v3375_v53  ;;  %v5113_v23 = vpack.i.bf16 %v3374_v56, %v7313_v0 }
 0xa4b   : > { %5044 = vrot.lane.b32.xlu2 %v5043_v18, %s5300_s5  ;;  %s4430_s5 = scalar_lea.hbm %s8385_s25, %s5456_s9 }
 0xa4c   : > { %5039 = vrot.lane.b32.xlu0 %v5043_v18, %s5299_s26 }
 0xa4e   : > { %5079 = vrot.lane.b32.xlu1 %v5073_v36, %s5301_s10 }
 0xa53   : > { %5049 = vrot.lane.b32.xlu2 %v5043_v18, %s5301_s10 }
 0xa54   : > { %3448 = vrot.lane.b32.xlu0 %v7313_v0, %s5301_s10  ;;  %s4422_s10 = scalar_lea.sflag [#allocation7], %s763_s11 }
 0xa56   : > { %5084 = vrot.lane.b32.xlu1 %v5073_v36, %s5302_s28 }
 0xa5b   : > { %5054 = vrot.lane.b32.xlu2 %v5073_v36, %s5299_s26 }
 0xa5c   : > { %5099 = vrot.lane.b32.xlu0 %v5073_v36, %s8685_s4 }
 0xa5e   : > { %5089 = vrot.lane.b32.xlu1 %v5088_v25, %s8477_s0  ;;  %s8479_s0 = smov 96  }
 0xa63   : > { %5059 = vrot.lane.b32.xlu2 %v5043_v18, %s5302_s28 }
 0xa64   : > { %5104 = vrot.lane.b32.xlu0 %v5088_v25, %s8661_s15 }
 0xa66   : > { %3396 = vrot.lane.b32.xlu1 %v7313_v0, %s8685_s4 }
 0xa6b   : > { %3430 = vrot.lane.b32.xlu2 %v7313_v0, %s5302_s28 }
 0xa6c   : > { %5109 = vrot.lane.b32.xlu0 %v5108_v14, %s5303_s3 }
 0xa6e   : > { %5114 = vrot.lane.b32.xlu1 %v5113_v23, %s5303_s3 }
 0xa73   : > { %5069 = vrot.lane.b32.xlu2 %v5043_v18, %s8685_s4 }
 0xa74   : > { %3530 = vperm.xlu0 %4655, %v3526_v17  }
 0xa76   : > { %3535 = vperm.xlu1 %4656, %v3527_v55  }
 0xa7b   : > { %5094 = vrot.lane.b32.xlu2 %v5063_v7, %s8661_s15 }
 0xa83   : > { %3508 = vrot.lane.b32.xlu2 %v8591_v16, %s5303_s3 }
 0xaa5   : > { %v5045_v63 = vpop.permute.xlu2 %5044 }
 0xaa6   : > { %v5047_v20 = vunpack.i.h.bf16 %v5045_v63  ;;  %v5046_v1 = vunpack.i.l.bf16 %v5045_v63 }
 0xaad   : > { %v5050_v44 = vpop.permute.xlu2 %5049 }
 0xaae   : > { %v3487_v48 = vpop.permute.xlu0 %3486  ;;  %v5052_v47 = vunpack.i.h.bf16 %v5050_v44  ;;  %v5051_v31 = vunpack.i.l.bf16 %v5050_v44 }
 0xab0   : > { %v7364_v33 = vpop.permute.xlu1 %5064 }
 0xab1   : > { %v5066_v30 = vunpack.i.l.bf16 %v7364_v33  ;;  %v5067_v56 = vunpack.i.h.bf16 %v7364_v33 }
 0xab5   : > { %v5055_v29 = vpop.permute.xlu2 %5054 }
 0xab6   : > { %v3468_v60 = vpop.permute.xlu0 %3467  ;;  %v5057_v22 = vunpack.i.h.bf16 %v5055_v29  ;;  %v5056_v8 = vunpack.i.l.bf16 %v5055_v29 }
 0xab7   : > { %v3478_v24 = vsel %vm3477_vm8, %v3468_v60, %v5046_v1 }
 0xab8   : > { %v5075_v61 = vpop.permute.xlu1 %5074  ;;  %v3499_v27 = vsel %vm3367_vm13, %v5057_v22, %v5056_v8 }
 0xab9   : > { %3590 = vmatpush.msrb.mxu3 %v3499_v27  ;;  %v5077_v11 = vunpack.i.h.bf16 %v5075_v61  ;;  %v5076_v49 = vunpack.i.l.bf16 %v5075_v61 }
 0xabb   : > { %v3481_v34 = vsel %vm3477_vm8, %v5077_v11, %v5076_v49  ;;  %v3480_v15 = vsel %vm3477_vm8, %v5047_v20, %v5077_v11  ;;  %v3479_v46 = vsel %vm3477_vm8, %v5046_v1, %v5076_v49 }
 0xabd   : > { %v5060_v54 = vpop.permute.xlu2 %5059 }
 0xabe   : > { %v5040_v38 = vpop.permute.xlu0 %5039  ;;  %v5062_v12 = vunpack.i.h.bf16 %v5060_v54  ;;  %v5061_v21 = vunpack.i.l.bf16 %v5060_v54 }
 0xabf   : > { %v5042_v39 = vunpack.i.h.bf16 %v5040_v38  ;;  %v5041_v51 = vunpack.i.l.bf16 %v5040_v38 }
 0xac0   : > { %v5080_v16 = vpop.permute.xlu1 %5079 }
 0xac1   : > { %v3498_v10 = vsel %vm3367_vm13, %v5042_v39, %v5057_v22  ;;  %v3497_v57 = vsel %vm3367_vm13, %v5041_v51, %v5056_v8  ;;  %v5082_v40 = vunpack.i.h.bf16 %v5080_v16  ;;  %v5081_v41 = vunpack.i.l.bf16 %v5080_v16 }
 0xac2   : > { %3544 = vmatpush.msrb.mxu1 %v3498_v10  ;;  %3591 = vmatpush.msrb.mxu3 %v3497_v57  ;;  %v3496_v19 = vsel %vm3367_vm13, %v3487_v48, %v5041_v51  ;;  %vm8689_vm13 = vmmov %vm8686_vm4 }
 0xac3   : > { %v3462_v42 = vsel %vm3458_vm10, %v5082_v40, %v5081_v41  ;;  %v3461_v26 = vsel %vm3458_vm10, %v5052_v47, %v5082_v40  ;;  %v3460_v7 = vsel %vm3458_vm10, %v5051_v31, %v5081_v41 }
 0xac4   : > { %3545 = vmatpush.msrb.mxu1 %v3496_v19  ;;  %3592 = vmatpush.msrb.mxu3 %v3481_v34 }
 0xac5   : > { %v3431_v28 = vpop.permute.xlu2 %3430 }
 0xac6   : > { %v3449_v4 = vpop.permute.xlu0 %3448  ;;  %3546 = vmatpush.msrb.mxu1 %v3480_v15  ;;  %3593 = vmatpush.msrb.mxu3 %v3479_v46  ;;  %v3440_v32 = vsel %vm8689_vm13, %v3431_v28, %v5061_v21  ;;  %v3523_v28 = vld [vmem:[%s8377_s16 + $0x8] sm:$0xff] }
 0xac7   : > { %v3459_v2 = vsel %vm3458_vm10, %v3449_v4, %v5051_v31 }
 0xac8   : > { %v5085_v50 = vpop.permute.xlu1 %5084  ;;  %3547 = vmatpush.msrb.mxu1 %v3478_v24  ;;  %3594 = vmatpush.msrb.mxu3 %v3462_v42 }
 0xac9   : > { %v5087_v9 = vunpack.i.h.bf16 %v5085_v50  ;;  %v5086_v5 = vunpack.i.l.bf16 %v5085_v50 }
 0xaca   : > { %3548 = vmatpush.msrb.mxu1 %v3461_v26  ;;  %3595 = vmatpush.msrb.mxu3 %v3460_v7  ;;  %v3846_v26 = vld [vmem:[%s8379_s19 + $0x1f8] sm:$0xff]  ;;  %v3797_v7 = vld [vmem:[%s8379_s19 + $0x70] sm:$0xff] }
 0xacb   : > { %v3443_v62 = vsel %vm8686_vm4, %v5087_v9, %v5086_v5  ;;  %v3442_v53 = vsel %vm8687_vm12, %v5062_v12, %v5087_v9  ;;  %v3441_v6 = vsel %vm8688_vm11, %v5061_v21, %v5086_v5  ;;  %v3798_v5 = vld [vmem:[%s8379_s19 + $0x78] sm:$0xff] }
 0xacc   : > { %3549 = vmatpush.msrb.mxu1 %v3459_v2  ;;  %3596 = vmatpush.msrb.mxu3 %v3443_v62  ;;  %v3845_v2 = vld [vmem:[%s8379_s19 + $0x1f0] sm:$0xff]  ;;  %v3796_v62 = vld [vmem:[%s8379_s19 + $0x68] sm:$0xff] }
 0xacd   : > { %v5070_v59 = vpop.permute.xlu2 %5069 }
 0xace   : > { %v5100_v36 = vpop.permute.xlu0 %5099  ;;  %3550 = vmatpush.msrb.mxu1 %v3442_v53  ;;  %3597 = vmatpush.msrb.mxu3 %v3441_v6  ;;  %v5072_v18 = vunpack.i.h.bf16 %v5070_v59  ;;  %v5071_v55 = vunpack.i.l.bf16 %v5070_v59 }
 0xacf   : > { %v5102_v25 = vunpack.i.h.bf16 %v5100_v36  ;;  %v5101_v14 = vunpack.i.l.bf16 %v5100_v36  ;;  %v3844_v36 = vld [vmem:[%s8379_s19 + $0x1e8] sm:$0xff] }
 0xad0   : > { %v5090_v3 = vpop.permute.xlu1 %5089  ;;  %3551 = vmatpush.msrb.mxu1 %v3440_v32  ;;  %v3814_v32 = vld [vmem:[%s8379_s19 + $0xf8] sm:$0xff] }
 0xad1   : > { %v5092_v58 = vunpack.i.h.bf16 %v5090_v3  ;;  %v5091_v43 = vunpack.i.l.bf16 %v5090_v3  ;;  %v3408_v22 = vsel %vm8690_vm0, %v5072_v18, %v5102_v25  ;;  %v3409_v8 = vsel %vm8691_vm6, %v5102_v25, %v5101_v14  ;;  %v3830_v3 = vld [vmem:[%s8379_s19 + $0x178] sm:$0xff] }
 0xad2   : > { %v3407_v11 = vsel %vm8693_vm2, %v5071_v55, %v5101_v14  ;;  %v3795_v14 = vld [vmem:[%s8379_s19 + $0x60] sm:$0xff] }
 0xad3   : > { %v3424_v23 = vsel %vm2929_vm1, %v5066_v30, %v5091_v43  ;;  %v3425_v17 = vsel %vm2929_vm1, %v5091_v43, %v7177_v35  ;;  %v3422_v44 = vsel %vm2929_vm1, %v5067_v56, %v5092_v58  ;;  %v3423_v48 = vsel %vm2929_vm1, %v5092_v58, %v7177_v35  ;;  %vm8694_vm1 = vmmov %vm8684_vm5  ;;  %v3813_v43 = vld [vmem:[%s8379_s19 + $0xf0] sm:$0xff] }
 0xad4   : > { %3552 = vmatpush.msrb.mxu1 %v3424_v23  ;;  %3598 = vmatpush.msrb.mxu3 %v3425_v17 }
 0xad5   : > { %v5095_v63 = vpop.permute.xlu2 %5094 }
 0xad6   : > { %v5105_v29 = vpop.permute.xlu0 %5104  ;;  %3553 = vmatpush.msrb.mxu1 %v3422_v44  ;;  %3599 = vmatpush.msrb.mxu3 %v3423_v48  ;;  %v5096_v33 = vunpack.i.l.bf16 %v5095_v63  ;;  %v5097_v27 = vunpack.i.h.bf16 %v5095_v63  ;;  %v3829_v63 = vld [vmem:[%s8379_s19 + $0x170] sm:$0xff]  ;;  %v3794_v48 = vld [vmem:[%s8379_s19 + $0x58] sm:$0xff] }
 0xad7   : > { %v5106_v60 = vunpack.i.l.bf16 %v5105_v29  ;;  %v5107_v54 = vunpack.i.h.bf16 %v5105_v29  ;;  %v3812_v29 = vld [vmem:[%s8379_s19 + $0xe8] sm:$0xff] }
 0xad8   : > { %v3397_v61 = vpop.permute.xlu1 %3396  ;;  %3554 = vmatpush.msrb.mxu1 %v3408_v22  ;;  %3600 = vmatpush.msrb.mxu3 %v3409_v8  ;;  %v3842_v22 = vld [vmem:[%s8379_s19 + $0x1d8] sm:$0xff]  ;;  %v3828_v8 = vld [vmem:[%s8379_s19 + $0x168] sm:$0xff] }
 0xad9   : > { %v3406_v38 = vsel %vm8692_vm14, %v3397_v61, %v5071_v55  ;;  %v3390_v35 = vsel %vm2883_vm15, %v5096_v33, %v5106_v60  ;;  %v3391_v49 = vsel %vm2883_vm15, %v5106_v60, %v7197_v45  ;;  %v3388_v39 = vsel %vm2883_vm15, %v5097_v27, %v5107_v54  ;;  %v3843_v55 = vld [vmem:[%s8379_s19 + $0x1e0] sm:$0xff] }
 0xada   : > { %3555 = vmatpush.msrb.mxu1 %v3406_v38  ;;  %3601 = vmatpush.msrb.mxu3 %v3407_v11  ;;  %v3389_v51 = vsel %vm2883_vm15, %v5107_v54, %v7197_v45  ;;  %v3522_v45 = vld [vmem:[%s8377_s16] sm:$0xff]  ;;  %vm8695_vm15 = vmmov %vm8694_vm1  ;;  %v3793_v11 = vld [vmem:[%s8379_s19 + $0x50] sm:$0xff] }
 0xadc   : > { %3556 = vmatpush.msrb.mxu1 %v3390_v35  ;;  %3602 = vmatpush.msrb.mxu3 %v3391_v49  ;;  %v3811_v35 = vld [vmem:[%s8379_s19 + $0xe0] sm:$0xff]  ;;  %v3841_v49 = vld [vmem:[%s8379_s19 + $0x1d0] sm:$0xff] }
 0xadd   : > { %v3509_v10 = vpop.permute.xlu2 %3508 }
 0xade   : > { %v5110_v16 = vpop.permute.xlu0 %5109  ;;  %3557 = vmatpush.msrb.mxu1 %v3388_v39  ;;  %3603 = vmatpush.msrb.mxu3 %v3389_v51  ;;  %v3792_v39 = vld [vmem:[%s8379_s19 + $0x48] sm:$0xff]  ;;  %v3827_v51 = vld [vmem:[%s8379_s19 + $0x160] sm:$0xff] }
 0xadf   : > { %v5112_v57 = vunpack.i.h.bf16 %v5110_v16  ;;  %v5111_v20 = vunpack.i.l.bf16 %v5110_v16 }
 0xae0   : > { %v5115_v1 = vpop.permute.xlu1 %5114  ;;  %3558 = vmatpush.msrb.mxu1 %v7316_v13  ;;  %4536 = vmatpush.msk.msrb.mxu3 %vm8694_vm1, %v7328_v37 }
 0xae1   : > { %v5117_v40 = vunpack.i.h.bf16 %v5115_v1  ;;  %v5116_v41 = vunpack.i.l.bf16 %v5115_v1  ;;  %v3517_v19 = vsel %vm2442_vm7, %v5112_v57, %v3509_v10  ;;  %v3516_v34 = vsel %vm2442_vm7, %v5111_v20, %v5112_v57  ;;  %v3840_v1 = vld [vmem:[%s8379_s19 + $0x1c8] sm:$0xff] }
 0xae2   : > { %3559 = vmatpush.msrb.mxu1 %v7313_v0  ;;  %3581 = vmatpush.msrb.mxu2 %v3516_v34  ;;  %v3524_v0 = vld [vmem:[%s8377_s16 + $0x10] sm:$0xff]  ;;  %v3826_v34 = vld [vmem:[%s8379_s19 + $0x158] sm:$0xff] }
 0xae3   : > { %4537 = vmatpush.msk.msrb.mxu3 %vm8695_vm15, %v7339_v52  ;;  %3627 = vmatpush.msra.mxu0 %v3517_v19  ;;  %v3514_v13 = vsel %vm2442_vm7, %v5116_v41, %v5117_v40  ;;  %v3515_v37 = vsel %vm2442_vm7, %v5117_v40, %v3509_v10  ;;  %v3525_v52 = vld [vmem:[%s8377_s16 + $0x18] sm:$0xff]  ;;  %v3791_v40 = vld [vmem:[%s8379_s19 + $0x40] sm:$0xff] }
 0xae4   : > { %3560 = vmatmul.f32.vlgmr.msrb.gmra.mxu1 %v3522_v45  ;;  %3606 = vmatmul.f32.vlgmr.msrb.gmra.mxu3 %v3522_v45  ;;  %v3810_v41 = vld [vmem:[%s8379_s19 + $0xd8] sm:$0xff]  ;;  %v3839_v19 = vld [vmem:[%s8379_s19 + $0x1c0] sm:$0xff] }
 0xae5   : > { %3582 = vmatpush.msrb.mxu2 %v3514_v13  ;;  %3628 = vmatpush.msra.mxu0 %v3515_v37  ;;  %v3790_v45 = vld [vmem:[%s8379_s19 + $0x38] sm:$0xff]  ;;  %v3809_v13 = vld [vmem:[%s8379_s19 + $0xd0] sm:$0xff] }
 0xae6   : > { %4534 = vmatmul.msk.f32.vlgmr.msrb.gmra.mxu2 %vm2442_vm7, %v3523_v28  ;;  %4538 = vmatmul.msk.f32.vlgmr.msra.gmra.mxu0 %vm2442_vm7, %v3523_v28  ;;  %v3531_v46 = vpop.permute.xlu0 %3530 }
 0xae7   : > { %4040 = vmatpush.msra.mxu2 %v3798_v5  ;;  %4100 = vmatpush.msra.mxu3 %v3846_v26  ;;  %v3787_v5 = vld [vmem:[%s8379_s19 + $0x20] sm:$0xff] }
 0xae8   : > { %v3536_v59 = vpop.permute.xlu1 %3535  ;;  %4060 = vmatpush.msra.mxu1 %v3814_v32  ;;  %4080 = vmatpush.msrb.mxu0 %v3830_v3  ;;  %v3823_v26 = vld [vmem:[%s8379_s19 + $0x140] sm:$0xff]  ;;  %v3822_v32 = vld [vmem:[%s8379_s19 + $0x138] sm:$0xff] }
 0xae9   : > { %4041 = vmatpush.msra.mxu2 %v3797_v7  ;;  %4101 = vmatpush.msra.mxu3 %v3845_v2  ;;  %v3835_v7 = vld [vmem:[%s8379_s19 + $0x1a0] sm:$0xff]  ;;  %v3834_v3 = vld [vmem:[%s8379_s19 + $0x198] sm:$0xff] }
 0xaea   : > { %4061 = vmatpush.msra.mxu1 %v3813_v43  ;;  %4081 = vmatpush.msrb.mxu0 %v3829_v63  ;;  %v3821_v43 = vld [vmem:[%s8379_s19 + $0x130] sm:$0xff]  ;;  %v3783_v63 = vld [vmem:[%s8379_s19] sm:$0xff] }
 0xaeb   : > { %4042 = vmatpush.msra.mxu2 %v3796_v62  ;;  %4102 = vmatpush.msra.mxu3 %v3844_v36  ;;  %v3786_v36 = vld [vmem:[%s8379_s19 + $0x18] sm:$0xff] }
 0xaec   : > { %3563 = vmatmul.f32.gmra.mxu1 %v3524_v0  ;;  %3609 = vmatmul.f32.gmra.mxu3 %v3524_v0  ;;  %v3838_v0 = vld [vmem:[%s8379_s19 + $0x1b8] sm:$0xff] }
 0xaed   : > { %4043 = vmatpush.msra.mxu2 %v3795_v14  ;;  %4103 = vmatpush.msra.mxu3 %v3843_v55  ;;  %v3784_v14 = vld [vmem:[%s8379_s19 + $0x8] sm:$0xff] }
 0xaee   : > { %4535 = vmatmul.msk.f32.gmra.mxu2 %vm2442_vm7, %v3525_v52  ;;  %4539 = vmatmul.msk.f32.gmra.mxu0 %vm2442_vm7, %v3525_v52  ;;  %v3825_v52 = vld [vmem:[%s8379_s19 + $0x150] sm:$0xff]  ;;  %v3832_v55 = vld [vmem:[%s8379_s19 + $0x188] sm:$0xff] }
 0xaef   : > { %4044 = vmatpush.msra.mxu2 %v3794_v48  ;;  %4062 = vmatpush.msra.mxu1 %v3812_v29  ;;  %v3819_v48 = vld [vmem:[%s8379_s19 + $0x120] sm:$0xff] }
 0xaf0   : > { %4104 = vmatpush.msra.mxu3 %v3842_v22  ;;  %4082 = vmatpush.msrb.mxu0 %v3828_v8  ;;  %v3831_v29 = vld [vmem:[%s8379_s19 + $0x180] sm:$0xff]  ;;  %v3802_v22 = vld [vmem:[%s8379_s19 + $0x98] sm:$0xff] }
 0xaf1   : > { %4045 = vmatpush.msra.mxu2 %v3793_v11  ;;  %4063 = vmatpush.msra.mxu1 %v3811_v35  ;;  %v3818_v8 = vld [vmem:[%s8379_s19 + $0x118] sm:$0xff]  ;;  %v3801_v11 = vld [vmem:[%s8379_s19 + $0x90] sm:$0xff] }
 0xaf2   : > { %4105 = vmatpush.msra.mxu3 %v3841_v49  ;;  %4083 = vmatpush.msrb.mxu0 %v3827_v51  ;;  %v3817_v35 = vld [vmem:[%s8379_s19 + $0x110] sm:$0xff]  ;;  %v3860_v49 = vld [vmem:[%s8379_s19 + $0x268] sm:$0xff] }
 0xaf3   : > { %4046 = vmatpush.msra.mxu2 %v3792_v39  ;;  %4064 = vmatpush.msra.mxu1 %v3810_v41  ;;  %v3908_v39 = vld [vmem:[%s8379_s19 + $0x3e8] sm:$0xff]  ;;  %v3858_v41 = vld [vmem:[%s8379_s19 + $0x258] sm:$0xff] }
 0xaf4   : > { %4106 = vmatpush.msra.mxu3 %v3840_v1  ;;  %4084 = vmatpush.msrb.mxu0 %v3826_v34  ;;  %v3800_v51 = vld [vmem:[%s8379_s19 + $0x88] sm:$0xff]  ;;  %v3799_v1 = vld [vmem:[%s8379_s19 + $0x80] sm:$0xff]  ;;  %v3894_v34 = vld [vmem:[%s8379_s19 + $0x378] sm:$0xff] }
 0xaf5   : > { %4047 = vmatpush.msra.mxu2 %v3791_v40  ;;  %4065 = vmatpush.msra.mxu1 %v3809_v13  ;;  %v3815_v40 = vld [vmem:[%s8379_s19 + $0x100] sm:$0xff]  ;;  %v3857_v13 = vld [vmem:[%s8379_s19 + $0x250] sm:$0xff] }
 0xaf6   : > { %4107 = vmatpush.msra.mxu3 %v3839_v19  ;;  %4085 = vmatpush.msrb.mxu0 %v3825_v52  ;;  %v3878_v19 = vld [vmem:[%s8379_s19 + $0x2f8] sm:$0xff]  ;;  %v3905_v52 = vld [vmem:[%s8379_s19 + $0x3d0] sm:$0xff] }
 0xaf7   : > { %4048 = vmatpush.msra.mxu2 %v3790_v45  ;;  %v3906_v45 = vld [vmem:[%s8379_s19 + $0x3d8] sm:$0xff] }
 0xaf8   : > { %4108 = vmatpush.msra.mxu3 %v3838_v0  ;;  %v3893_v0 = vld [vmem:[%s8379_s19 + $0x370] sm:$0xff] }
 0xb61   : > { %v3561_v15 = vpop.f32.mrf.mxu1 }
 0xb62   : > { %v3562_v31 = vadd.f32 %v3561_v15, %v3531_v46  ;;  %v3789_v15 = vld [vmem:[%s8379_s19 + $0x30] sm:$0xff] }
 0xb63   : > { %v3630_v47 = vpop.f32.mrf.mxu0  ;;  %4049 = vmatpush.msra.mxu2 %v3789_v15  ;;  %v3856_v15 = vld [vmem:[%s8379_s19 + $0x248] sm:$0xff] }
 0xb67   : > { %v3607_v4 = vpop.f32.mrf.mxu3 }
 0xb68   : > { %v3608_v24 = vadd.f32 %v3607_v4, %v3531_v46  ;;  %v3808_v46 = vld [vmem:[%s8379_s19 + $0xc8] sm:$0xff]  ;;  %v3837_v4 = vld [vmem:[%s8379_s19 + $0x1b0] sm:$0xff] }
 0xb69   : > { %v3584_v42 = vpop.f32.mrf.mxu2  ;;  %v3564_v30 = vpop.f32.mrf.mxu1  ;;  %4066 = vmatpush.msra.mxu1 %v3808_v46  ;;  %4109 = vmatpush.msra.mxu3 %v3837_v4  ;;  %v3876_v46 = vld [vmem:[%s8379_s19 + $0x2e8] sm:$0xff] }
 0xb6a   : > { %v3585_v50 = vadd.f32 %v3584_v42, %v3562_v31  ;;  %v3631_v9 = vadd.f32 %v3630_v47, %v3608_v24  ;;  %v3565_v44 = vadd.f32 %v3564_v30, %v3536_v59  ;;  %v3824_v47 = vld [vmem:[%s8379_s19 + $0x148] sm:$0xff]  ;;  %v3805_v30 = vld [vmem:[%s8379_s19 + $0xb0] sm:$0xff] }
 0xb6b   : > { %v3633_v17 = vpop.f32.mrf.mxu0  ;;  %v3788_v42 = vld [vmem:[%s8379_s19 + $0x28] sm:$0xff]  ;;  %4086 = vmatpush.msrb.mxu0 %v3824_v47 }
 0xb6c   : > { %v7435_v12 = vmax.f32 %v3585_v50, 0.0  ;;  %v3637_v21 = vmax.f32 %v3631_v9, 0.0  ;;  %v3836_v50 = vld [vmem:[%s8379_s19 + $0x1a8] sm:$0xff]  ;;  %v3807_v9 = vld [vmem:[%s8379_s19 + $0xc0] sm:$0xff]  ;;  %4050 = vmatpush.msra.mxu2 %v3788_v42 }
 0xb6d   : > { %4110 = vmatpush.msra.mxu3 %v3836_v50  ;;  %4067 = vmatpush.msra.mxu1 %v3807_v9  ;;  %v3892_v4 = vld [vmem:[%s8379_s19 + $0x368] sm:$0xff]  ;;  %v3891_v42 = vld [vmem:[%s8379_s19 + $0x360] sm:$0xff]  ;;  %v3854_v9 = vld [vmem:[%s8379_s19 + $0x238] sm:$0xff] }
 0xb6e   : > { %v3683_v53 = vrot.slane %v3637_v21, 3  ;;  %v3675_v6 = vrot.slane %v7435_v12, 3  ;;  %v3659_v33 = vrot.slane %v3637_v21, 1  ;;  %v3671_v60 = vrot.slane %v3637_v21, 2  ;;  %4051 = vmatpush.msra.mxu2 %v3787_v5  ;;  %4087 = vmatpush.msrb.mxu0 %v3823_v26  ;;  %v3904_v47 = vld [vmem:[%s8379_s19 + $0x3c8] sm:$0xff]  ;;  %v3903_v50 = vld [vmem:[%s8379_s19 + $0x3c0] sm:$0xff] }
 0xb6f   : > { %v3610_v58 = vpop.f32.mrf.mxu3  ;;  %v3651_v54 = vrot.slane %v7435_v12, 1  ;;  %v3663_v38 = vrot.slane %v7435_v12, 2  ;;  %4111 = vmatpush.msra.mxu3 %v3835_v7  ;;  %v3874_v5 = vld [vmem:[%s8379_s19 + $0x2d8] sm:$0xff] }
 0xb70   : > { %v3611_v56 = vadd.f32 %v3610_v58, %v3536_v59  ;;  %v5138_v18 = vpack.i.bf16 %v3683_v53, %v3637_v21  ;;  %v5123_v25 = vpack.i.bf16 %v3675_v6, %v7435_v12  ;;  %v5143_v57 = vpack.i.bf16 %v3671_v60, %v3659_v33  ;;  %v3806_v21 = vld [vmem:[%s8379_s19 + $0xb8] sm:$0xff]  ;;  %v3785_v58 = vld [vmem:[%s8379_s19 + $0x10] sm:$0xff]  ;;  %4052 = vmatpush.msra.mxu2 %v3786_v36 }
 0xb71   : > { %v3587_v23 = vpop.f32.mrf.mxu2  ;;  %v5133_v20 = vpack.i.bf16 %v3663_v38, %v3651_v54  ;;  %4068 = vmatpush.msra.mxu1 %v3806_v21  ;;  %4088 = vmatpush.msrb.mxu0 %v3822_v32  ;;  %v3862_v33 = vld [vmem:[%s8379_s19 + $0x278] sm:$0xff]  ;;  %v3853_v21 = vld [vmem:[%s8379_s19 + $0x230] sm:$0xff]  ;;  %v3852_v32 = vld [vmem:[%s8379_s19 + $0x228] sm:$0xff] }
 0xb72   : > { %5139 = vrot.lane.b32.xlu1 %v5138_v18, %s8696_s27  ;;  %5124 = vrot.lane.b32.xlu0 %v5123_v25, %s8479_s0  ;;  %v3588_v61 = vadd.f32 %v3587_v23, %v3565_v44  ;;  %v3634_v27 = vadd.f32 %v3633_v17, %v3611_v56  ;;  %v3804_v23 = vld [vmem:[%s8379_s19 + $0xa8] sm:$0xff]  ;;  %v3803_v44 = vld [vmem:[%s8379_s19 + $0xa0] sm:$0xff]  ;;  %s4434_s0 = sshll.u32 %s4430_s5, 4  ;;  %s4435_s0 = int_to_ptr.hbm [resolvable:$true] %s4434_s0 }
 0xb73   : > { %5119 = vrot.lane.b32.xlu2 %v5123_v25, %s8685_s4  ;;  %4112 = vmatpush.msra.mxu3 %v3834_v3  ;;  %v3833_v25 = vld [vmem:[%s8379_s19 + $0x190] sm:$0xff]  ;;  %v3820_v17 = vld [vmem:[%s8379_s19 + $0x128] sm:$0xff]  ;;  %v3910_v60 = vld [vmem:[%s8379_s19 + $0x3f8] sm:$0xff]  ;;  %s5192_s28 = sshra.s32 %s4435_s0, 4  ;;  %s5193_s28 = int_to_ptr.hbm [resolvable:$true] %s5192_s28 }
 0xb74   : > { %v7500_v16 = vmax.f32 %v3588_v61, 0.0  ;;  %v7502_v10 = vmax.f32 %v3634_v27, 0.0  ;;  %4069 = vmatpush.msra.mxu1 %v3805_v30  ;;  %4053 = vmatpush.msra.mxu2 %v3785_v58  ;;  %v3861_v61 = vld [vmem:[%s8379_s19 + $0x270] sm:$0xff]  ;;  %v3890_v26 = vld [vmem:[%s8379_s19 + $0x358] sm:$0xff]  ;;  %v3872_v3 = vld [vmem:[%s8379_s19 + $0x2c8] sm:$0xff]  ;;  %s5194_s3 = scalar_lea.hbm %s5193_s28, 1  ;;  %p5199_p0 = scmp.lt.s32.totalorder %s5193_s28, %s8385_s25 }
 0xb75   : > { %4089 = vmatpush.msrb.mxu0 %v3821_v43  ;;  %4113 = vmatpush.msra.mxu3 %v3833_v25  ;;  %v3909_v27 = vld [vmem:[%s8379_s19 + $0x3f0] sm:$0xff]  ;;  %v3902_v7 = vld [vmem:[%s8379_s19 + $0x3b8] sm:$0xff]  ;;  %v3888_v30 = vld [vmem:[%s8379_s19 + $0x348] sm:$0xff]  ;;  %p5195_p11 = scmp.ne.s32.totalorder %s5193_s28, %s5194_s3 }
 0xb76   : > { %v3743_v37 = vrot.slane %v7502_v10, 3  ;;  %v3735_v28 = vrot.slane %v7500_v16, 3  ;;  %v3719_v2 = vrot.slane %v7502_v10, 1  ;;  %v3731_v62 = vrot.slane %v7502_v10, 2  ;;  %4054 = vmatpush.msra.mxu2 %v3784_v14  ;;  %4070 = vmatpush.msra.mxu1 %v3804_v23  ;;  %v3901_v36 = vld [vmem:[%s8379_s19 + $0x3b0] sm:$0xff]  ;;  %v3900_v58 = vld [vmem:[%s8379_s19 + $0x3a8] sm:$0xff] }
 0xb77   : > { %v3711_v59 = vrot.slane %v7500_v16, 1  ;;  %v3723_v53 = vrot.slane %v7500_v16, 2  ;;  %4090 = vmatpush.msrb.mxu0 %v3820_v17  ;;  %4114 = vmatpush.msra.mxu3 %v3832_v55  ;;  %v3851_v43 = vld [vmem:[%s8379_s19 + $0x220] sm:$0xff]  ;;  %v3850_v14 = vld [vmem:[%s8379_s19 + $0x218] sm:$0xff]  ;;  %p5196_p12 = pnand %p5195_p11, %p5473_p5 }
 0xb78   : > { %v5158_v31 = vpack.i.bf16 %v3743_v37, %v7502_v10  ;;  %v5153_v24 = vpack.i.bf16 %v3735_v28, %v7500_v16  ;;  %v5173_v56 = vpack.i.bf16 %v3731_v62, %v3719_v2  ;;  %4055 = vmatpush.msra.mxu2 %v3783_v63  ;;  %4071 = vmatpush.msra.mxu1 %v3803_v44  ;;  %v3816_v10 = vld [vmem:[%s8379_s19 + $0x108] sm:$0xff]  ;;  %v3877_v37 = vld [vmem:[%s8379_s19 + $0x2f0] sm:$0xff]  ;;  %v3899_v25 = vld [vmem:[%s8379_s19 + $0x3a0] sm:$0xff] }
 0xb79   : > { %v5168_v18 = vpack.i.bf16 %v3723_v53, %v3711_v59  ;;  %4091 = vmatpush.msrb.mxu0 %v3819_v48  ;;  %4115 = vmatpush.msra.mxu3 %v3831_v29  ;;  %v3873_v2 = vld [vmem:[%s8379_s19 + $0x2d0] sm:$0xff]  ;;  %v3870_v23 = vld [vmem:[%s8379_s19 + $0x2b8] sm:$0xff]  ;;  %p5197_p13 = pneg %p5196_p12 }
 0xb7a   : > { %5144 = vrot.lane.b32.xlu1 %v5143_v57, %s8696_s27  ;;  %5134 = vrot.lane.b32.xlu0 %v5133_v20, %s8697_s7  ;;  %v3859_v57 = vld [vmem:[%s8379_s19 + $0x260] sm:$0xff]  ;;  %v3889_v62 = vld [vmem:[%s8379_s19 + $0x350] sm:$0xff] }
 0xb7b   : > { %5129 = vrot.lane.b32.xlu2 %v5133_v20, %s8685_s4  ;;  %4120 = vmatpush.msrb.mxu2 %v3862_v33  ;;  %v3907_v20 = vld [vmem:[%s8379_s19 + $0x3e0] sm:$0xff]  ;;  %v3886_v17 = vld [vmem:[%s8379_s19 + $0x338] sm:$0xff]  ;;  %v3849_v63 = vld [vmem:[%s8379_s19 + $0x210] sm:$0xff] }
 0xb7c   : > { %4180 = vmatpush.msrb.mxu3 %v3910_v60  ;;  %4072 = vmatpush.msra.mxu1 %v3802_v22  ;;  %v3898_v55 = vld [vmem:[%s8379_s19 + $0x398] sm:$0xff]  ;;  %v3869_v44 = vld [vmem:[%s8379_s19 + $0x2b0] sm:$0xff]  ;;  %v3848_v33 = vld [vmem:[%s8379_s19 + $0x208] sm:$0xff] }
 0xb7d   : > { %4092 = vmatpush.msrb.mxu0 %v3818_v8  ;;  %4121 = vmatpush.msrb.mxu2 %v3861_v61  ;;  %v3885_v48 = vld [vmem:[%s8379_s19 + $0x330] sm:$0xff]  ;;  %v3868_v60 = vld [vmem:[%s8379_s19 + $0x2a8] sm:$0xff]  ;;  %v3847_v61 = vld [vmem:[%s8379_s19 + $0x200] sm:$0xff] }
 0xb7e   : > { %4181 = vmatpush.msrb.mxu3 %v3909_v27  ;;  %4073 = vmatpush.msra.mxu1 %v3801_v11  ;;  %v3897_v29 = vld [vmem:[%s8379_s19 + $0x390] sm:$0xff]  ;;  %v3884_v22 = vld [vmem:[%s8379_s19 + $0x328] sm:$0xff]  ;;  %v3867_v27 = vld [vmem:[%s8379_s19 + $0x2a0] sm:$0xff] }
 0xb7f   : > { %4093 = vmatpush.msrb.mxu0 %v3817_v35  ;;  %4122 = vmatpush.msrb.mxu2 %v3860_v49  ;;  %v3896_v8 = vld [vmem:[%s8379_s19 + $0x388] sm:$0xff]  ;;  %v3883_v11 = vld [vmem:[%s8379_s19 + $0x320] sm:$0xff]  ;;  %v3866_v49 = vld [vmem:[%s8379_s19 + $0x298] sm:$0xff] }
 0xb80   : > { %4182 = vmatpush.msrb.mxu3 %v3908_v39  ;;  %4074 = vmatpush.msra.mxu1 %v3800_v51  ;;  %v3895_v35 = vld [vmem:[%s8379_s19 + $0x380] sm:$0xff]  ;;  %v3882_v39 = vld [vmem:[%s8379_s19 + $0x318] sm:$0xff]  ;;  %v3865_v51 = vld [vmem:[%s8379_s19 + $0x290] sm:$0xff] }
 0xb81   : > { %4094 = vmatpush.msrb.mxu0 %v3816_v10  ;;  %4123 = vmatpush.msrb.mxu2 %v3859_v57  ;;  %v3881_v10 = vld [vmem:[%s8379_s19 + $0x310] sm:$0xff]  ;;  %v3864_v57 = vld [vmem:[%s8379_s19 + $0x288] sm:$0xff] }
 0xb82   : > { %5159 = vrot.lane.b32.xlu1 %v5158_v31, %s8696_s27  ;;  %5154 = vrot.lane.b32.xlu0 %v5153_v24, %s8697_s7  ;;  %v3855_v31 = vld [vmem:[%s8379_s19 + $0x240] sm:$0xff] }
 0xb83   : > { %5149 = vrot.lane.b32.xlu2 %v5153_v24, %s8685_s4  ;;  %4183 = vmatpush.msrb.mxu3 %v3907_v20  ;;  %v3875_v24 = vld [vmem:[%s8379_s19 + $0x2e0] sm:$0xff]  ;;  %v3880_v20 = vld [vmem:[%s8379_s19 + $0x308] sm:$0xff] }
 0xb84   : > { %4075 = vmatpush.msra.mxu1 %v3799_v1  ;;  %4095 = vmatpush.msrb.mxu0 %v3815_v40  ;;  %v3863_v1 = vld [vmem:[%s8379_s19 + $0x280] sm:$0xff] }
 0xb85   : > { %4124 = vmatpush.msrb.mxu2 %v3858_v41  ;;  %4184 = vmatpush.msrb.mxu3 %v3906_v45  ;;  %v3879_v40 = vld [vmem:[%s8379_s19 + $0x300] sm:$0xff] }
 0xb86   : > { %4140 = vmatpush.msrb.mxu1 %v3878_v19  ;;  %4160 = vmatpush.msra.mxu0 %v3894_v34 }
 0xb87   : > { %4125 = vmatpush.msrb.mxu2 %v3857_v13  ;;  %4185 = vmatpush.msrb.mxu3 %v3905_v52 }
 0xb88   : > { %4141 = vmatpush.msrb.mxu1 %v3877_v37  ;;  %4161 = vmatpush.msra.mxu0 %v3893_v0 }
 0xb89   : > { %4126 = vmatpush.msrb.mxu2 %v3856_v15  ;;  %4186 = vmatpush.msrb.mxu3 %v3904_v47 }
 0xb8a   : > { %5174 = vrot.lane.b32.xlu1 %v5173_v56, %s8696_s27  ;;  %5169 = vrot.lane.b32.xlu0 %v5168_v18, %s8697_s7  ;;  %v3871_v56 = vld [vmem:[%s8379_s19 + $0x2c0] sm:$0xff]  ;;  %s5198_s27 = scalar_lea.hbm %s8385_s25, 2 }
 0xb8b   : > { %5164 = vrot.lane.b32.xlu2 %v5168_v18, %s8685_s4  ;;  %4142 = vmatpush.msrb.mxu1 %v3876_v46  ;;  %v3887_v18 = vld [vmem:[%s8379_s19 + $0x340] sm:$0xff]  ;;  %p5200_p1 = scmp.lt.s32.totalorder %s5198_s27, %s5194_s3 }
 0xb8c   : > { %4162 = vmatpush.msra.mxu0 %v3892_v4  ;;  %4127 = vmatpush.msrb.mxu2 %v3855_v31 }
 0xb8d   : > { %4143 = vmatpush.msrb.mxu1 %v3875_v24  ;;  %4187 = vmatpush.msrb.mxu3 %v3903_v50  ;;  %v3974_v50 = vld [vmem:[%s8379_s19 + $0x5f8] sm:$0xff]  ;;  %p5201_p2 = por %p5200_p1, %p5199_p0 }
 0xb8e   : > { %4163 = vmatpush.msra.mxu0 %v3891_v42  ;;  %4128 = vmatpush.msrb.mxu2 %v3854_v9  ;;  %v3926_v42 = vld [vmem:[%s8379_s19 + $0x478] sm:$0xff] }
 0xb8f   : > { %4144 = vmatpush.msrb.mxu1 %v3874_v5  ;;  %4188 = vmatpush.msrb.mxu3 %v3902_v7  ;;  %v3925_v5 = vld [vmem:[%s8379_s19 + $0x470] sm:$0xff]  ;;  %p5202_p3 = pnand %p5201_p2, %p5197_p13 }
 0xb90   : > { %4164 = vmatpush.msra.mxu0 %v3890_v26  ;;  %4129 = vmatpush.msrb.mxu2 %v3853_v21  ;;  %v3973_v26 = vld [vmem:[%s8379_s19 + $0x5f0] sm:$0xff] }
 0xb91   : > { %4145 = vmatpush.msrb.mxu1 %v3873_v2  ;;  %4189 = vmatpush.msrb.mxu3 %v3901_v36  ;;  %v3924_v2 = vld [vmem:[%s8379_s19 + $0x468] sm:$0xff] }
 0xb92   : > { %4165 = vmatpush.msra.mxu0 %v3889_v62  ;;  %4130 = vmatpush.msrb.mxu2 %v3852_v32  ;;  %v3972_v62 = vld [vmem:[%s8379_s19 + $0x5e8] sm:$0xff] }
 0xb93   : > { %4146 = vmatpush.msrb.mxu1 %v3872_v3  ;;  %4190 = vmatpush.msrb.mxu3 %v3900_v58 }
 0xb94   : > { %4166 = vmatpush.msra.mxu0 %v3888_v30  ;;  %4131 = vmatpush.msrb.mxu2 %v3851_v43 }
 0xb95   : > { %4147 = vmatpush.msrb.mxu1 %v3871_v56  ;;  %4191 = vmatpush.msrb.mxu3 %v3899_v25  ;;  %v3923_v56 = vld [vmem:[%s8379_s19 + $0x460] sm:$0xff] }
 0xb96   : > { %4167 = vmatpush.msra.mxu0 %v3887_v18  ;;  %4132 = vmatpush.msrb.mxu2 %v3850_v14  ;;  %v3971_v18 = vld [vmem:[%s8379_s19 + $0x5e0] sm:$0xff] }
 0xb97   : > { %4148 = vmatpush.msrb.mxu1 %v3870_v23  ;;  %4192 = vmatpush.msrb.mxu3 %v3898_v55 }
 0xb98   : > { %4168 = vmatpush.msra.mxu0 %v3886_v17  ;;  %4133 = vmatpush.msrb.mxu2 %v3849_v63 }
 0xb99   : > { %4149 = vmatpush.msrb.mxu1 %v3869_v44  ;;  %4193 = vmatpush.msrb.mxu3 %v3897_v29  ;;  %v3970_v29 = vld [vmem:[%s8379_s19 + $0x5d8] sm:$0xff] }
 0xb9a   : > { %4169 = vmatpush.msra.mxu0 %v3885_v48  ;;  %4134 = vmatpush.msrb.mxu2 %v3848_v33  ;;  %v3921_v33 = vld [vmem:[%s8379_s19 + $0x450] sm:$0xff] }
 0xb9b   : > { %4150 = vmatpush.msrb.mxu1 %v3868_v60  ;;  %4194 = vmatpush.msrb.mxu3 %v3896_v8  ;;  %v3941_v60 = vld [vmem:[%s8379_s19 + $0x4f0] sm:$0xff] }
 0xb9c   : > { %4170 = vmatpush.msra.mxu0 %v3884_v22  ;;  %4135 = vmatpush.msrb.mxu2 %v3847_v61  ;;  %v3957_v22 = vld [vmem:[%s8379_s19 + $0x570] sm:$0xff]  ;;  %v3920_v61 = vld [vmem:[%s8379_s19 + $0x448] sm:$0xff] }
 0xb9d   : > { %4151 = vmatpush.msrb.mxu1 %v3867_v27  ;;  %4195 = vmatpush.msrb.mxu3 %v3895_v35  ;;  %v3969_v8 = vld [vmem:[%s8379_s19 + $0x5d0] sm:$0xff]  ;;  %v3940_v27 = vld [vmem:[%s8379_s19 + $0x4e8] sm:$0xff] }
 0xb9e   : > { %4171 = vmatpush.msra.mxu0 %v3883_v11  ;;  %v3956_v11 = vld [vmem:[%s8379_s19 + $0x568] sm:$0xff] }
 0xb9f   : > { %4152 = vmatpush.msrb.mxu1 %v3866_v49  ;;  %v3968_v35 = vld [vmem:[%s8379_s19 + $0x5c8] sm:$0xff]  ;;  %v3919_v49 = vld [vmem:[%s8379_s19 + $0x440] sm:$0xff] }
 0xba0   : > { %4172 = vmatpush.msra.mxu0 %v3882_v39  ;;  %v3939_v39 = vld [vmem:[%s8379_s19 + $0x4e0] sm:$0xff] }
 0xba1   : > { %4153 = vmatpush.msrb.mxu1 %v3865_v51  ;;  %v3955_v51 = vld [vmem:[%s8379_s19 + $0x560] sm:$0xff] }
 0xba2   : > { %4173 = vmatpush.msra.mxu0 %v3881_v10  ;;  %v3967_v10 = vld [vmem:[%s8379_s19 + $0x5c0] sm:$0xff] }
 0xba3   : > { %4154 = vmatpush.msrb.mxu1 %v3864_v57 }
 0xba4   : > { %4174 = vmatpush.msra.mxu0 %v3880_v20 }
 0xba5   : > { %4155 = vmatpush.msrb.mxu1 %v3863_v1  ;;  %v3918_v1 = vld [vmem:[%s8379_s19 + $0x438] sm:$0xff] }
 0xba6   : > { %4175 = vmatpush.msra.mxu0 %v3879_v40  ;;  %v3938_v40 = vld [vmem:[%s8379_s19 + $0x4d8] sm:$0xff] }
 0xbcd   : > { %v5120_v41 = vpop.permute.xlu2 %5119 }
 0xbce   : > { %v5122_v19 = vunpack.i.h.bf16 %v5120_v41  ;;  %v5121_v34 = vunpack.i.l.bf16 %v5120_v41  ;;  %v3954_v41 = vld [vmem:[%s8379_s19 + $0x558] sm:$0xff] }
 0xbd0   : > { %v3697_v46 = vsel %vm3477_vm8, %v3675_v6, %v5122_v19  ;;  %v3687_v4 = vsel %vm3477_vm8, %v7435_v12, %v5121_v34  ;;  %v3922_v12 = vld [vmem:[%s8379_s19 + $0x458] sm:$0xff]  ;;  %v3917_v34 = vld [vmem:[%s8379_s19 + $0x430] sm:$0xff] }
 0xbd1   : > { %v3966_v19 = vld [vmem:[%s8379_s19 + $0x5b8] sm:$0xff] }
 0xbd5   : > { %v5130_v47 = vpop.permute.xlu2 %5129 }
 0xbd6   : > { %v5132_v7 = vunpack.i.h.bf16 %v5130_v47  ;;  %v5131_v21 = vunpack.i.l.bf16 %v5130_v47  ;;  %v3915_v47 = vld [vmem:[%s8379_s19 + $0x420] sm:$0xff] }
 0xbd8   : > { %v3694_v25 = vsel %vm3477_vm8, %v3663_v38, %v5132_v7  ;;  %v3691_v14 = vsel %vm3477_vm8, %v3651_v54, %v5131_v21  ;;  %v3942_v54 = vld [vmem:[%s8379_s19 + $0x4f8] sm:$0xff] }
 0xbd9   : > { %v3958_v38 = vld [vmem:[%s8379_s19 + $0x578] sm:$0xff] }
 0xbe4   : > { %v5140_v45 = vpop.permute.xlu1 %5139  ;;  %v5125_v13 = vpop.permute.xlu0 %5124 }
 0xbe5   : > { %v5142_v37 = vunpack.i.h.bf16 %v5140_v45  ;;  %v5141_v0 = vunpack.i.l.bf16 %v5140_v45  ;;  %v5127_v52 = vunpack.i.h.bf16 %v5125_v13  ;;  %v5126_v15 = vunpack.i.l.bf16 %v5125_v13  ;;  %v3937_v45 = vld [vmem:[%s8379_s19 + $0x4d0] sm:$0xff] }
 0xbe6   : > { %v3953_v13 = vld [vmem:[%s8379_s19 + $0x550] sm:$0xff] }
 0xbe7   : > { %v3688_v31 = vsel %vm3458_vm10, %v3687_v4, %v5126_v15  ;;  %v3698_v24 = vsel %vm3458_vm10, %v3697_v46, %v5127_v52  ;;  %v3936_v52 = vld [vmem:[%s8379_s19 + $0x4c8] sm:$0xff]  ;;  %v5150_v4 = vpop.permute.xlu2 %5149 }
 0xbe8   : > { %v3690_v9 = vsel %vm3689_vm3, %v3688_v31, %v5141_v0  ;;  %v3699_v6 = vsel %vm3689_vm3, %v3698_v24, %v5142_v37  ;;  %v3965_v37 = vld [vmem:[%s8379_s19 + $0x5b0] sm:$0xff]  ;;  %v3916_v0 = vld [vmem:[%s8379_s19 + $0x428] sm:$0xff]  ;;  %v3935_v31 = vld [vmem:[%s8379_s19 + $0x4c0] sm:$0xff]  ;;  %v5152_v7 = vunpack.i.h.bf16 %v5150_v4  ;;  %v5151_v21 = vunpack.i.l.bf16 %v5150_v4 }
 0xbe9   : > { %4056 = vmatmul.f32.vlgmr.msra.gmra.mxu2 %v3690_v9  ;;  %4116 = vmatmul.f32.vlgmr.msra.gmra.mxu3 %v3699_v6  ;;  %v3763_v55 = vrot.slane %v3690_v9, 4  ;;  %v3766_v63 = vrot.slane %v3699_v6, 4  ;;  %v3952_v15 = vld [vmem:[%s8379_s19 + $0x548] sm:$0xff]  ;;  %v3914_v9 = vld [vmem:[%s8379_s19 + $0x418] sm:$0xff] }
 0xbea   : > { %4200 = vmatpush.msra.mxu2 %v3926_v42  ;;  %4260 = vmatpush.msra.mxu3 %v3974_v50  ;;  %v3964_v46 = vld [vmem:[%s8379_s19 + $0x5a8] sm:$0xff]  ;;  %v3951_v42 = vld [vmem:[%s8379_s19 + $0x540] sm:$0xff]  ;;  %v3934_v6 = vld [vmem:[%s8379_s19 + $0x4b8] sm:$0xff] }
 0xbeb   : > { %v3963_v50 = vld [vmem:[%s8379_s19 + $0x5a0] sm:$0xff]  ;;  %v3986_v4 = vld [vmem:[%s8379_s19 + $0x658] sm:$0xff] }
 0xbec   : > { %4201 = vmatpush.msra.mxu2 %v3925_v5  ;;  %4261 = vmatpush.msra.mxu3 %v3973_v26  ;;  %v5145_v36 = vpop.permute.xlu1 %5144  ;;  %v5135_v32 = vpop.permute.xlu0 %5134  ;;  %v3950_v5 = vld [vmem:[%s8379_s19 + $0x538] sm:$0xff] }
 0xbed   : > { %v5147_v3 = vunpack.i.h.bf16 %v5145_v36  ;;  %v5146_v30 = vunpack.i.l.bf16 %v5145_v36  ;;  %v5137_v58 = vunpack.i.h.bf16 %v5135_v32  ;;  %v5136_v43 = vunpack.i.l.bf16 %v5135_v32  ;;  %v3962_v26 = vld [vmem:[%s8379_s19 + $0x598] sm:$0xff]  ;;  %v3933_v36 = vld [vmem:[%s8379_s19 + $0x4b0] sm:$0xff] }
 0xbee   : > { %4202 = vmatpush.msra.mxu2 %v3924_v2  ;;  %4262 = vmatpush.msra.mxu3 %v3972_v62  ;;  %v3913_v62 = vld [vmem:[%s8379_s19 + $0x410] sm:$0xff] }
 0xbef   : > { %v3692_v23 = vsel %vm3458_vm10, %v3691_v14, %v5136_v43  ;;  %v3695_v17 = vsel %vm3458_vm10, %v3694_v25, %v5137_v58  ;;  %v3961_v58 = vld [vmem:[%s8379_s19 + $0x590] sm:$0xff]  ;;  %v3912_v43 = vld [vmem:[%s8379_s19 + $0x408] sm:$0xff]  ;;  %v3756_v14 = vsel %vm3477_vm8, %v3735_v28, %v5152_v7  ;;  %v3947_v28 = vld [vmem:[%s8379_s19 + $0x520] sm:$0xff] }
 0xbf0   : > { %4203 = vmatpush.msra.mxu2 %v3923_v56  ;;  %4263 = vmatpush.msra.mxu3 %v3971_v18  ;;  %v3693_v44 = vsel %vm3689_vm3, %v3692_v23, %v5146_v30  ;;  %v3696_v48 = vsel %vm3689_vm3, %v3695_v17, %v5147_v3  ;;  %v3949_v30 = vld [vmem:[%s8379_s19 + $0x530] sm:$0xff]  ;;  %v3932_v56 = vld [vmem:[%s8379_s19 + $0x4a8] sm:$0xff]  ;;  %v3747_v23 = vsel %vm3477_vm8, %v7500_v16, %v5151_v21  ;;  %v3927_v16 = vld [vmem:[%s8379_s19 + $0x480] sm:$0xff] }
 0xbf1   : > { %4076 = vmatmul.f32.vlgmr.msra.gmra.mxu1 %v3693_v44  ;;  %4096 = vmatmul.f32.vlgmr.msrb.gmra.mxu0 %v3696_v48  ;;  %v3764_v57 = vrot.slane %v3693_v44, 4  ;;  %v3765_v20 = vrot.slane %v3696_v48, 4  ;;  %v3948_v18 = vld [vmem:[%s8379_s19 + $0x528] sm:$0xff]  ;;  %v3931_v44 = vld [vmem:[%s8379_s19 + $0x4a0] sm:$0xff] }
 0xbf2   : > { %4136 = vmatmul.f32.vlgmr.msrb.gmra.mxu2 %v3763_v55  ;;  %4196 = vmatmul.f32.vlgmr.msrb.gmra.mxu3 %v3766_v63  ;;  %v3960_v25 = vld [vmem:[%s8379_s19 + $0x588] sm:$0xff]  ;;  %v3911_v63 = vld [vmem:[%s8379_s19 + $0x400] sm:$0xff] }
 0xbf3   : > { %4204 = vmatpush.msra.mxu2 %v3922_v12  ;;  %4220 = vmatpush.msra.mxu1 %v3942_v54  ;;  %v3959_v48 = vld [vmem:[%s8379_s19 + $0x580] sm:$0xff]  ;;  %v3984_v7 = vld [vmem:[%s8379_s19 + $0x648] sm:$0xff] }
 0xbf4   : > { %4240 = vmatpush.msrb.mxu0 %v3958_v38  ;;  %4264 = vmatpush.msra.mxu3 %v3970_v29  ;;  %v5155_v24 = vpop.permute.xlu0 %5154  ;;  %v5160_v2 = vpop.permute.xlu1 %5159  ;;  %v4004_v21 = vld [vmem:[%s8379_s19 + $0x6e8] sm:$0xff] }
 0xbf5   : > { %4205 = vmatpush.msra.mxu2 %v3921_v33  ;;  %4221 = vmatpush.msra.mxu1 %v3941_v60  ;;  %v5157_v32 = vunpack.i.h.bf16 %v5155_v24  ;;  %v5156_v3 = vunpack.i.l.bf16 %v5155_v24  ;;  %v5162_v17 = vunpack.i.h.bf16 %v5160_v2  ;;  %v5161_v55 = vunpack.i.l.bf16 %v5160_v2  ;;  %v5165_v38 = vpop.permute.xlu2 %5164  ;;  %v3990_v33 = vld [vmem:[%s8379_s19 + $0x678] sm:$0xff]  ;;  %v4020_v2 = vld [vmem:[%s8379_s19 + $0x768] sm:$0xff] }
 0xbf6   : > { %4241 = vmatpush.msrb.mxu0 %v3957_v22  ;;  %4265 = vmatpush.msra.mxu3 %v3969_v8  ;;  %v4038_v60 = vld [vmem:[%s8379_s19 + $0x7f8] sm:$0xff] }
 0xbf7   : > { %4206 = vmatpush.msra.mxu2 %v3920_v61  ;;  %4222 = vmatpush.msra.mxu1 %v3940_v27  ;;  %v3748_v12 = vsel %vm3458_vm10, %v3747_v23, %v5156_v3  ;;  %v3757_v54 = vsel %vm3458_vm10, %v3756_v14, %v5157_v32  ;;  %v3930_v61 = vld [vmem:[%s8379_s19 + $0x498] sm:$0xff]  ;;  %v4003_v32 = vld [vmem:[%s8379_s19 + $0x6e0] sm:$0xff]  ;;  %v4001_v14 = vld [vmem:[%s8379_s19 + $0x6d0] sm:$0xff] }
 0xbf8   : > { %4242 = vmatpush.msrb.mxu0 %v3956_v11  ;;  %4266 = vmatpush.msra.mxu3 %v3968_v35  ;;  %v8053_v22 = vsel %vm3689_vm3, %v3748_v12, %v5161_v55  ;;  %v8056_v8 = vsel %vm3689_vm3, %v3757_v54, %v5162_v17  ;;  %v3946_v27 = vld [vmem:[%s8379_s19 + $0x518] sm:$0xff]  ;;  %v5167_v11 = vunpack.i.h.bf16 %v5165_v38  ;;  %v5166_v35 = vunpack.i.l.bf16 %v5165_v38  ;;  %v4019_v3 = vld [vmem:[%s8379_s19 + $0x760] sm:$0xff]  ;;  %v4017_v23 = vld [vmem:[%s8379_s19 + $0x750] sm:$0xff] }
 0xbf9   : > { %4207 = vmatpush.msra.mxu2 %v3919_v49  ;;  %4223 = vmatpush.msra.mxu1 %v3939_v39  ;;  %v3989_v49 = vld [vmem:[%s8379_s19 + $0x670] sm:$0xff]  ;;  %v3980_v55 = vld [vmem:[%s8379_s19 + $0x628] sm:$0xff]  ;;  %v3999_v12 = vld [vmem:[%s8379_s19 + $0x6c0] sm:$0xff] }
 0xbfa   : > { %4243 = vmatpush.msrb.mxu0 %v3955_v51  ;;  %4267 = vmatpush.msra.mxu3 %v3967_v10  ;;  %v4037_v39 = vld [vmem:[%s8379_s19 + $0x7f0] sm:$0xff]  ;;  %v4015_v54 = vld [vmem:[%s8379_s19 + $0x740] sm:$0xff] }
 0xbfb   : > { %4156 = vmatmul.f32.vlgmr.msrb.gmra.mxu1 %v3764_v57  ;;  %4176 = vmatmul.f32.vlgmr.msra.gmra.mxu0 %v3765_v20  ;;  %v3929_v20 = vld [vmem:[%s8379_s19 + $0x490] sm:$0xff]  ;;  %v4027_v38 = vld [vmem:[%s8379_s19 + $0x7a0] sm:$0xff] }
 0xbfc   : > { %4208 = vmatpush.msra.mxu2 %v3918_v1  ;;  %4224 = vmatpush.msra.mxu1 %v3938_v40  ;;  %v5170_v29 = vpop.permute.xlu0 %5169  ;;  %v5175_v51 = vpop.permute.xlu1 %5174  ;;  %v3945_v1 = vld [vmem:[%s8379_s19 + $0x510] sm:$0xff]  ;;  %v3988_v40 = vld [vmem:[%s8379_s19 + $0x668] sm:$0xff] }
 0xbfd   : > { %4244 = vmatpush.msrb.mxu0 %v3954_v41  ;;  %4268 = vmatpush.msra.mxu3 %v3966_v19  ;;  %v5172_v10 = vunpack.i.h.bf16 %v5170_v29  ;;  %v5171_v57 = vunpack.i.l.bf16 %v5170_v29  ;;  %v4036_v41 = vld [vmem:[%s8379_s19 + $0x7e8] sm:$0xff]  ;;  %v4029_v17 = vld [vmem:[%s8379_s19 + $0x7b0] sm:$0xff]  ;;  %v3978_v29 = vld [vmem:[%s8379_s19 + $0x618] sm:$0xff] }
 0xbfe   : > { %4209 = vmatpush.msra.mxu2 %v3917_v34  ;;  %4225 = vmatpush.msra.mxu1 %v3937_v45  ;;  %v3928_v19 = vld [vmem:[%s8379_s19 + $0x488] sm:$0xff]  ;;  %v3753_v45 = vsel %vm3477_vm8, %v3723_v53, %v5167_v11  ;;  %v3997_v11 = vld [vmem:[%s8379_s19 + $0x6b0] sm:$0xff] }
 0xbff   : > { %4245 = vmatpush.msrb.mxu0 %v3953_v13  ;;  %4269 = vmatpush.msra.mxu3 %v3965_v37  ;;  %v3944_v34 = vld [vmem:[%s8379_s19 + $0x508] sm:$0xff]  ;;  %v3750_v13 = vsel %vm3477_vm8, %v3711_v59, %v5166_v35  ;;  %v5177_v37 = vunpack.i.h.bf16 %v5175_v51  ;;  %v3754_v53 = vsel %vm3458_vm10, %v3753_v45, %v5172_v10  ;;  %v3943_v59 = vld [vmem:[%s8379_s19 + $0x500] sm:$0xff]  ;;  %v4013_v35 = vld [vmem:[%s8379_s19 + $0x730] sm:$0xff] }
 0xc00   : > { %4210 = vmatpush.msra.mxu2 %v3916_v0  ;;  %4226 = vmatpush.msra.mxu1 %v3936_v52  ;;  %v5176_v0 = vunpack.i.l.bf16 %v5175_v51  ;;  %v3987_v52 = vld [vmem:[%s8379_s19 + $0x660] sm:$0xff]  ;;  %v3996_v51 = vld [vmem:[%s8379_s19 + $0x6a8] sm:$0xff]  ;;  %v3994_v45 = vld [vmem:[%s8379_s19 + $0x698] sm:$0xff] }
 0xc01   : > { %4246 = vmatpush.msrb.mxu0 %v3952_v15  ;;  %4270 = vmatpush.msra.mxu3 %v3964_v46  ;;  %v4035_v15 = vld [vmem:[%s8379_s19 + $0x7e0] sm:$0xff]  ;;  %v3751_v46 = vsel %vm3458_vm10, %v3750_v13, %v5171_v57  ;;  %v8120_v24 = vsel %vm3689_vm3, %v3754_v53, %v5177_v37  ;;  %v4012_v10 = vld [vmem:[%s8379_s19 + $0x728] sm:$0xff]  ;;  %v4010_v13 = vld [vmem:[%s8379_s19 + $0x718] sm:$0xff] }
 0xc02   : > { %4211 = vmatpush.msra.mxu2 %v3915_v47  ;;  %4227 = vmatpush.msra.mxu1 %v3935_v31  ;;  %v4006_v47 = vld [vmem:[%s8379_s19 + $0x6f8] sm:$0xff]  ;;  %v8117_v31 = vsel %vm3689_vm3, %v3751_v46, %v5176_v0  ;;  %v4024_v57 = vld [vmem:[%s8379_s19 + $0x788] sm:$0xff]  ;;  %v3777_v53 = vrot.slane %v8120_v24, 4 }
 0xc03   : > { %4247 = vmatpush.msrb.mxu0 %v3951_v42  ;;  %4271 = vmatpush.msra.mxu3 %v3963_v50  ;;  %v4022_v42 = vld [vmem:[%s8379_s19 + $0x778] sm:$0xff]  ;;  %v3992_v37 = vld [vmem:[%s8379_s19 + $0x688] sm:$0xff]  ;;  %v3776_v46 = vrot.slane %v8117_v31, 4 }
 0xc04   : > { %4212 = vmatpush.msra.mxu2 %v3914_v9  ;;  %4228 = vmatpush.msra.mxu1 %v3934_v6  ;;  %v4034_v50 = vld [vmem:[%s8379_s19 + $0x7d8] sm:$0xff]  ;;  %v3985_v9 = vld [vmem:[%s8379_s19 + $0x650] sm:$0xff]  ;;  %v4008_v0 = vld [vmem:[%s8379_s19 + $0x708] sm:$0xff] }
 0xc05   : > { %4248 = vmatpush.msrb.mxu0 %v3950_v5  ;;  %4272 = vmatpush.msra.mxu3 %v3962_v26  ;;  %v4005_v6 = vld [vmem:[%s8379_s19 + $0x6f0] sm:$0xff] }
 0xc06   : > { %4213 = vmatpush.msra.mxu2 %v3913_v62  ;;  %4229 = vmatpush.msra.mxu1 %v3933_v36  ;;  %v4021_v5 = vld [vmem:[%s8379_s19 + $0x770] sm:$0xff]  ;;  %v4032_v62 = vld [vmem:[%s8379_s19 + $0x7c8] sm:$0xff]  ;;  %v3983_v36 = vld [vmem:[%s8379_s19 + $0x640] sm:$0xff] }
 0xc07   : > { %4249 = vmatpush.msrb.mxu0 %v3949_v30  ;;  %4273 = vmatpush.msra.mxu3 %v3961_v58  ;;  %v4033_v26 = vld [vmem:[%s8379_s19 + $0x7d0] sm:$0xff]  ;;  %v4031_v30 = vld [vmem:[%s8379_s19 + $0x7c0] sm:$0xff]  ;;  %v3982_v58 = vld [vmem:[%s8379_s19 + $0x638] sm:$0xff] }
 0xc08   : > { %4214 = vmatpush.msra.mxu2 %v3912_v43  ;;  %4230 = vmatpush.msra.mxu1 %v3932_v56  ;;  %v4002_v43 = vld [vmem:[%s8379_s19 + $0x6d8] sm:$0xff] }
 0xc09   : > { %4250 = vmatpush.msrb.mxu0 %v3948_v18  ;;  %4274 = vmatpush.msra.mxu3 %v3960_v25  ;;  %v4018_v56 = vld [vmem:[%s8379_s19 + $0x758] sm:$0xff]  ;;  %v3981_v25 = vld [vmem:[%s8379_s19 + $0x630] sm:$0xff] }
 0xc0a   : > { %4215 = vmatpush.msra.mxu2 %v3911_v63  ;;  %4231 = vmatpush.msra.mxu1 %v3931_v44  ;;  %v4030_v18 = vld [vmem:[%s8379_s19 + $0x7b8] sm:$0xff]  ;;  %v4000_v63 = vld [vmem:[%s8379_s19 + $0x6c8] sm:$0xff] }
 0xc0b   : > { %4251 = vmatpush.msrb.mxu0 %v3947_v28  ;;  %4275 = vmatpush.msra.mxu3 %v3959_v48  ;;  %v4016_v44 = vld [vmem:[%s8379_s19 + $0x748] sm:$0xff]  ;;  %v3979_v48 = vld [vmem:[%s8379_s19 + $0x620] sm:$0xff] }
 0xc0c   : > { %4216 = vmatmul.f32.vlgmr.msra.gmra.mxu2 %v8053_v22  ;;  %4276 = vmatmul.f32.vlgmr.msra.gmra.mxu3 %v8056_v8  ;;  %v4028_v28 = vld [vmem:[%s8379_s19 + $0x7a8] sm:$0xff] }
 0xc0d   : > { %4280 = vmatpush.msrb.mxu2 %v3990_v33  ;;  %4340 = vmatpush.msrb.mxu3 %v4038_v60  ;;  %v3998_v33 = vld [vmem:[%s8379_s19 + $0x6b8] sm:$0xff] }
 0xc0e   : > { %4232 = vmatpush.msra.mxu1 %v3930_v61  ;;  %4252 = vmatpush.msrb.mxu0 %v3946_v27  ;;  %v4014_v60 = vld [vmem:[%s8379_s19 + $0x738] sm:$0xff]  ;;  %v3977_v27 = vld [vmem:[%s8379_s19 + $0x610] sm:$0xff] }
 0xc0f   : > { %4281 = vmatpush.msrb.mxu2 %v3989_v49  ;;  %4341 = vmatpush.msrb.mxu3 %v4037_v39  ;;  %v4026_v61 = vld [vmem:[%s8379_s19 + $0x798] sm:$0xff]  ;;  %v4025_v49 = vld [vmem:[%s8379_s19 + $0x790] sm:$0xff]  ;;  %v3976_v39 = vld [vmem:[%s8379_s19 + $0x608] sm:$0xff] }
 0xc10   : > { %4233 = vmatpush.msra.mxu1 %v3929_v20  ;;  %4253 = vmatpush.msrb.mxu0 %v3945_v1  ;;  %v3975_v20 = vld [vmem:[%s8379_s19 + $0x600] sm:$0xff] }
 0xc11   : > { %4282 = vmatpush.msrb.mxu2 %v3988_v40  ;;  %4342 = vmatpush.msrb.mxu3 %v4036_v41  ;;  %v3995_v1 = vld [vmem:[%s8379_s19 + $0x6a0] sm:$0xff] }
 0xc12   : > { %4234 = vmatpush.msra.mxu1 %v3928_v19  ;;  %4254 = vmatpush.msrb.mxu0 %v3944_v34  ;;  %v4011_v40 = vld [vmem:[%s8379_s19 + $0x720] sm:$0xff]  ;;  %v3775_v19 = vrot.slane %v8053_v22, 4  ;;  %v3778_v34 = vrot.slane %v8056_v8, 4  ;;  %v3993_v22 = vld [vmem:[%s8379_s19 + $0x690] sm:$0xff] }
 0xc13   : > { %4283 = vmatpush.msrb.mxu2 %v3987_v52  ;;  %4343 = vmatpush.msrb.mxu3 %v4035_v15  ;;  %v4023_v41 = vld [vmem:[%s8379_s19 + $0x780] sm:$0xff]  ;;  %v4009_v8 = vld [vmem:[%s8379_s19 + $0x710] sm:$0xff] }
 0xc14   : > { %4235 = vmatpush.msra.mxu1 %v3927_v16  ;;  %4255 = vmatpush.msrb.mxu0 %v3943_v59  ;;  %v3991_v52 = vld [vmem:[%s8379_s19 + $0x680] sm:$0xff]  ;;  %v4368_v16 = vld [vmem:[%s8381_s21 + $0x38] sm:$0xff]  ;;  %v4367_v59 = vld [vmem:[%s8381_s21 + $0x30] sm:$0xff] }
 0xc15   : > { %4236 = vmatmul.f32.vlgmr.msra.gmra.mxu1 %v8117_v31  ;;  %4256 = vmatmul.f32.vlgmr.msrb.gmra.mxu0 %v8120_v24  ;;  %v4007_v15 = vld [vmem:[%s8379_s19 + $0x700] sm:$0xff] }
 0xc16   : > { %4284 = vmatpush.msrb.mxu2 %v3986_v4  ;;  %4300 = vmatpush.msrb.mxu1 %v4006_v47  ;;  %v4039_v4 = vld [vmem:[%s8380_s20] sm:$0x1] }
 0xc17   : > { %4320 = vmatpush.msra.mxu0 %v4022_v42  ;;  %4344 = vmatpush.msrb.mxu3 %v4034_v50 }
 0xc18   : > { %4285 = vmatpush.msrb.mxu2 %v3985_v9  ;;  %4301 = vmatpush.msrb.mxu1 %v4005_v6 }
 0xc19   : > { %4321 = vmatpush.msra.mxu0 %v4021_v5  ;;  %4345 = vmatpush.msrb.mxu3 %v4033_v26  ;;  %v4366_v26 = vld [vmem:[%s8381_s21 + $0x28] sm:$0xff] }
 0xc1a   : > { %4286 = vmatpush.msrb.mxu2 %v3984_v7  ;;  %4302 = vmatpush.msrb.mxu1 %v4004_v21  ;;  %v4365_v21 = vld [vmem:[%s8381_s21 + $0x20] sm:$0xff] }
 0xc1b   : > { %4322 = vmatpush.msra.mxu0 %v4020_v2  ;;  %4346 = vmatpush.msrb.mxu3 %v4032_v62 }
 0xc1c   : > { %4287 = vmatpush.msrb.mxu2 %v3983_v36  ;;  %4303 = vmatpush.msrb.mxu1 %v4003_v32  ;;  %v4364_v36 = vld [vmem:[%s8381_s21 + $0x18] sm:$0xff]  ;;  %v4363_v32 = vld [vmem:[%s8381_s21 + $0x10] sm:$0xff] }
 0xc1d   : > { %4323 = vmatpush.msra.mxu0 %v4019_v3  ;;  %4347 = vmatpush.msrb.mxu3 %v4031_v30  ;;  %v4362_v30 = vld [vmem:[%s8381_s21 + $0x8] sm:$0xff] }
 0xc1e   : > { %4288 = vmatpush.msrb.mxu2 %v3982_v58  ;;  %4304 = vmatpush.msrb.mxu1 %v4002_v43  ;;  %v4361_v58 = vld [vmem:[%s8381_s21] sm:$0xff]  ;;  %v4395_v43 = vld [vmem:[%s8383_s23 + $0x8] sm:$0xff] }
 0xc1f   : > { %4324 = vmatpush.msra.mxu0 %v4018_v56  ;;  %4348 = vmatpush.msrb.mxu3 %v4030_v18 }
 0xc20   : > { %4289 = vmatpush.msrb.mxu2 %v3981_v25  ;;  %4305 = vmatpush.msrb.mxu1 %v4001_v14 }
 0xc21   : > { %4325 = vmatpush.msra.mxu0 %v4017_v23  ;;  %4349 = vmatpush.msrb.mxu3 %v4029_v17 }
 0xc22   : > { %4290 = vmatpush.msrb.mxu2 %v3980_v55  ;;  %4306 = vmatpush.msrb.mxu1 %v4000_v63 }
 0xc23   : > { %4326 = vmatpush.msra.mxu0 %v4016_v44  ;;  %4350 = vmatpush.msrb.mxu3 %v4028_v28 }
 0xc24   : > { %4291 = vmatpush.msrb.mxu2 %v3979_v48  ;;  %4307 = vmatpush.msrb.mxu1 %v3999_v12 }
 0xc25   : > { %4327 = vmatpush.msra.mxu0 %v4015_v54  ;;  %4351 = vmatpush.msrb.mxu3 %v4027_v38 }
 0xc26   : > { %4292 = vmatpush.msrb.mxu2 %v3978_v29  ;;  %4308 = vmatpush.msrb.mxu1 %v3998_v33 }
 0xc27   : > { %4328 = vmatpush.msra.mxu0 %v4014_v60  ;;  %4352 = vmatpush.msrb.mxu3 %v4026_v61 }
 0xc28   : > { %4293 = vmatpush.msrb.mxu2 %v3977_v27  ;;  %4309 = vmatpush.msrb.mxu1 %v3997_v11 }
 0xc29   : > { %4329 = vmatpush.msra.mxu0 %v4013_v35  ;;  %4353 = vmatpush.msrb.mxu3 %v4025_v49  ;;  %v4394_v49 = vld [vmem:[%s8383_s23] sm:$0xff] }
 0xc2a   : > { %4294 = vmatpush.msrb.mxu2 %v3976_v39  ;;  %4310 = vmatpush.msrb.mxu1 %v3996_v51  ;;  %v4369_v39 = vld [vmem:[%s8382_s22] sm:$0x1] }
 0xc2b   : > { %4330 = vmatpush.msra.mxu0 %v4012_v10  ;;  %4354 = vmatpush.msrb.mxu3 %v4024_v57 }
 0xc2c   : > { %4295 = vmatpush.msrb.mxu2 %v3975_v20  ;;  %4311 = vmatpush.msrb.mxu1 %v3995_v1  ;;  %v4396_v20 = vld [vmem:[%s8384_s24] sm:$0x1] }
 0xc2d   : > { %4331 = vmatpush.msra.mxu0 %v4011_v40  ;;  %4355 = vmatpush.msrb.mxu3 %v4023_v41 }
 0xc2e   : > { %4296 = vmatmul.f32.vlgmr.msrb.gmra.mxu2 %v3775_v19  ;;  %4356 = vmatmul.f32.vlgmr.msrb.gmra.mxu3 %v3778_v34 }
 0xc2f   : > { %4312 = vmatpush.msrb.mxu1 %v3994_v45  ;;  %4332 = vmatpush.msra.mxu0 %v4010_v13 }
 0xc30   : > { %4381 = vmatpush.msra.mxu2 %v4368_v16 }
 0xc31   : > { %4313 = vmatpush.msrb.mxu1 %v3993_v22  ;;  %4333 = vmatpush.msra.mxu0 %v4009_v8 }
 0xc32   : > { %4382 = vmatpush.msra.mxu2 %v4367_v59 }
 0xc33   : > { %4314 = vmatpush.msrb.mxu1 %v3992_v37  ;;  %4334 = vmatpush.msra.mxu0 %v4008_v0 }
 0xc34   : > { %4383 = vmatpush.msra.mxu2 %v4366_v26 }
 0xc35   : > { %4315 = vmatpush.msrb.mxu1 %v3991_v52  ;;  %4335 = vmatpush.msra.mxu0 %v4007_v15 }
 0xc36   : > { %4316 = vmatmul.f32.vlgmr.msrb.gmra.mxu1 %v3776_v46  ;;  %4336 = vmatmul.f32.vlgmr.msra.gmra.mxu0 %v3777_v53 }
 0xc37   : > { %4384 = vmatpush.msra.mxu2 %v4365_v21  ;;  %4414 = vmatpush.msra.mxu1 %v4395_v43 }
 0xc39   : > { %4385 = vmatpush.msra.mxu2 %v4364_v36  ;;  %4415 = vmatpush.msra.mxu1 %v4394_v49 }
 0xc3b   : > { %4386 = vmatpush.msra.mxu2 %v4363_v32 }
 0xc3d   : > { %4387 = vmatpush.msra.mxu2 %v4362_v30 }
 0xc3f   : > { %4388 = vmatpush.msra.mxu2 %v4361_v58 }
 0xc6c   : > { %v4057_v47 = vpop.f32.mrf.mxu2  ;;  %v4117_v6 = vpop.f32.mrf.mxu3 }
 0xc6d   : > { %v4058_v31 = vadd.f32 %v4057_v47, %v4039_v4 }
 0xc6e   : > { %v4077_v24 = vpop.f32.mrf.mxu1  ;;  %v4097_v50 = vpop.f32.mrf.mxu0 }
 0xc6f   : > { %v4078_v42 = vadd.f32 %v4077_v24, %v4058_v31 }
 0xc71   : > { %v4098_v9 = vadd.f32 %v4097_v50, %v4078_v42 }
 0xc73   : > { %v4118_v5 = vadd.f32 %v4117_v6, %v4098_v9 }
 0xc75   : > { %v4137_v7 = vpop.f32.mrf.mxu2  ;;  %v4197_v25 = vpop.f32.mrf.mxu3 }
 0xc76   : > { %v4138_v2 = vadd.f32 %v4137_v7, %v4118_v5 }
 0xc78   : > { %v4157_v62 = vpop.f32.mrf.mxu1  ;;  %v4177_v56 = vpop.f32.mrf.mxu0 }
 0xc79   : > { %v4158_v3 = vadd.f32 %v4157_v62, %v4138_v2 }
 0xc7b   : > { %v4178_v18 = vadd.f32 %v4177_v56, %v4158_v3 }
 0xc7d   : > { %v4198_v23 = vadd.f32 %v4197_v25, %v4178_v18 }
 0xc8f   : > { %v4217_v14 = vpop.f32.mrf.mxu2  ;;  %v4277_v48 = vpop.f32.mrf.mxu3 }
 0xc90   : > { %v4218_v17 = vadd.f32 %v4217_v14, %v4198_v23 }
 0xc92   : > { %v4237_v55 = vpop.f32.mrf.mxu1  ;;  %v4257_v44 = vpop.f32.mrf.mxu0 }
 0xc93   : > { %v4238_v63 = vadd.f32 %v4237_v55, %v4218_v17 }
 0xc95   : > { %v4258_v28 = vadd.f32 %v4257_v44, %v4238_v63 }
 0xc97   : > { %v4278_v12 = vadd.f32 %v4277_v48, %v4258_v28 }
 0xcb1   : > { %v4297_v54 = vpop.f32.mrf.mxu2  ;;  %v4357_v27 = vpop.f32.mrf.mxu3 }
 0xcb2   : > { %v4298_v38 = vadd.f32 %v4297_v54, %v4278_v12 }
 0xcb3   : > { %v4317_v29 = vpop.f32.mrf.mxu1  ;;  %v4337_v60 = vpop.f32.mrf.mxu0 }
 0xcb4   : > { %v4318_v33 = vadd.f32 %v4317_v29, %v4298_v38 }
 0xcb6   : > { %v4338_v61 = vadd.f32 %v4337_v60, %v4318_v33 }
 0xcb8   : > { %v4358_v11 = vadd.f32 %v4357_v27, %v4338_v61 }
 0xcba   : > { %v4360_v35 = vmax.f32 %v4358_v11, 0.0 }
 0xcbc   : > { %4540 = vmatmul.msk.f32.vlgmr.msra.gmra.mxu2 %vm3458_vm10, %v4360_v35 }
 0xd3f   : > { %v4390_v51 = vpop.f32.mrf.mxu2 }
 0xd40   : > { %v4391_v10 = vadd.f32 %v4390_v51, %v4369_v39 }
 0xd42   : > { %v4393_v57 = vmax.f32 %v4391_v10, 0.0 }
 0xd44   : > { %4541 = vmatmul.msk.f32.vlgmr.msra.gmra.mxu1 %vm2442_vm7, %v4393_v57 }
 0xdc1   : > { %v4417_v1 = vpop.f32.mrf.mxu1 }
 0xdc2   : > { %v4418_v40 = vadd.f32 %v4417_v1, %v4396_v20 }
 0xdc4   : > { %4420 = vst [vmem:[%s764_s12] sm:$0x1] %v4418_v40 }
 0xdc5   : > { %5205 = shalt.err (!%p5202_p3)
}
 0xdc6   : > { %4545 = dma.vmem_to_hbm [thread:$0]  (%p5473_p5), %s4433_s13, 16, %s4435_s0, %s4422_s10  }
 0xdc7 PF: > { %p4551_p4 = scmp.ge.s32.totalorder %s5240_s30, 2  ;;  %s4446_s11 = sand.u32 1, %s5228_s29  }
 0xdc8   : > { %s4447_s5 = scalar_lea.sflag [#allocation7], %s4446_s11 }
 0xdc9   : > { %p4548_p7 = pnand %p4551_p4, %p5477_p6 }
 0xdcb   : > { %p4549_p8 = pneg %p4548_p7 }
 0xdcd   : > { %5223 = dma.done.wait (%p4549_p8), %s4447_s5, 16  }
 0xdce   : > { %5225 = vsyncadd (%p4549_p8), %s4447_s5, 4294967280  ;;  %s8698_s4 = sld [smem:[#allocation9_spill]]  ;;  %p43_p9 = scmp.ge.s32.totalorder %s5460_s18, 4  }
 0xdcf   : > { %s8699_s29 = smov %s5232_s2  ;;  %s8700_s2 = smov %s5236_s6 }
 0xdd0   : > { %s8702_s30 = smov %s5460_s18  ;;  %45 = sbr.rel (!%p43_p9) target bundleno = 16 (0x10), region = 155 }
 0xdd4   : > { %s8701_s6 = smov %s8698_s4 }
 0xdd5   :  { %4452 = vsyncpa [#allocation7], 1 }
 0xdd6   :  { %4454 = vsyncpa [#allocation7 + $0x1], 1 }

</bundles_post_ra>
